<compile_context>
chip_gen: v7x
topology: tpu7x:2x2x1
jax: 0.10.0
libtpu: 0.0.40
codegen_flags: <defaults>
</compile_context>

<pallas_src>
import math
from functools import partial

import jax
import jax.numpy as jnp
from jax import lax
from jax.experimental import pallas as pl
from jax.experimental.pallas import tpu as pltpu

EMBED = 1024                 # hard-coded in the PyTorch module
N_HEAD = 8
HEAD_DIM = EMBED // N_HEAD   # 128 -> one lane-tile per head
PATCH = 16
MLP_HIDDEN = 4 * EMBED
LN_EPS = 1e-5
_INV_SQRT2 = 1.0 / math.sqrt(2.0)
_VMEM_LIMIT = 32 * 1024 * 1024      # raise scoped-VMEM limit (v5e default is 16 MiB)

_DN_QKT = (((1,), (1,)), ((), ()))  # q @ k^T contracting head_dim, no explicit transpose


def _cp():
    return pltpu.CompilerParams(dimension_semantics=("parallel",),
                                vmem_limit_bytes=_VMEM_LIMIT)


# --------------------- kernel 1: patch embed + fused QKV (head-major bf16 out) ---------------------
def _patch_qkv_kernel(p_ref, wp_ref, bp_ref, wq_ref, bq_ref, o_ref):
    # tokens = patches @ w_patch + b_patch       (full K=256, recomputed per N tile — negligible)
    tok = jnp.dot(p_ref[...].astype(jnp.bfloat16), wp_ref[...],
                  preferred_element_type=jnp.float32) + bp_ref[...]
    # qkv tile = tokens @ w_qkv[:, tile] + bias  (full K=1024 -> no K grid axis / accumulator)
    y = jnp.dot(tok.astype(jnp.bfloat16), wq_ref[...],
                preferred_element_type=jnp.float32) + bq_ref[...]
    y = y.astype(o_ref.dtype)
    # scatter the (M, tn) tile into head-major (tn/128, M, 128) layout: static 128-wide tile copies
    for c in range(y.shape[-1] // HEAD_DIM):
        o_ref[c] = y[:, c * HEAD_DIM:(c + 1) * HEAD_DIM]


def patch_embed_qkv(patches, w_patch, b_patch, w_qkv, b_qkv, *, tn=1536):
    M, P2 = patches.shape
    K, threeE = w_qkv.shape
    assert w_patch.shape == (P2, K) and threeE % tn == 0 and tn % HEAD_DIM == 0
    n_blk = threeE // HEAD_DIM                      # 24 head-major column blocks [Q0..7|K0..7|V0..7]
    return pl.pallas_call(
        _patch_qkv_kernel,
        out_shape=jax.ShapeDtypeStruct((n_blk, M, HEAD_DIM), jnp.bfloat16),
        grid=(threeE // tn,),
        in_specs=[
            pl.BlockSpec((M, P2), lambda j: (0, 0)),
            pl.BlockSpec((P2, K), lambda j: (0, 0)),
            pl.BlockSpec((1, K), lambda j: (0, 0)),
            pl.BlockSpec((K, tn), lambda j: (0, j)),
            pl.BlockSpec((1, tn), lambda j: (0, j)),
        ],
        out_specs=pl.BlockSpec((tn // HEAD_DIM, M, HEAD_DIM), lambda j: (j, 0, 0)),
        compiler_params=_cp(),
    )(patches, w_patch, b_patch.reshape(1, K), w_qkv, b_qkv.reshape(1, threeE))


# --------------------- kernel 2: attention (head-major, fori_loop over heads) ---------------------
def _attn_past_kernel(q_ref, k_ref, v_ref, o_ref, *, scale):
    # q: (H, T, hd) last channel; k/v: (H, 2T, hd) = [prev ; last] rows. No mask (layer_past path).
    def head(h, carry):
        q = q_ref[h]                                    # (T, hd)  bf16
        k = k_ref[h]                                    # (2T, hd) bf16
        v = v_ref[h]
        s = lax.dot_general(q, k, _DN_QKT, preferred_element_type=jnp.float32) * scale
        m = jnp.max(s, axis=-1, keepdims=True)
        p = jnp.exp(s - m)
        den = jnp.sum(p, axis=-1, keepdims=True)        # exact division (no approx reciprocal)
        o = jnp.dot(p.astype(v.dtype), v, preferred_element_type=jnp.float32) / den
        o_ref[h] = o.astype(o_ref.dtype)
        return carry
    lax.fori_loop(0, N_HEAD, head, 0, unroll=2)


def _attn_causal_kernel(q_ref, k_ref, v_ref, o_ref, *, scale):
    T = q_ref.shape[1]
    row = lax.broadcasted_iota(jnp.int32, (T, T), 0)
    col = lax.broadcasted_iota(jnp.int32, (T, T), 1)
    keep = col <= row                                   # diagonal always kept -> no NaN rows

    def head(h, carry):
        q = q_ref[h]
        k = k_ref[h]
        v = v_ref[h]
        s = lax.dot_general(q, k, _DN_QKT, preferred_element_type=jnp.float32) * scale
        s = jnp.where(keep, s, -jnp.inf)
        m = jnp.max(s, axis=-1, keepdims=True)
        p = jnp.exp(s - m)
        den = jnp.sum(p, axis=-1, keepdims=True)
        o = jnp.dot(p.astype(v.dtype), v, preferred_element_type=jnp.float32) / den
        o_ref[h] = o.astype(o_ref.dtype)
        return carry
    lax.fori_loop(0, N_HEAD, head, 0, unroll=2)


def attention_with_past(qkv3d, B, T):
    """qkv3d: (3*n_head, 2*B*T, 128) bf16, rows ordered (batch, [prev, last], token)."""
    nb, M2, hd = qkv3d.shape
    assert nb == 3 * N_HEAD and hd == HEAD_DIM and M2 == 2 * B * T
    scale = 1.0 / math.sqrt(HEAD_DIM)
    return pl.pallas_call(
        partial(_attn_past_kernel, scale=scale),
        out_shape=jax.ShapeDtypeStruct((N_HEAD, B * T, HEAD_DIM), jnp.bfloat16),
        grid=(B,),
        in_specs=[
            pl.BlockSpec((N_HEAD, T, HEAD_DIM), lambda b: (0, 2 * b + 1, 0)),      # Q, last chan
            pl.BlockSpec((N_HEAD, 2 * T, HEAD_DIM), lambda b: (1, b, 0)),          # K, prev+last
            pl.BlockSpec((N_HEAD, 2 * T, HEAD_DIM), lambda b: (2, b, 0)),          # V, prev+last
        ],
        out_specs=pl.BlockSpec((N_HEAD, T, HEAD_DIM), lambda b: (0, b, 0)),
        compiler_params=_cp(),
    )(qkv3d, qkv3d, qkv3d)


def attention_causal(qkv3d, B, T):
    """qkv3d: (3*n_head, B*T, 128) bf16 (single channel, layer_past is None -> causal mask)."""
    nb, M, hd = qkv3d.shape
    assert nb == 3 * N_HEAD and hd == HEAD_DIM and M == B * T
    scale = 1.0 / math.sqrt(HEAD_DIM)
    return pl.pallas_call(
        partial(_attn_causal_kernel, scale=scale),
        out_shape=jax.ShapeDtypeStruct((N_HEAD, B * T, HEAD_DIM), jnp.bfloat16),
        grid=(B,),
        in_specs=[
            pl.BlockSpec((N_HEAD, T, HEAD_DIM), lambda b: (0, b, 0)),
            pl.BlockSpec((N_HEAD, T, HEAD_DIM), lambda b: (1, b, 0)),
            pl.BlockSpec((N_HEAD, T, HEAD_DIM), lambda b: (2, b, 0)),
        ],
        out_specs=pl.BlockSpec((N_HEAD, T, HEAD_DIM), lambda b: (0, b, 0)),
        compiler_params=_cp(),
    )(qkv3d, qkv3d, qkv3d)


# --------------------- kernel 3: output projection ---------------------
def _proj_kernel(y_ref, w_ref, b_ref, o_ref):
    # gather head-major (H, M, 128) bf16 back into a lane-dense (M, E) operand (static tile concat)
    x = jnp.concatenate([y_ref[h] for h in range(N_HEAD)], axis=-1)
    o_ref[...] = jnp.dot(x, w_ref[...], preferred_element_type=jnp.float32) + b_ref[...]


def proj(y3d, w, b, *, tn=512):
    H, M, hd = y3d.shape
    E = H * hd
    assert w.shape == (E, EMBED) and EMBED % tn == 0
    return pl.pallas_call(
        _proj_kernel,
        out_shape=jax.ShapeDtypeStruct((M, EMBED), jnp.float32),
        grid=(EMBED // tn,),
        in_specs=[
            pl.BlockSpec((N_HEAD, M, HEAD_DIM), lambda j: (0, 0, 0)),
            pl.BlockSpec((E, tn), lambda j: (0, j)),
            pl.BlockSpec((1, tn), lambda j: (0, j)),
        ],
        out_specs=pl.BlockSpec((M, tn), lambda j: (0, j)),
        compiler_params=_cp(),
    )(y3d, w, b.reshape(1, EMBED))


# --------------------- kernel 4: LayerNorm fused into fc1 + exact GELU ---------------------
def _ln_fc1_gelu_kernel(x_ref, g_ref, bln_ref, w_ref, b_ref, o_ref):
    x = x_ref[...]                                       # fp32 (M, E), full rows -> exact LN stats
    mean = jnp.mean(x, axis=-1, keepdims=True)
    var = jnp.mean(jnp.square(x - mean), axis=-1, keepdims=True)
    xn = (x - mean) * lax.rsqrt(var + LN_EPS) * g_ref[...] + bln_ref[...]
    y = jnp.dot(xn.astype(jnp.bfloat16), w_ref[...],
                preferred_element_type=jnp.float32) + b_ref[...]
    y = 0.5 * y * (1.0 + lax.erf(y * _INV_SQRT2))        # exact (erf) GELU, torch.nn.GELU default
    o_ref[...] = y.astype(o_ref.dtype)


def ln_fc1_gelu(x, ln_g, ln_b, w, b, *, tn=2048):
    M, E = x.shape
    _, N = w.shape
    assert N % tn == 0
    return pl.pallas_call(
        _ln_fc1_gelu_kernel,
        out_shape=jax.ShapeDtypeStruct((M, N), jnp.bfloat16),
        grid=(N // tn,),
        in_specs=[
            pl.BlockSpec((M, E), lambda j: (0, 0)),
            pl.BlockSpec((1, E), lambda j: (0, 0)),
            pl.BlockSpec((1, E), lambda j: (0, 0)),
            pl.BlockSpec((E, tn), lambda j: (0, j)),
            pl.BlockSpec((1, tn), lambda j: (0, j)),
        ],
        out_specs=pl.BlockSpec((M, tn), lambda j: (0, j)),
        compiler_params=_cp(),
    )(x, ln_g.reshape(1, E), ln_b.reshape(1, E), w, b.reshape(1, N))


# --------------------- kernel 5: fc2 with residual add fused into the epilogue ---------------------
def _fc2_residual_kernel(h_ref, w_ref, b_ref, r_ref, o_ref):
    y = jnp.dot(h_ref[...], w_ref[...], preferred_element_type=jnp.float32)
    o_ref[...] = y + b_ref[...] + r_ref[...]


def fc2_residual(h, w, b, resid, *, tn=512):
    M, K = h.shape
    _, N = w.shape
    assert N % tn == 0 and resid.shape == (M, N)
    return pl.pallas_call(
        _fc2_residual_kernel,
        out_shape=jax.ShapeDtypeStruct((M, N), jnp.float32),
        grid=(N // tn,),
        in_specs=[
            pl.BlockSpec((M, K), lambda j: (0, 0)),
            pl.BlockSpec((K, tn), lambda j: (0, j)),
            pl.BlockSpec((1, tn), lambda j: (0, j)),
            pl.BlockSpec((M, tn), lambda j: (0, j)),
        ],
        out_specs=pl.BlockSpec((M, tn), lambda j: (0, j)),
        compiler_params=_cp(),
    )(h, w, b.reshape(1, N), resid)


# --------------------- model wiring (glue) ---------------------
def _extract_patches(x_slices):
    """x_slices: (G, H, W) -> (G*T, PATCH*PATCH) patch rows in (slice, hp, wp) order."""
    G, H, W = x_slices.shape
    Hp, Wp = H // PATCH, W // PATCH
    p = x_slices.reshape(G, Hp, PATCH, Wp, PATCH)
    p = p.transpose(0, 1, 3, 2, 4).reshape(G * Hp * Wp, PATCH * PATCH)
    return p, Hp * Wp


def attn_head_forward(params, x):
    """Channel-looped module semantics: only the final channel's attention output is consumed,
    its KV past is the previous channel's K/V (the module stacks `present` before the past
    concat), so channels 0..C-3 are dead work.  layer_past != None -> no causal mask."""
    B, C, H, W = x.shape
    assert H % PATCH == 0 and W % PATCH == 0
    if C >= 2:
        xs = x[:, C - 2:C].reshape(B * 2, H, W)      # rows ordered (batch, [prev, last])
    else:
        xs = x[:, 0]
    patches, T = _extract_patches(xs)
    assert T % 8 == 0 and (B * T) % 8 == 0

    qkv3d = patch_embed_qkv(patches, params["w_patch"], params["b_patch"],
                            params["w_qkv"], params["b_qkv"])          # (24, rows, 128) bf16

    if C >= 2:
        y3d = attention_with_past(qkv3d, B, T)       # (n_head, B*T, 128) bf16
    else:
        y3d = attention_causal(qkv3d, B, T)
    # TODO(synk): attn_drop / resid_drop are identity here (eval-mode forward)

    out2d = proj(y3d, params["w_proj"], params["b_proj"])              # (B*T, E) fp32
    h = ln_fc1_gelu(out2d, params["ln_g"], params["ln_b"],
                    params["w_fc1"], params["b_fc1"])                  # (B*T, 4E) bf16
    out = fc2_residual(h, params["w_fc2"], params["b_fc2"], out2d)     # (B*T, E) fp32
    return out.reshape(B, T, EMBED)


# --------------------- parameters ---------------------
def init_params(key):
    ks = jax.random.split(key, 16)

    def w(k, shape, scale=0.02):
        return (scale * jax.random.normal(k, shape)).astype(jnp.float32)

    return dict(
        # Conv2d(1, 1024, 16, 16) expressed as a (p*p, EMBED) matmul weight
        w_patch=w(ks[0], (PATCH * PATCH, EMBED)), b_patch=w(ks[1], (EMBED,)),
        w_k=w(ks[2], (EMBED, EMBED)), b_k=w(ks[3], (EMBED,)),
        w_q=w(ks[4], (EMBED, EMBED)), b_q=w(ks[5], (EMBED,)),
        w_v=w(ks[6], (EMBED, EMBED)), b_v=w(ks[7], (EMBED,)),
        w_proj=w(ks[8], (EMBED, EMBED)), b_proj=w(ks[9], (EMBED,)),
        ln_g=(1.0 + w(ks[10], (EMBED,), 0.1)).astype(jnp.float32),
        ln_b=w(ks[11], (EMBED,), 0.1),
        w_fc1=w(ks[12], (EMBED, MLP_HIDDEN)), b_fc1=w(ks[13], (MLP_HIDDEN,)),
        w_fc2=w(ks[14], (MLP_HIDDEN, EMBED)), b_fc2=w(ks[15], (EMBED,)),
    )


def prepare_params(p):
    """Fuse QKV into one weight (columns [Q | K | V]) and cast matmul weights to bf16;
    biases / LayerNorm params stay fp32 (all elementwise math is done in fp32 in-kernel)."""
    bf = lambda a: a.astype(jnp.bfloat16)
    w_qkv = jnp.concatenate([p["w_q"], p["w_k"], p["w_v"]], axis=1)
    b_qkv = jnp.concatenate([p["b_q"], p["b_k"], p["b_v"]], axis=0)
    return dict(
        w_patch=bf(p["w_patch"]), b_patch=p["b_patch"],
        w_qkv=bf(w_qkv), b_qkv=b_qkv,
        w_proj=bf(p["w_proj"]), b_proj=p["b_proj"],
        ln_g=p["ln_g"], ln_b=p["ln_b"],
        w_fc1=bf(p["w_fc1"]), b_fc1=p["b_fc1"],
        w_fc2=bf(p["w_fc2"]), b_fc2=p["b_fc2"],
    )


if __name__ == "__main__":
    key = jax.random.PRNGKey(0)
    kp, kx = jax.random.split(key)
    params = prepare_params(init_params(kp))
    # small input consistent with the module: NCHW, spatial divisible by patch=16
    B, C, H, W = 2, 3, 64, 64          # -> T = (64/16)^2 = 16 tokens per channel slice
    x = jax.random.normal(kx, (B, C, H, W), dtype=jnp.float32)
    out = attn_head_forward(params, x)
    out = jax.block_until_ready(out)
    assert out.shape == (B, (H // PATCH) * (W // PATCH), EMBED)
    assert bool(jnp.all(jnp.isfinite(out)))
    print("KERNEL_OK")
</pallas_src>

<mosaic_0001>
module attributes {stable_mosaic.version = 11 : i64} {
  func.func @_patch_qkv_kernel(%arg0: i32, %arg1: memref<64x256xf32, #tpu.memory_space<vmem>>, %arg2: memref<256x1024xbf16, #tpu.memory_space<vmem>>, %arg3: memref<1x1024xf32, #tpu.memory_space<vmem>>, %arg4: memref<1024x1536xbf16, #tpu.memory_space<vmem>>, %arg5: memref<1x1536xf32, #tpu.memory_space<vmem>>, %arg6: memref<12x64x128xbf16, #tpu.memory_space<vmem>>) attributes {dimension_semantics = [#tpu.dimension_semantics<parallel>], iteration_bounds = array<i64: 2>, scalar_prefetch = 0 : i64, scratch_operands = 0 : i64, tpu.core_type = #tpu.core_type<tc>, window_params = [{pipeline_mode = #tpu.pipeline_mode<synchronous>, transform_indices = @transform_0, window_bounds = array<i64: 64, 256>}, {pipeline_mode = #tpu.pipeline_mode<synchronous>, transform_indices = @transform_1, window_bounds = array<i64: 256, 1024>}, {pipeline_mode = #tpu.pipeline_mode<synchronous>, transform_indices = @transform_2, window_bounds = array<i64: 1, 1024>}, {transform_indices = @transform_3, window_bounds = array<i64: 1024, 1536>}, {transform_indices = @transform_4, window_bounds = array<i64: 1, 1536>}, {transform_indices = @transform_5, window_bounds = array<i64: 12, 64, 128>}]} {
    %c0 = arith.constant 0 : index
    %c0_0 = arith.constant 0 : index
    %0 = vector.load %arg1[%c0, %c0_0] : memref<64x256xf32, #tpu.memory_space<vmem>>, vector<64x256xf32>
    %1 = arith.truncf %0 : vector<64x256xf32> to vector<64x256xbf16>
    %c0_1 = arith.constant 0 : index
    %c0_2 = arith.constant 0 : index
    %2 = vector.load %arg2[%c0_1, %c0_2] : memref<256x1024xbf16, #tpu.memory_space<vmem>>, vector<256x1024xbf16>
    %cst = arith.constant dense<0.000000e+00> : vector<64x1024xf32>
    %3 = tpu.matmul %1, %2, %cst {dimension_numbers = #tpu.dot_dimension_numbers<[1], [0], [0], [1], [0, 0, 1, 1], [], []>} : vector<64x256xbf16>, vector<256x1024xbf16>, vector<64x1024xf32> -> vector<64x1024xf32>
    %c0_3 = arith.constant 0 : index
    %c0_4 = arith.constant 0 : index
    %4 = vector.load %arg3[%c0_3, %c0_4] : memref<1x1024xf32, #tpu.memory_space<vmem>>, vector<1x1024xf32>
    %5 = vector.broadcast %4 : vector<1x1024xf32> to vector<64x1024xf32>
    %6 = arith.addf %3, %5 : vector<64x1024xf32>
    %7 = arith.truncf %6 : vector<64x1024xf32> to vector<64x1024xbf16>
    %c0_5 = arith.constant 0 : index
    %c0_6 = arith.constant 0 : index
    %8 = vector.load %arg4[%c0_5, %c0_6] : memref<1024x1536xbf16, #tpu.memory_space<vmem>>, vector<1024x1536xbf16>
    %cst_7 = arith.constant dense<0.000000e+00> : vector<64x1536xf32>
    %9 = tpu.matmul %7, %8, %cst_7 {dimension_numbers = #tpu.dot_dimension_numbers<[1], [0], [0], [1], [0, 0, 1, 1], [], []>} : vector<64x1024xbf16>, vector<1024x1536xbf16>, vector<64x1536xf32> -> vector<64x1536xf32>
    %c0_8 = arith.constant 0 : index
    %c0_9 = arith.constant 0 : index
    %10 = vector.load %arg5[%c0_8, %c0_9] : memref<1x1536xf32, #tpu.memory_space<vmem>>, vector<1x1536xf32>
    %11 = vector.broadcast %10 : vector<1x1536xf32> to vector<64x1536xf32>
    %12 = arith.addf %9, %11 : vector<64x1536xf32>
    %13 = arith.truncf %12 : vector<64x1536xf32> to vector<64x1536xbf16>
    %14 = vector.extract_strided_slice %13 {offsets = [0, 0], sizes = [64, 128], strides = [1, 1]} : vector<64x1536xbf16> to vector<64x128xbf16>
    %c0_10 = arith.constant 0 : index
    %c0_11 = arith.constant 0 : index
    %c0_12 = arith.constant 0 : index
    %15 = vector.load %arg6[%c0_10, %c0_11, %c0_12] : memref<12x64x128xbf16, #tpu.memory_space<vmem>>, vector<1x64x128xbf16>
    %16 = vector.shape_cast %15 : vector<1x64x128xbf16> to vector<64x128xbf16>
    %17 = vector.shape_cast %14 : vector<64x128xbf16> to vector<1x64x128xbf16>
    tpu.vector_store %arg6[%c0_10, %c0_11, %c0_12], %17 {strides = array<i32>} : memref<12x64x128xbf16, #tpu.memory_space<vmem>>, vector<1x64x128xbf16>,
    %18 = vector.extract_strided_slice %13 {offsets = [0, 128], sizes = [64, 128], strides = [1, 1]} : vector<64x1536xbf16> to vector<64x128xbf16>
    %c1 = arith.constant 1 : index
    %c0_13 = arith.constant 0 : index
    %c0_14 = arith.constant 0 : index
    %19 = vector.load %arg6[%c1, %c0_13, %c0_14] : memref<12x64x128xbf16, #tpu.memory_space<vmem>>, vector<1x64x128xbf16>
    %20 = vector.shape_cast %19 : vector<1x64x128xbf16> to vector<64x128xbf16>
    %21 = vector.shape_cast %18 : vector<64x128xbf16> to vector<1x64x128xbf16>
    tpu.vector_store %arg6[%c1, %c0_13, %c0_14], %21 {strides = array<i32>} : memref<12x64x128xbf16, #tpu.memory_space<vmem>>, vector<1x64x128xbf16>,
    %22 = vector.extract_strided_slice %13 {offsets = [0, 256], sizes = [64, 128], strides = [1, 1]} : vector<64x1536xbf16> to vector<64x128xbf16>
    %c2 = arith.constant 2 : index
    %c0_15 = arith.constant 0 : index
    %c0_16 = arith.constant 0 : index
    %23 = vector.load %arg6[%c2, %c0_15, %c0_16] : memref<12x64x128xbf16, #tpu.memory_space<vmem>>, vector<1x64x128xbf16>
    %24 = vector.shape_cast %23 : vector<1x64x128xbf16> to vector<64x128xbf16>
    %25 = vector.shape_cast %22 : vector<64x128xbf16> to vector<1x64x128xbf16>
    tpu.vector_store %arg6[%c2, %c0_15, %c0_16], %25 {strides = array<i32>} : memref<12x64x128xbf16, #tpu.memory_space<vmem>>, vector<1x64x128xbf16>,
    %26 = vector.extract_strided_slice %13 {offsets = [0, 384], sizes = [64, 128], strides = [1, 1]} : vector<64x1536xbf16> to vector<64x128xbf16>
    %c3 = arith.constant 3 : index
    %c0_17 = arith.constant 0 : index
    %c0_18 = arith.constant 0 : index
    %27 = vector.load %arg6[%c3, %c0_17, %c0_18] : memref<12x64x128xbf16, #tpu.memory_space<vmem>>, vector<1x64x128xbf16>
    %28 = vector.shape_cast %27 : vector<1x64x128xbf16> to vector<64x128xbf16>
    %29 = vector.shape_cast %26 : vector<64x128xbf16> to vector<1x64x128xbf16>
    tpu.vector_store %arg6[%c3, %c0_17, %c0_18], %29 {strides = array<i32>} : memref<12x64x128xbf16, #tpu.memory_space<vmem>>, vector<1x64x128xbf16>,
    %30 = vector.extract_strided_slice %13 {offsets = [0, 512], sizes = [64, 128], strides = [1, 1]} : vector<64x1536xbf16> to vector<64x128xbf16>
    %c4 = arith.constant 4 : index
    %c0_19 = arith.constant 0 : index
    %c0_20 = arith.constant 0 : index
    %31 = vector.load %arg6[%c4, %c0_19, %c0_20] : memref<12x64x128xbf16, #tpu.memory_space<vmem>>, vector<1x64x128xbf16>
    %32 = vector.shape_cast %31 : vector<1x64x128xbf16> to vector<64x128xbf16>
    %33 = vector.shape_cast %30 : vector<64x128xbf16> to vector<1x64x128xbf16>
    tpu.vector_store %arg6[%c4, %c0_19, %c0_20], %33 {strides = array<i32>} : memref<12x64x128xbf16, #tpu.memory_space<vmem>>, vector<1x64x128xbf16>,
    %34 = vector.extract_strided_slice %13 {offsets = [0, 640], sizes = [64, 128], strides = [1, 1]} : vector<64x1536xbf16> to vector<64x128xbf16>
    %c5 = arith.constant 5 : index
    %c0_21 = arith.constant 0 : index
    %c0_22 = arith.constant 0 : index
    %35 = vector.load %arg6[%c5, %c0_21, %c0_22] : memref<12x64x128xbf16, #tpu.memory_space<vmem>>, vector<1x64x128xbf16>
    %36 = vector.shape_cast %35 : vector<1x64x128xbf16> to vector<64x128xbf16>
    %37 = vector.shape_cast %34 : vector<64x128xbf16> to vector<1x64x128xbf16>
    tpu.vector_store %arg6[%c5, %c0_21, %c0_22], %37 {strides = array<i32>} : memref<12x64x128xbf16, #tpu.memory_space<vmem>>, vector<1x64x128xbf16>,
    %38 = vector.extract_strided_slice %13 {offsets = [0, 768], sizes = [64, 128], strides = [1, 1]} : vector<64x1536xbf16> to vector<64x128xbf16>
    %c6 = arith.constant 6 : index
    %c0_23 = arith.constant 0 : index
    %c0_24 = arith.constant 0 : index
    %39 = vector.load %arg6[%c6, %c0_23, %c0_24] : memref<12x64x128xbf16, #tpu.memory_space<vmem>>, vector<1x64x128xbf16>
    %40 = vector.shape_cast %39 : vector<1x64x128xbf16> to vector<64x128xbf16>
    %41 = vector.shape_cast %38 : vector<64x128xbf16> to vector<1x64x128xbf16>
    tpu.vector_store %arg6[%c6, %c0_23, %c0_24], %41 {strides = array<i32>} : memref<12x64x128xbf16, #tpu.memory_space<vmem>>, vector<1x64x128xbf16>,
    %42 = vector.extract_strided_slice %13 {offsets = [0, 896], sizes = [64, 128], strides = [1, 1]} : vector<64x1536xbf16> to vector<64x128xbf16>
    %c7 = arith.constant 7 : index
    %c0_25 = arith.constant 0 : index
    %c0_26 = arith.constant 0 : index
    %43 = vector.load %arg6[%c7, %c0_25, %c0_26] : memref<12x64x128xbf16, #tpu.memory_space<vmem>>, vector<1x64x128xbf16>
    %44 = vector.shape_cast %43 : vector<1x64x128xbf16> to vector<64x128xbf16>
    %45 = vector.shape_cast %42 : vector<64x128xbf16> to vector<1x64x128xbf16>
    tpu.vector_store %arg6[%c7, %c0_25, %c0_26], %45 {strides = array<i32>} : memref<12x64x128xbf16, #tpu.memory_space<vmem>>, vector<1x64x128xbf16>,
    %46 = vector.extract_strided_slice %13 {offsets = [0, 1024], sizes = [64, 128], strides = [1, 1]} : vector<64x1536xbf16> to vector<64x128xbf16>
    %c8 = arith.constant 8 : index
    %c0_27 = arith.constant 0 : index
    %c0_28 = arith.constant 0 : index
    %47 = vector.load %arg6[%c8, %c0_27, %c0_28] : memref<12x64x128xbf16, #tpu.memory_space<vmem>>, vector<1x64x128xbf16>
    %48 = vector.shape_cast %47 : vector<1x64x128xbf16> to vector<64x128xbf16>
    %49 = vector.shape_cast %46 : vector<64x128xbf16> to vector<1x64x128xbf16>
    tpu.vector_store %arg6[%c8, %c0_27, %c0_28], %49 {strides = array<i32>} : memref<12x64x128xbf16, #tpu.memory_space<vmem>>, vector<1x64x128xbf16>,
    %50 = vector.extract_strided_slice %13 {offsets = [0, 1152], sizes = [64, 128], strides = [1, 1]} : vector<64x1536xbf16> to vector<64x128xbf16>
    %c9 = arith.constant 9 : index
    %c0_29 = arith.constant 0 : index
    %c0_30 = arith.constant 0 : index
    %51 = vector.load %arg6[%c9, %c0_29, %c0_30] : memref<12x64x128xbf16, #tpu.memory_space<vmem>>, vector<1x64x128xbf16>
    %52 = vector.shape_cast %51 : vector<1x64x128xbf16> to vector<64x128xbf16>
    %53 = vector.shape_cast %50 : vector<64x128xbf16> to vector<1x64x128xbf16>
    tpu.vector_store %arg6[%c9, %c0_29, %c0_30], %53 {strides = array<i32>} : memref<12x64x128xbf16, #tpu.memory_space<vmem>>, vector<1x64x128xbf16>,
    %54 = vector.extract_strided_slice %13 {offsets = [0, 1280], sizes = [64, 128], strides = [1, 1]} : vector<64x1536xbf16> to vector<64x128xbf16>
    %c10 = arith.constant 10 : index
    %c0_31 = arith.constant 0 : index
    %c0_32 = arith.constant 0 : index
    %55 = vector.load %arg6[%c10, %c0_31, %c0_32] : memref<12x64x128xbf16, #tpu.memory_space<vmem>>, vector<1x64x128xbf16>
    %56 = vector.shape_cast %55 : vector<1x64x128xbf16> to vector<64x128xbf16>
    %57 = vector.shape_cast %54 : vector<64x128xbf16> to vector<1x64x128xbf16>
    tpu.vector_store %arg6[%c10, %c0_31, %c0_32], %57 {strides = array<i32>} : memref<12x64x128xbf16, #tpu.memory_space<vmem>>, vector<1x64x128xbf16>,
    %58 = vector.extract_strided_slice %13 {offsets = [0, 1408], sizes = [64, 128], strides = [1, 1]} : vector<64x1536xbf16> to vector<64x128xbf16>
    %c11 = arith.constant 11 : index
    %c0_33 = arith.constant 0 : index
    %c0_34 = arith.constant 0 : index
    %59 = vector.load %arg6[%c11, %c0_33, %c0_34] : memref<12x64x128xbf16, #tpu.memory_space<vmem>>, vector<1x64x128xbf16>
    %60 = vector.shape_cast %59 : vector<1x64x128xbf16> to vector<64x128xbf16>
    %61 = vector.shape_cast %58 : vector<64x128xbf16> to vector<1x64x128xbf16>
    tpu.vector_store %arg6[%c11, %c0_33, %c0_34], %61 {strides = array<i32>} : memref<12x64x128xbf16, #tpu.memory_space<vmem>>, vector<1x64x128xbf16>,
    return
  }
  func.func @transform_0(%arg0: i32) -> (i32, i32) {
    %c0_i32 = arith.constant 0 : i32
    %c0_i32_0 = arith.constant 0 : i32
    %c0_i32_1 = arith.constant 0 : i32
    return %c0_i32, %c0_i32_0 : i32, i32
  }
  func.func @transform_1(%arg0: i32) -> (i32, i32) {
    %c0_i32 = arith.constant 0 : i32
    %c0_i32_0 = arith.constant 0 : i32
    %c0_i32_1 = arith.constant 0 : i32
    return %c0_i32, %c0_i32_0 : i32, i32
  }
  func.func @transform_2(%arg0: i32) -> (i32, i32) {
    %c0_i32 = arith.constant 0 : i32
    %c0_i32_0 = arith.constant 0 : i32
    %c0_i32_1 = arith.constant 0 : i32
    return %c0_i32, %c0_i32_0 : i32, i32
  }
  func.func @transform_3(%arg0: i32) -> (i32, i32) {
    %c0_i32 = arith.constant 0 : i32
    %c0_i32_0 = arith.constant 0 : i32
    return %c0_i32, %arg0 : i32, i32
  }
  func.func @transform_4(%arg0: i32) -> (i32, i32) {
    %c0_i32 = arith.constant 0 : i32
    %c0_i32_0 = arith.constant 0 : i32
    return %c0_i32, %arg0 : i32, i32
  }
  func.func @transform_5(%arg0: i32) -> (i32, i32, i32) {
    %c0_i32 = arith.constant 0 : i32
    %c0_i32_0 = arith.constant 0 : i32
    %c0_i32_1 = arith.constant 0 : i32
    return %arg0, %c0_i32, %c0_i32_0 : i32, i32, i32
  }
}

</mosaic_0001>

<bundles_post_ra>
// kernel: tpu_custom_call.1
= control target key start
LH: loop header
LB: loop body
LE: loop exit
PB: predicated region body
PF: predicated region fallthrough
CT: control target
= control target key end

     0   :  { %s13586_s0 = inlined_call_operand.hbm [shape: f32[64,256], index: 0, kind: input, shape index: {}]   ;;  %s13587_s1 = inlined_call_operand.hbm [shape: bf16[256,1024], index: 1, kind: input, shape index: {}]   ;;  %s13588_s2 = inlined_call_operand.hbm [shape: f32[1,1024], index: 2, kind: input, shape index: {}]   ;;  %s13589_s3 = inlined_call_operand.hbm [shape: bf16[1024,3072], index: 3, kind: input, shape index: {}]   ;;  %s13590_s4 = inlined_call_operand.hbm [shape: f32[1,3072], index: 4, kind: input, shape index: {}]   ;;  %s13591_s5 = inlined_call_operand.hbm [shape: bf16[24,64,128], index: 5, kind: output, shape index: {}]  }
   0x1   :  { %13609 = sst [smem:[#allocation20_spill]] %s13587_s1 }
   0x2   :  { %13610 = sst [smem:[#allocation21_spill]] %s13589_s3 }
   0x3   :  { %10 = vsyncpa [#allocation3], 0 }
   0x4   :  { %11 = vsyncpa [#allocation6], 0 }
   0x5   :  { %12 = vsyncpa [#allocation9], 0 }
   0x6   :  { %14 = vsyncpa [#allocation9 + $0x1], 0 }
   0x7   :  { %15 = vsyncpa [#allocation4], 0 }
   0x8   :  { %17 = vsyncpa [#allocation4 + $0x1], 0  ;;  %s11917_s18 = smov 0   ;;  %s11919_s19 = smov 0  }
   0x9   :  { %s11921_s20 = smov 0   ;;  %s11923_s21 = smov 0  }
   0xa LB: > { %13611 = sst [smem:[#allocation16_spill]] %s11858_s18  ;;  %s11938_s22 = sadd.s32 4294967295, %s11870_s21   ;;  %s11870_s21 = sphi %s11923_s21, %s13646_s21   ;;  %s11866_s20 = sphi %s11921_s20, %s13650_s20   ;;  %s11862_s19 = sphi %s11919_s19, %s13649_s19   ;;  %s11858_s18 = sphi %s11917_s18, %s13648_s18  }
   0xb   : > { %s8535_s23 = sadd.s32 4294967294, %s11870_s21   ;;  %s11942_s24 = sadd.s32 1, %s11870_s21  }
   0xc   : > { %13612 = sst [smem:[#allocation17_spill]] %s11942_s24  ;;  %s93_s25 = sadd.s32 1, %s11866_s20 }
   0xd   : > { %s90_s26 = ssub.s32 %s11870_s21, %s11942_s24  ;;  %p100_p0 = scmp.ne.s32.totalorder %s11866_s20, %s11862_s19 }
   0xe   : > { %p91_p1 = scmp.eq.s32.totalorder %s90_s26, 0  ;;  %p101_p2 = scmp.eq.s32.totalorder %s11870_s21, 0 }
   0xf   : > { %p106_p3 = scmp.ne.s32.totalorder %s11862_s19, %s11858_s18  ;;  %p13592_p4 = scmp.eq.s32.totalorder %s11938_s22, 0 }
  0x10   : > { %s11954_s27 = scalar_select %p91_p1, %s11866_s20, %s93_s25  }
  0x11   : > { %p11956_p5 = por %p101_p2, %p100_p0  ;;  %p11962_p6 = por %p13592_p4, %p106_p3 }
  0x12   : > { %13613 = sst [smem:[#allocation18_spill]] %s11954_s27  ;;  %p156_p7 = scmp.eq.s32.totalorder %s11938_s22, 1 }
  0x13   : > { %s13614_s28 = scalar_select %p11956_p5, 1, 0 }
  0x14   : > { %s13615_s29 = scalar_select %p11962_p6, 1, 0 }
  0x15   : > { %p162_p8 = scmp.eq.s32.totalorder %s8535_s23, 1  ;;  %p8536_p9 = scmp.ge.s32.totalorder %s11870_s21, 1 }
  0x16   : > { %p169_p10 = scmp.lt.s32.totalorder %s11870_s21, 3  ;;  %p11969_p11 = por %p156_p7, %p100_p0 }
  0x17   : > { %p11973_p12 = por %p162_p8, %p106_p3  ;;  %s11872_s8 = smov [#allocation5]  }
  0x18   : > { %s13616_s30 = scalar_select %p11969_p11, 1, 0 }
  0x19   : > { %s13617_s6 = scalar_select %p11973_p12, 1, 0 }
  0x1a   : > { %p11977_p13 = pnand %p8536_p9, %p169_p10  ;;  %s194_s9 = sshll.u32 %s11872_s8, 4  ;;  %s195_s9 = int_to_ptr.vmem [resolvable:$true] %s194_s9 }
  0x1b   : > { %13618 = sst [smem:[#allocation19_spill]] %s13617_s6  ;;  %s219_s11 = sand.u32 1, %s11870_s21  }
  0x1c   : > { %s13619_s7 = scalar_select %p11977_p13, 1, 0 }
  0x1d   : > { %p10426_p1 = pneg %p11977_p13  ;;  %s13621_s1 = sld [smem:[#allocation20_spill]] }
  0x1f   : > { %p11985_p2 = pnand %p10426_p1, %p13592_p4 }
  0x21   : > { %s13620_s10 = scalar_select %p11985_p2, 1, 0 }
  0x22   : > { %p12000_p8 = pneg %p11985_p2 }
  0x23   : > { %s11652_s14 = scalar_lea.hbm %s13621_s1, 16384 }
  0x24   : > { %p11653_p7 = scmp.ne.s32.totalorder %s13621_s1, %s11652_s14  ;;  %p11659_p1 = scmp.lt.u32.totalorder %s11652_s14, %s13621_s1 }
  0x26   : > { %p11655_p9 = pnand %p12000_p8, %p11653_p7 }
  0x28   : > { %p11656_p10 = pneg %p11655_p9 }
  0x2a   : > { %p11661_p0 = pnand %p11659_p1, %p11656_p10 }
  0x2c   : > { %11664 = shalt.err (!%p11661_p0)
}
  0x2d   : > { %s11665_s26 = scalar_lea.vmem %s195_s9, 16384  ;;  %p11673_p11 = scmp.lt.s32.totalorder %s195_s9, %s195_s9 }
  0x2e   : > { %p11666_p4 = scmp.ne.s32.totalorder %s195_s9, %s11665_s26  ;;  %p11674_p6 = scmp.lt.s32.totalorder %s11665_s26, %s11665_s26 }
  0x30   : > { %p11668_p3 = pnand %p11666_p4, %p12000_p8  ;;  %p11675_p13 = por %p11674_p6, %p11673_p11 }
  0x32   : > { %p11669_p12 = pneg %p11668_p3 }
  0x34   : > { %p11676_p5 = pnand %p11675_p13, %p11669_p12 }
  0x36   : > { %11679 = shalt.err (!%p11676_p5)
}
  0x37   : > { %s11873_s8 = smov 512   ;;  %s11874_s12 = smov 32  }
  0x38   : > { %10432 = dma.hbm_to_vmem [thread:$0]  (!%p11985_p2), %s13621_s1, 16384, %s195_s9, [#allocation6], %s11873_s8, %s11873_s8, %s11874_s12  }
  0x39   : > { %p13623_p4 = scmp.ne.s32.totalorder %s13614_s28, 0  ;;  %p13624_p0 = scmp.lt.s32.totalorder %s11870_s21, 2 }
  0x3a   : > { %s13600_s16 = sand.u32 1, %s11866_s20   ;;  %s9631_s25 = smul.u32 768, %s11870_s21 }
  0x3b   : > { %p12020_p3 = pnand %p13624_p0, %p13623_p4  ;;  %s10403_s23 = smul.u32 6144, %s13600_s16 }
  0x3c   : > { %s13626_s3 = sld [smem:[#allocation21_spill]]  ;;  %s12035_s8 = scalar_lea.sflag [#allocation9], %s219_s11 }
  0x3d   : > { %s13625_s15 = scalar_select %p12020_p3, 1, 0 }
  0x3e   : > { %s223_s28 = scalar_lea.vmem [#allocation8], %s10403_s23  ;;  %p13601_p6 = pneg %p12020_p3 }
  0x3f   : > { %s230_s9 = sshll.u32 %s223_s28, 4  ;;  %s12033_s9 = int_to_ptr.vmem [resolvable:$true] %s230_s9 }
  0x42   : > { %s12031_s24 = scalar_lea.hbm %s13626_s3, %s9631_s25  ;;  %s11685_s14 = scalar_lea.hbm %s13626_s3, 196608 }
  0x43   : > { %s11680_s12 = scalar_lea.hbm %s12031_s24, 98304  ;;  %p11686_p13 = scmp.lt.u32.totalorder %s12031_s24, %s13626_s3 }
  0x44   : > { %p11681_p5 = scmp.ne.s32.totalorder %s12031_s24, %s11680_s12  ;;  %p11687_p7 = scmp.lt.u32.totalorder %s11685_s14, %s11680_s12 }
  0x45   : > { %p11689_p10 = scmp.lt.u32.totalorder %s11680_s12, %s12031_s24 }
  0x46   : > { %p11683_p11 = pnand %p13601_p6, %p11681_p5  ;;  %p11688_p9 = por %p11687_p7, %p11686_p13 }
  0x48   : > { %p11684_p12 = pneg %p11683_p11  ;;  %p11690_p1 = por %p11689_p10, %p11688_p9 }
  0x4a   : > { %p11691_p4 = pnand %p11690_p1, %p11684_p12 }
  0x4c   : > { %11694 = shalt.err (!%p11691_p4)
}
  0x4d   : > { %s11695_s11 = scalar_lea.vmem %s12033_s9, 98304  ;;  %s11875_s23 = smov [#allocation8]  }
  0x4e   : > { %p11696_p0 = scmp.ne.s32.totalorder %s12033_s9, %s11695_s11  ;;  %s11700_s28 = sshll.u32 %s11875_s23, 4  ;;  %s11701_s28 = int_to_ptr.vmem [resolvable:$false] %s11700_s28 }
  0x4f   : > { %s11702_s27 = scalar_lea.vmem %s11701_s28, 196608  ;;  %p11703_p2 = scmp.lt.s32.totalorder %s12033_s9, %s11701_s28 }
  0x50   : > { %p11698_p5 = pnand %p11696_p0, %p13601_p6  ;;  %p11704_p13 = scmp.lt.s32.totalorder %s11702_s27, %s11695_s11 }
  0x52   : > { %p11699_p11 = pneg %p11698_p5  ;;  %p11705_p7 = por %p11704_p13, %p11703_p2 }
  0x54   : > { %p11706_p9 = pnand %p11705_p7, %p11699_p11 }
  0x56   : > { %11709 = shalt.err (!%p11706_p9)
}
  0x57   : > { %s11876_s12 = smov 1536   ;;  %s11877_s13 = smov 768  }
  0x58   : > { %s11878_s14 = smov 48   ;;  %s11879_s25 = smov [#allocation2]  }
  0x59   : > { %10439 = dma.hbm_to_vmem [thread:$0]  (!%p12020_p3), %s12031_s24, 98304, %s12033_s9, %s12035_s8, %s11876_s12, %s11877_s13, %s11878_s14  }
  0x5a   : > { %s181_s26 = sshll.u32 %s11879_s25, 4  ;;  %s11710_s11 = scalar_lea.hbm %s13586_s0, 2048  ;;  %s182_s26 = int_to_ptr.vmem [resolvable:$true] %s181_s26 }
  0x5b   : > { %p11711_p2 = scmp.ne.s32.totalorder %s13586_s0, %s11710_s11  ;;  %p11717_p1 = scmp.lt.u32.totalorder %s11710_s11, %s13586_s0 }
  0x5d   : > { %p11713_p12 = pnand %p11711_p2, %p12000_p8 }
  0x5f   : > { %p11714_p10 = pneg %p11713_p12 }
  0x61   : > { %p11719_p4 = pnand %p11717_p1, %p11714_p10 }
  0x63   : > { %11722 = shalt.err (!%p11719_p4)
}
  0x64   : > { %s11723_s24 = scalar_lea.vmem %s182_s26, 2048  ;;  %p11731_p13 = scmp.lt.s32.totalorder %s182_s26, %s182_s26 }
  0x65   : > { %p11724_p0 = scmp.ne.s32.totalorder %s182_s26, %s11723_s24  ;;  %p11732_p7 = scmp.lt.s32.totalorder %s11723_s24, %s11723_s24 }
  0x67   : > { %p11726_p5 = pnand %p11724_p0, %p12000_p8  ;;  %p11733_p9 = por %p11732_p7, %p11731_p13 }
  0x69   : > { %p11727_p11 = pneg %p11726_p5 }
  0x6b   : > { %p11734_p6 = pnand %p11733_p9, %p11727_p11 }
  0x6d   : > { %11737 = shalt.err (!%p11734_p6)
}
  0x6e   : > { %s11880_s16 = smov 256   ;;  %s11881_s1 = smov 16  }
  0x6f   : > { %p13627_p2 = scmp.ne.s32.totalorder %s13620_s10, 0  ;;  %s11882_s12 = smov [#allocation7]  }
  0x70   : > { %s208_s13 = sshll.u32 %s11882_s12, 4  ;;  %s13628_s14 = sand.u32 1, %s11866_s20   ;;  %s209_s13 = int_to_ptr.vmem [resolvable:$true] %s208_s13 }
  0x71   : > { %10429 = dma.hbm_to_vmem [thread:$0]  (!%p13627_p2), %s13586_s0, 2048, %s182_s26, [#allocation3], %s11880_s16, %s11880_s16, %s11881_s1  }
  0x72   : > { %s10404_s25 = smul.u32 12, %s13628_s14  ;;  %s11738_s27 = scalar_lea.hbm %s13588_s2, 128 }
  0x73   : > { %s9632_s23 = smul.u32 192, %s11870_s21  ;;  %p11739_p6 = scmp.ne.s32.totalorder %s13588_s2, %s11738_s27 }
  0x74   : > { %p11745_p1 = scmp.lt.u32.totalorder %s11738_s27, %s13588_s2 }
  0x75   : > { %p11741_p12 = pnand %p11739_p6, %p12000_p8 }
  0x77   : > { %p11742_p10 = pneg %p11741_p12 }
  0x79   : > { %p11747_p4 = pnand %p11745_p1, %p11742_p10 }
  0x7b   : > { %11750 = shalt.err (!%p11747_p4)
}
  0x7c   : > { %s11751_s26 = scalar_lea.vmem %s209_s13, 128  ;;  %p11759_p13 = scmp.lt.s32.totalorder %s209_s13, %s209_s13 }
  0x7d   : > { %p11752_p0 = scmp.ne.s32.totalorder %s209_s13, %s11751_s26  ;;  %p11760_p7 = scmp.lt.s32.totalorder %s11751_s26, %s11751_s26 }
  0x7f   : > { %p11754_p5 = pnand %p11752_p0, %p12000_p8  ;;  %p11761_p9 = por %p11760_p7, %p11759_p13 }
  0x81   : > { %p11755_p11 = pneg %p11754_p5 }
  0x83   : > { %p11762_p3 = pnand %p11761_p9, %p11755_p11 }
  0x85   : > { %11765 = shalt.err (!%p11762_p3)
}
  0x86   : > { %10435 = dma.hbm_to_vmem [thread:$0]  (!%p13627_p2), %s13588_s2, 128, %s209_s13, [#allocation6]  }
  0x87   : > { %s12105_s9 = scalar_lea.hbm %s13590_s4, %s9632_s23  ;;  %s244_s17 = scalar_lea.vmem [#allocation10], %s10404_s25 }
  0x88   : > { %s252_s12 = sshll.u32 %s244_s17, 4  ;;  %s11766_s14 = scalar_lea.hbm %s12105_s9, 192  ;;  %s253_s12 = int_to_ptr.vmem [resolvable:$true] %s252_s12 }
  0x89   : > { %p11767_p8 = scmp.ne.s32.totalorder %s12105_s9, %s11766_s14  ;;  %p13629_p3 = scmp.ne.s32.totalorder %s13625_s15, 0 }
  0x8a   : > { %s11771_s11 = scalar_lea.hbm %s13590_s4, 384  ;;  %p11772_p2 = scmp.lt.u32.totalorder %s12105_s9, %s13590_s4 }
  0x8b   : > { %p13630_p6 = pneg %p13629_p3  ;;  %p11773_p1 = scmp.lt.u32.totalorder %s11771_s11, %s11766_s14 }
  0x8c   : > { %p11775_p0 = scmp.lt.u32.totalorder %s11766_s14, %s12105_s9 }
  0x8d   : > { %p11769_p12 = pnand %p11767_p8, %p13630_p6  ;;  %p11774_p4 = por %p11773_p1, %p11772_p2 }
  0x8f   : > { %p11770_p10 = pneg %p11769_p12  ;;  %p11776_p5 = por %p11775_p0, %p11774_p4 }
  0x91   : > { %p11777_p11 = pnand %p11776_p5, %p11770_p10 }
  0x93   : > { %11780 = shalt.err (!%p11777_p11)
}
  0x94   : > { %s11781_s25 = scalar_lea.vmem %s253_s12, 192  ;;  %p13631_p7 = pmov %p13630_p6 }
  0x95   : > { %p11782_p13 = scmp.ne.s32.totalorder %s253_s12, %s11781_s25  ;;  %s11883_s27 = smov [#allocation10]  }
  0x96   : > { %s11786_s24 = sshll.u32 %s11883_s27, 4  ;;  %s11787_s24 = int_to_ptr.vmem [resolvable:$false] %s11786_s24 }
  0x97   : > { %p11784_p9 = pnand %p11782_p13, %p13631_p7  ;;  %s11788_s3 = scalar_lea.vmem %s11787_s24, 384 }
  0x98   : > { %p11789_p6 = scmp.lt.s32.totalorder %s253_s12, %s11787_s24  ;;  %p11790_p12 = scmp.lt.s32.totalorder %s11788_s3, %s11781_s25 }
  0x99   : > { %p11785_p8 = pneg %p11784_p9 }
  0x9a   : > { %p11791_p1 = por %p11790_p12, %p11789_p6 }
  0x9c   : > { %p11792_p2 = pnand %p11791_p1, %p11785_p8 }
  0x9e   : > { %11795 = shalt.err (!%p11792_p2)
}
  0x9f   : > { %10442 = dma.hbm_to_vmem [thread:$0]  (!%p13629_p3), %s12105_s9, 192, %s253_s12, %s12035_s8  }
  0xa0   : > { %p13632_p10 = scmp.ne.s32.totalorder %s13619_s7, 0 }
  0xa1   : > { %p13633_p4 = scmp.eq.s32.totalorder (!%p13632_p10), %s11938_s22, 0 }
  0xa2   : > { %261 = sbr.rel (%p13632_p10) target bundleno = 1438 (0x59e), region = 40 }
  0xa9   : > { %11841 = dma.done.wait (%p13633_p4), [#allocation3], 2048   ;;  %p13634_p0 = pmov %p13633_p4 }
  0xab   : > { %11843 = vsyncadd (%p13634_p0), [#allocation3], 4294965248  ;;  %p13635_p5 = pmov %p13634_p0 }
  0xac   : > { %p13636_p11 = pmov %p13634_p0 }
  0xad   : > { %11845 = dma.done.wait (%p13635_p5), [#allocation6], 16512  }
  0xae   : > { %11847 = vsyncadd (%p13636_p11), [#allocation6], 4294950784  ;;  %s275_s15 = sand.u32 1, %s11938_s22   ;;  %s12139_s8 = sand.u32 1, %s11862_s19  }
  0xaf   : > { %s10405_s7 = smul.u32 6144, %s12139_s8  ;;  %s276_s26 = scalar_lea.sflag [#allocation9], %s275_s15 }
  0xb0   : > { %p13637_p3 = scmp.ne.s32.totalorder %s13615_s29, 0 }
  0xb1   : > { %s12142_s6 = scalar_lea.vmem [#allocation8], %s10405_s7 }
  0xb2   : > { %11849 = dma.done.wait (%p13637_p3), %s276_s26, 98496  }
  0xb3   : > { %11851 = vsyncadd (%p13637_p3), %s276_s26, 4294868800  ;;  %v347_v0 = vld [vmem:[#allocation5] sm:$0xff]  ;;  %v348_v17 = vld [vmem:[#allocation5 + $0x8] sm:$0xff]  ;;  %s10406_s29 = smul.u32 12, %s12139_s8  ;;  %s8397_s10 = scalar_lea.sflag [#allocation4], %s12139_s8 }
  0xb4   : > { %v351_v1 = vld [vmem:[#allocation5 + $0x20] sm:$0xff]  ;;  %v352_v18 = vld [vmem:[#allocation5 + $0x28] sm:$0xff]  ;;  %v326_v20 = vld [vmem:[#allocation2 + $0x18] sm:$0xff]  ;;  %s10407_s18 = smul.u32 384, %s12139_s8  ;;  %p13641_p7 = scmp.ne.s32.totalorder %s13616_s30, 0 }
  0xb5   : > { %v355_v2 = vld [vmem:[#allocation5 + $0x40] sm:$0xff]  ;;  %v8548_v3 = vcombine.high %v347_v0, %v351_v1  ;;  %v8547_v4 = vcombine.low %v347_v0, %v351_v1  ;;  %v324_v19 = vld [vmem:[#allocation2 + $0x8] sm:$0xff]  ;;  %v8550_v22 = vcombine.high %v348_v17, %v352_v18  ;;  %v8549_v23 = vcombine.low %v348_v17, %v352_v18  ;;  %s12953_s16 = scalar_lea.vmem [#allocation10], %s10406_s29  ;;  %s10018_s9 = smul.u32 6144, %s11938_s22 }
  0xb6   : > { %v359_v5 = vld [vmem:[#allocation5 + $0x60] sm:$0xff]  ;;  %v12148_v24 = vpack.c.bf16 %v326_v20, %v324_v19  ;;  %v356_v25 = vld [vmem:[#allocation5 + $0x48] sm:$0xff]  ;;  %s12992_s1 = scalar_lea.vmem [#allocation11], %s10407_s18  ;;  %s11884_s11 = smov [#allocation11]  }
  0xb7   : > { %v8556_v6 = vcombine.high %v355_v2, %v359_v5  ;;  %v363_v7 = vld [vmem:[#allocation5 + $0x80] sm:$0xff]  ;;  %1157 = vmatprep.subr.bf16.mxu0 %v8548_v3  ;;  %v8555_v9 = vcombine.low %v355_v2, %v359_v5  ;;  %v360_v27 = vld [vmem:[#allocation5 + $0x68] sm:$0xff]  ;;  %1230 = vmatprep.subr.bf16.mxu1 %v8550_v22  ;;  %s8411_s17 = sshll.u32 %s12992_s1, 4  ;;  %s13536_s14 = scalar_lea.hbm %s13591_s5, %s10018_s9  ;;  %s13538_s17 = int_to_ptr.vmem [resolvable:$true] %s8411_s17 }
  0xb8   : > { %v367_v8 = vld [vmem:[#allocation5 + $0xa0] sm:$0xff]  ;;  %1158 = vmatpush1.bf16.msra.mxu0 %v8547_v4  ;;  %v364_v28 = vld [vmem:[#allocation5 + $0x88] sm:$0xff]  ;;  %1189 = vmatprep.mubr.bf16.mxu0 %v12148_v24  ;;  %v8558_v32 = vcombine.high %v356_v25, %v360_v27  ;;  %v8557_v33 = vcombine.low %v356_v25, %v360_v27  ;;  %s11796_s13 = scalar_lea.vmem %s13538_s17, 6144  ;;  %s11800_s28 = sshll.u32 %s11884_s11, 4  ;;  %s11801_s28 = int_to_ptr.vmem [resolvable:$false] %s11800_s28 }
  0xb9   : > { %1159 = vmatprep.subr.bf16.mxu0 %v8556_v6  ;;  %v8564_v10 = vcombine.high %v363_v7, %v367_v8  ;;  %v371_v11 = vld [vmem:[#allocation5 + $0xc0] sm:$0xff]  ;;  %v8563_v13 = vcombine.low %v363_v7, %v367_v8  ;;  %v368_v29 = vld [vmem:[#allocation5 + $0xa8] sm:$0xff]  ;;  %1231 = vmatpush1.bf16.msra.mxu1 %v8549_v23  ;;  %p11797_p13 = scmp.ne.s32.totalorder %s13538_s17, %s11796_s13  ;;  %s11802_s23 = scalar_lea.vmem %s11801_s28, 12288 }
  0xba   : > { %v375_v12 = vld [vmem:[#allocation5 + $0xe0] sm:$0xff]  ;;  %1262 = vmatprep.mubr.bf16.mxu1 %v12148_v24  ;;  %1232 = vmatprep.subr.bf16.mxu1 %v8558_v32  ;;  %v8566_v35 = vcombine.high %v364_v28, %v368_v29  ;;  %v372_v37 = vld [vmem:[#allocation5 + $0xc8] sm:$0xff]  ;;  %v8565_v41 = vcombine.low %v364_v28, %v368_v29  ;;  %p11803_p6 = scmp.lt.s32.totalorder %s13538_s17, %s11801_s28  ;;  %p11804_p12 = scmp.lt.s32.totalorder %s11802_s23, %s11796_s13 }
  0xbb   : > { %v8572_v14 = vcombine.high %v371_v11, %v375_v12  ;;  %v379_v15 = vld [vmem:[#allocation5 + $0x100] sm:$0xff]  ;;  %v8571_v21 = vcombine.low %v371_v11, %v375_v12  ;;  %v376_v38 = vld [vmem:[#allocation5 + $0xe8] sm:$0xff]  ;;  %p11798_p9 = pnand %p11797_p13, %p13641_p7 }
  0xbc   : > { %1160 = vmatpush1.bf16.msra.mxu0 %v8555_v9  ;;  %v383_v16 = vld [vmem:[#allocation5 + $0x120] sm:$0xff]  ;;  %v8574_v43 = vcombine.high %v372_v37, %v376_v38  ;;  %v380_v45 = vld [vmem:[#allocation5 + $0x108] sm:$0xff]  ;;  %v8573_v49 = vcombine.low %v372_v37, %v376_v38  ;;  %p11805_p1 = por %p11804_p12, %p11803_p6 }
  0xbd   : > { %1161 = vmatprep.subr.bf16.mxu0 %v8564_v10  ;;  %v8580_v26 = vcombine.high %v379_v15, %v383_v16  ;;  %v387_v30 = vld [vmem:[#allocation5 + $0x140] sm:$0xff]  ;;  %v8579_v34 = vcombine.low %v379_v15, %v383_v16  ;;  %1233 = vmatpush1.bf16.msra.mxu1 %v8557_v33  ;;  %v384_v46 = vld [vmem:[#allocation5 + $0x128] sm:$0xff]  ;;  %p11799_p8 = pneg %p11798_p9 }
  0xbe   : > { %v391_v31 = vld [vmem:[#allocation5 + $0x160] sm:$0xff]  ;;  %1234 = vmatprep.subr.bf16.mxu1 %v8566_v35  ;;  %v8582_v51 = vcombine.high %v380_v45, %v384_v46  ;;  %v388_v53 = vld [vmem:[#allocation5 + $0x148] sm:$0xff]  ;;  %v8581_v57 = vcombine.low %v380_v45, %v384_v46 }
  0xbf   : > { %v8588_v36 = vcombine.high %v387_v30, %v391_v31  ;;  %v395_v39 = vld [vmem:[#allocation5 + $0x180] sm:$0xff]  ;;  %v8587_v42 = vcombine.low %v387_v30, %v391_v31  ;;  %v392_v54 = vld [vmem:[#allocation5 + $0x168] sm:$0xff]  ;;  %p11806_p2 = pnand %p11805_p1, %p11799_p8 }
  0xc0   : > { %1162 = vmatpush1.bf16.msra.mxu0 %v8563_v13  ;;  %v399_v40 = vld [vmem:[#allocation5 + $0x1a0] sm:$0xff]  ;;  %v8590_v59 = vcombine.high %v388_v53, %v392_v54  ;;  %v396_v61 = vld [vmem:[#allocation5 + $0x188] sm:$0xff]  ;;  %v8589_v1 = vcombine.low %v388_v53, %v392_v54 }
  0xc1   : > { %1163 = vmatprep.subr.bf16.mxu0 %v8572_v14  ;;  %v8596_v44 = vcombine.high %v395_v39, %v399_v40  ;;  %v403_v47 = vld [vmem:[#allocation5 + $0x1c0] sm:$0xff]  ;;  %1235 = vmatpush1.bf16.msra.mxu1 %v8565_v41  ;;  %v8595_v50 = vcombine.low %v395_v39, %v399_v40  ;;  %v400_v62 = vld [vmem:[#allocation5 + $0x1a8] sm:$0xff] }
  0xc2   : > { %v407_v48 = vld [vmem:[#allocation5 + $0x1e0] sm:$0xff]  ;;  %1236 = vmatprep.subr.bf16.mxu1 %v8574_v43  ;;  %v8598_v3 = vcombine.high %v396_v61, %v400_v62  ;;  %v404_v5 = vld [vmem:[#allocation5 + $0x1c8] sm:$0xff]  ;;  %v8597_v9 = vcombine.low %v396_v61, %v400_v62  ;;  %v330_v61 = vld [vmem:[#allocation2 + $0x38] sm:$0xff] }
  0xc3   : > { %v8604_v52 = vcombine.high %v403_v47, %v407_v48  ;;  %v411_v55 = vld [vmem:[#allocation5 + $0x200] sm:$0xff]  ;;  %v8603_v58 = vcombine.low %v403_v47, %v407_v48  ;;  %v408_v6 = vld [vmem:[#allocation5 + $0x1e8] sm:$0xff] }
  0xc4   : > { %1164 = vmatpush1.bf16.msra.mxu0 %v8571_v21  ;;  %v415_v56 = vld [vmem:[#allocation5 + $0x220] sm:$0xff]  ;;  %v8606_v11 = vcombine.high %v404_v5, %v408_v6  ;;  %v412_v13 = vld [vmem:[#allocation5 + $0x208] sm:$0xff]  ;;  %v8605_v17 = vcombine.low %v404_v5, %v408_v6  ;;  %v357_v6 = vld [vmem:[#allocation5 + $0x50] sm:$0xff] }
  0xc5   : > { %1165 = vmatprep.subr.bf16.mxu0 %v8580_v26  ;;  %1237 = vmatpush1.bf16.msra.mxu1 %v8573_v49  ;;  %v8612_v60 = vcombine.high %v411_v55, %v415_v56  ;;  %v419_v63 = vld [vmem:[#allocation5 + $0x240] sm:$0xff]  ;;  %v8611_v2 = vcombine.low %v411_v55, %v415_v56  ;;  %v416_v14 = vld [vmem:[#allocation5 + $0x228] sm:$0xff] }
  0xc6   : > { %1238 = vmatprep.subr.bf16.mxu1 %v8582_v51  ;;  %v423_v0 = vld [vmem:[#allocation5 + $0x260] sm:$0xff]  ;;  %v8614_v19 = vcombine.high %v412_v13, %v416_v14  ;;  %v420_v21 = vld [vmem:[#allocation5 + $0x248] sm:$0xff]  ;;  %v8613_v26 = vcombine.low %v412_v13, %v416_v14  ;;  %v329_v14 = vld [vmem:[#allocation2 + $0x30] sm:$0xff] }
  0xc7   : > { %v8620_v4 = vcombine.high %v419_v63, %v423_v0  ;;  %v427_v7 = vld [vmem:[#allocation5 + $0x280] sm:$0xff]  ;;  %v8619_v10 = vcombine.low %v419_v63, %v423_v0  ;;  %v424_v22 = vld [vmem:[#allocation5 + $0x268] sm:$0xff] }
  0xc8   : > { %1166 = vmatpush1.bf16.msra.mxu0 %v8579_v34  ;;  %v431_v8 = vld [vmem:[#allocation5 + $0x2a0] sm:$0xff]  ;;  %v8622_v28 = vcombine.high %v420_v21, %v424_v22  ;;  %v428_v30 = vld [vmem:[#allocation5 + $0x288] sm:$0xff]  ;;  %v8621_v34 = vcombine.low %v420_v21, %v424_v22  ;;  %v350_v22 = vld [vmem:[#allocation5 + $0x18] sm:$0xff] }
  0xc9   : > { %1167 = vmatprep.subr.bf16.mxu0 %v8588_v36  ;;  %1239 = vmatpush1.bf16.msra.mxu1 %v8581_v57  ;;  %v8628_v12 = vcombine.high %v427_v7, %v431_v8  ;;  %v435_v15 = vld [vmem:[#allocation5 + $0x2c0] sm:$0xff]  ;;  %v8627_v18 = vcombine.low %v427_v7, %v431_v8  ;;  %v432_v31 = vld [vmem:[#allocation5 + $0x2a8] sm:$0xff]  ;;  %v325_v57 = vld [vmem:[#allocation2 + $0x10] sm:$0xff] }
  0xca   : > { %1240 = vmatprep.subr.bf16.mxu1 %v8590_v59  ;;  %v439_v16 = vld [vmem:[#allocation5 + $0x2e0] sm:$0xff]  ;;  %v8630_v36 = vcombine.high %v428_v30, %v432_v31  ;;  %v436_v37 = vld [vmem:[#allocation5 + $0x2c8] sm:$0xff]  ;;  %v353_v59 = vld [vmem:[#allocation5 + $0x30] sm:$0xff] }
  0xcb   : > { %v8636_v20 = vcombine.high %v435_v15, %v439_v16  ;;  %v443_v23 = vld [vmem:[#allocation5 + $0x300] sm:$0xff]  ;;  %v8635_v27 = vcombine.low %v435_v15, %v439_v16  ;;  %v440_v39 = vld [vmem:[#allocation5 + $0x2e8] sm:$0xff]  ;;  %v361_v7 = vld [vmem:[#allocation5 + $0x70] sm:$0xff] }
  0xcc   : > { %1168 = vmatpush1.bf16.msra.mxu0 %v8587_v42  ;;  %v447_v25 = vld [vmem:[#allocation5 + $0x320] sm:$0xff]  ;;  %v8629_v42 = vcombine.low %v428_v30, %v432_v31  ;;  %v444_v45 = vld [vmem:[#allocation5 + $0x308] sm:$0xff]  ;;  %v8560_v15 = vcombine.high %v357_v6, %v361_v7  ;;  %v377_v30 = vld [vmem:[#allocation5 + $0xf0] sm:$0xff] }
  0xcd   : > { %1169 = vmatprep.subr.bf16.mxu0 %v8596_v44  ;;  %1241 = vmatpush1.bf16.msra.mxu1 %v8589_v1  ;;  %v8644_v29 = vcombine.high %v443_v23, %v447_v25  ;;  %v451_v32 = vld [vmem:[#allocation5 + $0x340] sm:$0xff]  ;;  %v8643_v35 = vcombine.low %v443_v23, %v447_v25  ;;  %v8638_v44 = vcombine.high %v436_v37, %v440_v39  ;;  %v448_v47 = vld [vmem:[#allocation5 + $0x328] sm:$0xff]  ;;  %v354_v25 = vld [vmem:[#allocation5 + $0x38] sm:$0xff] }
  0xce   : > { %1242 = vmatprep.subr.bf16.mxu1 %v8598_v3  ;;  %v455_v33 = vld [vmem:[#allocation5 + $0x360] sm:$0xff]  ;;  %v452_v53 = vld [vmem:[#allocation5 + $0x348] sm:$0xff]  ;;  %v8645_v62 = vcombine.low %v444_v45, %v448_v47  ;;  %v8559_v23 = vcombine.low %v357_v6, %v361_v7  ;;  %v386_v6 = vld [vmem:[#allocation5 + $0x138] sm:$0xff] }
  0xcf   : > { %v8652_v38 = vcombine.high %v451_v32, %v455_v33  ;;  %v459_v40 = vld [vmem:[#allocation5 + $0x380] sm:$0xff]  ;;  %v8651_v43 = vcombine.low %v451_v32, %v455_v33  ;;  %v456_v55 = vld [vmem:[#allocation5 + $0x368] sm:$0xff]  ;;  %v8554_v32 = vcombine.high %v350_v22, %v354_v25  ;;  %v358_v33 = vld [vmem:[#allocation5 + $0x58] sm:$0xff] }
  0xd0   : > { %1170 = vmatpush1.bf16.msra.mxu0 %v8595_v50  ;;  %v463_v41 = vld [vmem:[#allocation5 + $0x3a0] sm:$0xff]  ;;  %v8637_v50 = vcombine.low %v436_v37, %v440_v39  ;;  %v8654_v0 = vcombine.high %v452_v53, %v456_v55  ;;  %v460_v1 = vld [vmem:[#allocation5 + $0x388] sm:$0xff]  ;;  %v8653_v5 = vcombine.low %v452_v53, %v456_v55  ;;  %v333_v37 = vld [vmem:[#allocation2 + $0x50] sm:$0xff] }
  0xd1   : > { %1171 = vmatprep.subr.bf16.mxu0 %v8604_v52  ;;  %1243 = vmatpush1.bf16.msra.mxu1 %v8597_v9  ;;  %v8660_v46 = vcombine.high %v459_v40, %v463_v41  ;;  %v467_v48 = vld [vmem:[#allocation5 + $0x3c0] sm:$0xff]  ;;  %v8659_v51 = vcombine.low %v459_v40, %v463_v41  ;;  %v8646_v52 = vcombine.high %v444_v45, %v448_v47  ;;  %v332_v16 = vld [vmem:[#allocation2 + $0x48] sm:$0xff]  ;;  %v338_v40 = vld [vmem:[#allocation2 + $0x78] sm:$0xff] }
  0xd2   : > { %1244 = vmatprep.subr.bf16.mxu1 %v8606_v11  ;;  %v471_v49 = vld [vmem:[#allocation5 + $0x3e0] sm:$0xff]  ;;  %v472_v11 = vld [vmem:[#allocation5 + $0x3e8] sm:$0xff]  ;;  %v381_v41 = vld [vmem:[#allocation5 + $0x110] sm:$0xff] }
  0xd3   : > { %v8668_v54 = vcombine.high %v467_v48, %v471_v49  ;;  %v323_v56 = vld [vmem:[#allocation2] sm:$0xff]  ;;  %v8667_v63 = vcombine.low %v467_v48, %v471_v49  ;;  %v336_v39 = vld [vmem:[#allocation2 + $0x68] sm:$0xff]  ;;  %v366_v45 = vld [vmem:[#allocation5 + $0x98] sm:$0xff] }
  0xd4   : > { %1172 = vmatpush1.bf16.msra.mxu0 %v8603_v58  ;;  %v349_v58 = vld [vmem:[#allocation5 + $0x10] sm:$0xff]  ;;  %v327_v13 = vld [vmem:[#allocation2 + $0x20] sm:$0xff]  ;;  %v370_v47 = vld [vmem:[#allocation5 + $0xb8] sm:$0xff]  ;;  %v12168_v53 = vpack.c.bf16 %v338_v40, %v336_v39 }
  0xd5   : > { %1173 = vmatprep.subr.bf16.mxu0 %v8612_v60  ;;  %1245 = vmatpush1.bf16.msra.mxu1 %v8605_v17  ;;  %v328_v60 = vld [vmem:[#allocation2 + $0x28] sm:$0xff]  ;;  %v8552_v3 = vcombine.high %v349_v58, %v353_v59  ;;  %v334_v17 = vld [vmem:[#allocation2 + $0x58] sm:$0xff] }
  0xd6   : > { %1246 = vmatprep.subr.bf16.mxu1 %v8614_v19  ;;  %v12154_v8 = vpack.c.bf16 %v330_v61, %v328_v60  ;;  %v365_v19 = vld [vmem:[#allocation5 + $0x90] sm:$0xff]  ;;  %v12160_v31 = vpack.c.bf16 %v334_v17, %v332_v16  ;;  %v374_v55 = vld [vmem:[#allocation5 + $0xd8] sm:$0xff] }
  0xd7   : > { %v397_v60 = vld [vmem:[#allocation5 + $0x190] sm:$0xff]  ;;  %v418_v39 = vld [vmem:[#allocation5 + $0x238] sm:$0xff] }
  0xd8   : > { %1174 = vmatpush1.bf16.msra.mxu0 %v8611_v2  ;;  %v464_v2 = vld [vmem:[#allocation5 + $0x3a8] sm:$0xff]  ;;  %v401_v61 = vld [vmem:[#allocation5 + $0x1b0] sm:$0xff] }
  0xd9   : > { %1175 = vmatprep.subr.bf16.mxu0 %v8620_v4  ;;  %1247 = vmatpush1.bf16.msra.mxu1 %v8613_v26  ;;  %v12152_v4 = vpack.c.bf16 %v325_v57, %v323_v56  ;;  %v8662_v9 = vcombine.high %v460_v1, %v464_v2  ;;  %v378_v57 = vld [vmem:[#allocation5 + $0xf8] sm:$0xff]  ;;  %v8600_v7 = vcombine.high %v397_v60, %v401_v61  ;;  %v417_v16 = vld [vmem:[#allocation5 + $0x230] sm:$0xff] }
  0xda   : > { %1248 = vmatprep.subr.bf16.mxu1 %v8622_v28 }
  0xdc   : > { %1176 = vmatpush1.bf16.msra.mxu0 %v8619_v10  ;;  %v468_v10 = vld [vmem:[#allocation5 + $0x3c8] sm:$0xff] }
  0xdd   : > { %1177 = vmatprep.subr.bf16.mxu0 %v8628_v12  ;;  %1249 = vmatpush1.bf16.msra.mxu1 %v8621_v34  ;;  %v8551_v12 = vcombine.low %v349_v58, %v353_v59  ;;  %v8670_v21 = vcombine.high %v468_v10, %v472_v11  ;;  %v8669_v28 = vcombine.low %v468_v10, %v472_v11  ;;  %v335_v58 = vld [vmem:[#allocation2 + $0x60] sm:$0xff]  ;;  %v390_v11 = vld [vmem:[#allocation5 + $0x158] sm:$0xff] }
  0xde   : > { %1250 = vmatprep.subr.bf16.mxu1 %v8630_v36  ;;  %v331_v36 = vld [vmem:[#allocation2 + $0x40] sm:$0xff]  ;;  %v8577_v10 = vcombine.low %v374_v55, %v378_v57 }
  0xdf   : > { %v12165_v49 = vpack.c.bf16 %v333_v37, %v331_v36 }
  0xe0   : > { %1178 = vmatpush1.bf16.msra.mxu0 %v8627_v18  ;;  %v8661_v18 = vcombine.low %v460_v1, %v464_v2  ;;  %v405_v2 = vld [vmem:[#allocation5 + $0x1d0] sm:$0xff] }
  0xe1   : > { %1179 = vmatprep.subr.bf16.mxu0 %v8636_v20  ;;  %1251 = vmatpush1.bf16.msra.mxu1 %v8629_v42  ;;  %v369_v20 = vld [vmem:[#allocation5 + $0xb0] sm:$0xff] }
  0xe2   : > { %1252 = vmatprep.subr.bf16.mxu1 %v8638_v44  ;;  %v8568_v26 = vcombine.high %v365_v19, %v369_v20  ;;  %v8567_v34 = vcombine.low %v365_v19, %v369_v20  ;;  %v385_v42 = vld [vmem:[#allocation5 + $0x130] sm:$0xff]  ;;  %v398_v19 = vld [vmem:[#allocation5 + $0x198] sm:$0xff] }
  0xe3   : > { %v8584_v48 = vcombine.high %v381_v41, %v385_v42  ;;  %v8583_v56 = vcombine.low %v381_v41, %v385_v42  ;;  %v402_v20 = vld [vmem:[#allocation5 + $0x1b8] sm:$0xff]  ;;  %v437_v42 = vld [vmem:[#allocation5 + $0x2d0] sm:$0xff] }
  0xe4   : > { %1180 = vmatpush1.bf16.msra.mxu0 %v8635_v27  ;;  %v12158_v27 = vpack.c.bf16 %v329_v14, %v327_v13  ;;  %v8599_v14 = vcombine.low %v397_v60, %v401_v61  ;;  %v8601_v37 = vcombine.low %v398_v19, %v402_v20  ;;  %v453_v60 = vld [vmem:[#allocation5 + $0x350] sm:$0xff] }
  0xe5   : > { %1181 = vmatprep.subr.bf16.mxu0 %v8644_v29  ;;  %1253 = vmatpush1.bf16.msra.mxu1 %v8637_v50  ;;  %v373_v29 = vld [vmem:[#allocation5 + $0xd0] sm:$0xff] }
  0xe6   : > { %1254 = vmatprep.subr.bf16.mxu1 %v8646_v52  ;;  %v389_v50 = vld [vmem:[#allocation5 + $0x150] sm:$0xff] }
  0xe7   : > { %v457_v61 = vld [vmem:[#allocation5 + $0x370] sm:$0xff] }
  0xe8   : > { %1182 = vmatpush1.bf16.msra.mxu0 %v8643_v35  ;;  %v362_v35 = vld [vmem:[#allocation5 + $0x78] sm:$0xff] }
  0xe9   : > { %1183 = vmatprep.subr.bf16.mxu0 %v8652_v38  ;;  %1255 = vmatpush1.bf16.msra.mxu1 %v8645_v62  ;;  %v8576_v38 = vcombine.high %v373_v29, %v377_v30  ;;  %v8562_v44 = vcombine.high %v358_v33, %v362_v35  ;;  %v8561_v52 = vcombine.low %v358_v33, %v362_v35  ;;  %v433_v35 = vld [vmem:[#allocation5 + $0x2b0] sm:$0xff] }
  0xea   : > { %1256 = vmatprep.subr.bf16.mxu1 %v8654_v0  ;;  %v8569_v62 = vcombine.low %v366_v45, %v370_v47  ;;  %v8578_v0 = vcombine.high %v374_v55, %v378_v57  ;;  %v434_v57 = vld [vmem:[#allocation5 + $0x2b8] sm:$0xff] }
  0xec   : > { %1184 = vmatpush1.bf16.msra.mxu0 %v8651_v43  ;;  %v8553_v43 = vcombine.low %v350_v22, %v354_v25  ;;  %v425_v25 = vld [vmem:[#allocation5 + $0x270] sm:$0xff] }
  0xed   : > { %1185 = vmatprep.subr.bf16.mxu0 %v8660_v46  ;;  %1257 = vmatpush1.bf16.msra.mxu1 %v8653_v5  ;;  %v8575_v46 = vcombine.low %v373_v29, %v377_v30  ;;  %v382_v5 = vld [vmem:[#allocation5 + $0x118] sm:$0xff] }
  0xee   : > { %1258 = vmatprep.subr.bf16.mxu1 %v8662_v9  ;;  %v8586_v13 = vcombine.high %v382_v5, %v386_v6  ;;  %v406_v29 = vld [vmem:[#allocation5 + $0x1d8] sm:$0xff] }
  0xef   : > { %v410_v30 = vld [vmem:[#allocation5 + $0x1f8] sm:$0xff] }
  0xf0   : > { %1186 = vmatpush1.bf16.msra.mxu0 %v8659_v51  ;;  %v393_v51 = vld [vmem:[#allocation5 + $0x170] sm:$0xff]  ;;  %v8610_v40 = vcombine.high %v406_v29, %v410_v30 }
  0xf1   : > { %1187 = vmatprep.subr.bf16.mxu0 %v8668_v54  ;;  %1259 = vmatpush1.bf16.msra.mxu1 %v8661_v18  ;;  %v8570_v54 = vcombine.high %v366_v45, %v370_v47  ;;  %v8592_v59 = vcombine.high %v389_v50, %v393_v51  ;;  %v8591_v1 = vcombine.low %v389_v50, %v393_v51  ;;  %v426_v47 = vld [vmem:[#allocation5 + $0x278] sm:$0xff]  ;;  %v445_v51 = vld [vmem:[#allocation5 + $0x310] sm:$0xff] }
  0xf2   : > { %1260 = vmatprep.subr.bf16.mxu1 %v8670_v21  ;;  %v8585_v18 = vcombine.low %v382_v5, %v386_v6  ;;  %v8609_v45 = vcombine.low %v406_v29, %v410_v30  ;;  %v465_v5 = vld [vmem:[#allocation5 + $0x3b0] sm:$0xff]  ;;  %v8656_v6 = vcombine.high %v453_v60, %v457_v61  ;;  %v10501_v29 = vld [vmem:[%s12142_s6 + $0x4] ss:$48 sps:$4 sm:$0xff]  }
  0xf4   : > { %1188 = vmatpush1.bf16.msra.mxu0 %v8667_v63  ;;  %v337_v63 = vld [vmem:[#allocation2 + $0x70] sm:$0xff] }
  0xf5   : > { %1303 = vmatprep.subr.bf16.mxu0 %v8552_v3  ;;  %1261 = vmatpush1.bf16.msra.mxu1 %v8669_v28  ;;  %v409_v3 = vld [vmem:[#allocation5 + $0x1f0] sm:$0xff]  ;;  %v12173_v9 = vpack.c.bf16 %v337_v63, %v335_v58  ;;  %v438_v63 = vld [vmem:[#allocation5 + $0x2d8] sm:$0xff] }
  0xf6   : > { %1376 = vmatprep.subr.bf16.mxu1 %v8554_v32  ;;  %v8608_v17 = vcombine.high %v405_v2, %v409_v3  ;;  %v8607_v22 = vcombine.low %v405_v2, %v409_v3  ;;  %v8602_v32 = vcombine.high %v398_v19, %v402_v20  ;;  %v461_v3 = vld [vmem:[#allocation5 + $0x390] sm:$0xff]  ;;  %v458_v19 = vld [vmem:[#allocation5 + $0x378] sm:$0xff] }
  0xf7   : > { %1190 = vmatmul.mubr.bf16.vlgmr.msra.gmra.mrb[0].mxu0 %v12152_v4 }
  0xf8   : > { %1199 = vmatprep.mubr.bf16.mxu0 %v12154_v8  ;;  %1304 = vmatpush1.bf16.msra.mxu0 %v8551_v12  ;;  %v394_v12 = vld [vmem:[#allocation5 + $0x178] sm:$0xff] }
  0xf9   : > { %1305 = vmatprep.subr.bf16.mxu0 %v8560_v15  ;;  %1263 = vmatmul.mubr.bf16.vlgmr.msra.gmra.mrb[0].mxu1 %v12152_v4  ;;  %v413_v15 = vld [vmem:[#allocation5 + $0x210] sm:$0xff]  ;;  %v8594_v21 = vcombine.high %v390_v11, %v394_v12  ;;  %v8593_v28 = vcombine.low %v390_v11, %v394_v12  ;;  %v450_v11 = vld [vmem:[#allocation5 + $0x338] sm:$0xff] }
  0xfa   : > { %1377 = vmatpush1.bf16.msra.mxu1 %v8553_v43  ;;  %1272 = vmatprep.mubr.bf16.mxu1 %v12154_v8  ;;  %v8615_v33 = vcombine.low %v413_v15, %v417_v16  ;;  %v441_v43 = vld [vmem:[#allocation5 + $0x2f0] sm:$0xff] }
  0xfb   : > { %1378 = vmatprep.subr.bf16.mxu1 %v8562_v44 }
  0xfc   : > { %1306 = vmatpush1.bf16.msra.mxu0 %v8559_v23  ;;  %v421_v23 = vld [vmem:[#allocation5 + $0x250] sm:$0xff] }
  0xfd   : > { %1307 = vmatprep.subr.bf16.mxu0 %v8568_v26  ;;  %v8616_v26 = vcombine.high %v413_v15, %v417_v16  ;;  %v8624_v36 = vcombine.high %v421_v23, %v425_v25  ;;  %v8623_v41 = vcombine.low %v421_v23, %v425_v25  ;;  %v473_v15 = vld [vmem:[#allocation5 + $0x3f0] sm:$0xff]  ;;  %v8664_v16 = vcombine.high %v461_v3, %v465_v5  ;;  %v462_v25 = vld [vmem:[#allocation5 + $0x398] sm:$0xff] }
  0xfe   : > { %1379 = vmatpush1.bf16.msra.mxu1 %v8561_v52  ;;  %v449_v52 = vld [vmem:[#allocation5 + $0x330] sm:$0xff] }
  0xff   : > { %1200 = vmatmul.mubr.bf16.gmra.mrb[4].mxu0 %v12158_v27  ;;  %1380 = vmatprep.subr.bf16.mxu1 %v8570_v54  ;;  %v8640_v54 = vcombine.high %v437_v42, %v441_v43  ;;  %v8647_v2 = vcombine.low %v445_v51, %v449_v52 }
 0x100   : > { %1209 = vmatprep.mubr.bf16.mxu0 %v12160_v31  ;;  %1308 = vmatpush1.bf16.msra.mxu0 %v8567_v34  ;;  %v429_v34 = vld [vmem:[#allocation5 + $0x290] sm:$0xff] }
 0x101   : > { %1309 = vmatprep.subr.bf16.mxu0 %v8576_v38  ;;  %1273 = vmatmul.mubr.bf16.gmra.mrb[4].mxu1 %v12158_v27  ;;  %v414_v38 = vld [vmem:[#allocation5 + $0x218] sm:$0xff]  ;;  %v8632_v44 = vcombine.high %v429_v34, %v433_v35  ;;  %v8631_v50 = vcombine.low %v429_v34, %v433_v35 }
 0x102   : > { %1381 = vmatpush1.bf16.msra.mxu1 %v8569_v62  ;;  %1282 = vmatprep.mubr.bf16.mxu1 %v12160_v31  ;;  %v8617_v55 = vcombine.low %v414_v38, %v418_v39  ;;  %v474_v34 = vld [vmem:[#allocation5 + $0x3f8] sm:$0xff] }
 0x103   : > { %1382 = vmatprep.subr.bf16.mxu1 %v8578_v0  ;;  %v442_v0 = vld [vmem:[#allocation5 + $0x2f8] sm:$0xff] }
 0x104   : > { %1310 = vmatpush1.bf16.msra.mxu0 %v8575_v46  ;;  %v422_v46 = vld [vmem:[#allocation5 + $0x258] sm:$0xff]  ;;  %v8642_v12 = vcombine.high %v438_v63, %v442_v0 }
 0x105   : > { %1311 = vmatprep.subr.bf16.mxu0 %v8584_v48  ;;  %v8618_v48 = vcombine.high %v414_v38, %v418_v39  ;;  %v8626_v58 = vcombine.high %v422_v46, %v426_v47  ;;  %v8625_v62 = vcombine.low %v422_v46, %v426_v47  ;;  %v10499_v35 = vld [vmem:[%s12142_s6] ss:$48 sps:$4 sm:$0xff]   ;;  %v10502_v46 = vld [vmem:[%s12142_s6 + $0x8] ss:$48 sps:$4 sm:$0xff]   ;;  %v10510_v47 = vld [vmem:[%s12142_s6 + $0x6c] ss:$48 sps:$4 sm:$0xff]  }
 0x106   : > { %1383 = vmatpush1.bf16.msra.mxu1 %v8577_v10  ;;  %v446_v10 = vld [vmem:[#allocation5 + $0x318] sm:$0xff] }
 0x107   : > { %1210 = vmatmul.mubr.bf16.gmra.mrb[8].mxu0 %v12165_v49  ;;  %1384 = vmatprep.subr.bf16.mxu1 %v8586_v13  ;;  %v8655_v13 = vcombine.low %v453_v60, %v457_v61  ;;  %v8650_v20 = vcombine.high %v446_v10, %v450_v11  ;;  %v8649_v23 = vcombine.low %v446_v10, %v450_v11  ;;  %v10505_v39 = vld [vmem:[%s12142_s6 + $0x60] ss:$48 sps:$4 sm:$0xff]   ;;  %v10526_v60 = vld [vmem:[%s12142_s6 + $0x188] ss:$48 sps:$4 sm:$0xff]  }
 0x108   : > { %1219 = vmatprep.mubr.bf16.mxu0 %v12168_v53  ;;  %1312 = vmatpush1.bf16.msra.mxu0 %v8583_v56  ;;  %v430_v56 = vld [vmem:[#allocation5 + $0x298] sm:$0xff]  ;;  %v10550_v10 = vld [vmem:[%s12142_s6 + $0x308] ss:$48 sps:$4 sm:$0xff]  }
 0x109   : > { %1313 = vmatprep.subr.bf16.mxu0 %v8592_v59  ;;  %1283 = vmatmul.mubr.bf16.gmra.mrb[8].mxu1 %v12165_v49  ;;  %v8639_v59 = vcombine.low %v437_v42, %v441_v43  ;;  %v10504_v42 = vld [vmem:[%s12142_s6 + $0xc] ss:$48 sps:$4 sm:$0xff]   ;;  %v10535_v61 = vld [vmem:[%s12142_s6 + $0x240] ss:$48 sps:$4 sm:$0xff]  }
 0x10a   : > { %1385 = vmatpush1.bf16.msra.mxu1 %v8585_v18  ;;  %1292 = vmatprep.mubr.bf16.mxu1 %v12168_v53  ;;  %v454_v18 = vld [vmem:[#allocation5 + $0x358] sm:$0xff] }
 0x10b   : > { %1386 = vmatprep.subr.bf16.mxu1 %v8594_v21  ;;  %v8663_v21 = vcombine.low %v461_v3, %v465_v5  ;;  %v10555_v3 = vld [vmem:[%s12142_s6 + $0x364] ss:$48 sps:$4 sm:$0xff]   ;;  %v10546_v5 = vld [vmem:[%s12142_s6 + $0x2ac] ss:$48 sps:$4 sm:$0xff]   ;;  %v10559_v11 = vld [vmem:[%s12142_s6 + $0x3c0] ss:$48 sps:$4 sm:$0xff]  }
 0x10c   : > { %1314 = vmatpush1.bf16.msra.mxu0 %v8591_v1  ;;  %v8634_v1 = vcombine.high %v430_v56, %v434_v57 }
 0x10d   : > { %1315 = vmatprep.subr.bf16.mxu0 %v8600_v7  ;;  %v8633_v7 = vcombine.low %v430_v56, %v434_v57  ;;  %v10514_v56 = vld [vmem:[%s12142_s6 + $0xc8] ss:$48 sps:$4 sm:$0xff]  }
 0x10e   : > { %1387 = vmatpush1.bf16.msra.mxu1 %v8593_v28  ;;  %v8658_v28 = vcombine.high %v454_v18, %v458_v19  ;;  %v10520_v57 = vld [vmem:[%s12142_s6 + $0x128] ss:$48 sps:$4 sm:$0xff]  }
 0x10f   : > { %1220 = vmatmul.mubr.bf16.gmra.mrb[12].mxu0 %v12173_v9  ;;  %1388 = vmatprep.subr.bf16.mxu1 %v8602_v32  ;;  %v8657_v32 = vcombine.low %v454_v18, %v458_v19  ;;  %v10571_v18 = vld [vmem:[%s12142_s6 + $0x480] ss:$48 sps:$4 sm:$0xff]   ;;  %v10579_v19 = vld [vmem:[%s12142_s6 + $0x4e4] ss:$48 sps:$4 sm:$0xff]  }
 0x110   : > { %1335 = vmatprep.mubr.bf16.mxu0 %v12148_v24  ;;  %1316 = vmatpush1.bf16.msra.mxu0 %v8599_v14  ;;  %v469_v14 = vld [vmem:[#allocation5 + $0x3d0] sm:$0xff] }
 0x111   : > { %1317 = vmatprep.subr.bf16.mxu0 %v8608_v17  ;;  %1293 = vmatmul.mubr.bf16.gmra.mrb[12].mxu1 %v12173_v9  ;;  %v8641_v17 = vcombine.low %v438_v63, %v442_v0  ;;  %v8671_v30 = vcombine.low %v469_v14, %v473_v15  ;;  %v10549_v63 = vld [vmem:[%s12142_s6 + $0x304] ss:$48 sps:$4 sm:$0xff]   ;;  %v10540_v0 = vld [vmem:[%s12142_s6 + $0x24c] ss:$48 sps:$4 sm:$0xff]  }
 0x112   : > { %1389 = vmatpush1.bf16.msra.mxu1 %v8601_v37  ;;  %1408 = vmatprep.mubr.bf16.mxu1 %v12148_v24  ;;  %v8648_v24 = vcombine.high %v445_v51, %v449_v52  ;;  %v10507_v37 = vld [vmem:[%s12142_s6 + $0x64] ss:$48 sps:$4 sm:$0xff]   ;;  %v10508_v51 = vld [vmem:[%s12142_s6 + $0x68] ss:$48 sps:$4 sm:$0xff]   ;;  %v10516_v52 = vld [vmem:[%s12142_s6 + $0xcc] ss:$48 sps:$4 sm:$0xff]  }
 0x113   : > { %1390 = vmatprep.subr.bf16.mxu1 %v8610_v40 }
 0x114   : > { %1318 = vmatpush1.bf16.msra.mxu0 %v8607_v22  ;;  %v8672_v22 = vcombine.high %v469_v14, %v473_v15  ;;  %v10556_v14 = vld [vmem:[%s12142_s6 + $0x368] ss:$48 sps:$4 sm:$0xff]   ;;  %v10573_v15 = vld [vmem:[%s12142_s6 + $0x484] ss:$48 sps:$4 sm:$0xff]  }
 0x115   : > { %1319 = vmatprep.subr.bf16.mxu0 %v8616_v26  ;;  %v466_v26 = vld [vmem:[#allocation5 + $0x3b8] sm:$0xff] }
 0x116   : > { %1391 = vmatpush1.bf16.msra.mxu1 %v8609_v45  ;;  %v8665_v38 = vcombine.low %v462_v25, %v466_v26  ;;  %v10519_v45 = vld [vmem:[%s12142_s6 + $0x124] ss:$48 sps:$4 sm:$0xff]  }
 0x117   : > { %1392 = vmatprep.subr.bf16.mxu1 %v8618_v48  ;;  %v10517_v48 = vld [vmem:[%s12142_s6 + $0x120] ss:$48 sps:$4 sm:$0xff]  }
 0x118   : > { %1320 = vmatpush1.bf16.msra.mxu0 %v8615_v33  ;;  %v470_v33 = vld [vmem:[#allocation5 + $0x3d8] sm:$0xff] }
 0x119   : > { %1321 = vmatprep.subr.bf16.mxu0 %v8624_v36  ;;  %v8666_v36 = vcombine.high %v462_v25, %v466_v26  ;;  %v8674_v40 = vcombine.high %v470_v33, %v474_v34  ;;  %v8673_v43 = vcombine.low %v470_v33, %v474_v34  ;;  %v10576_v25 = vld [vmem:[%s12142_s6 + $0x48c] ss:$48 sps:$4 sm:$0xff]   ;;  %v10574_v26 = vld [vmem:[%s12142_s6 + $0x488] ss:$48 sps:$4 sm:$0xff]   ;;  %v10589_v33 = vld [vmem:[%s12142_s6 + $0x5a0] ss:$48 sps:$4 sm:$0xff]  }
 0x11a   : > { %1393 = vmatpush1.bf16.msra.mxu1 %v8617_v55  ;;  %v10531_v55 = vld [vmem:[%s12142_s6 + $0x1e4] ss:$48 sps:$4 sm:$0xff]  }
 0x11b   : > { %1394 = vmatprep.subr.bf16.mxu1 %v8626_v58  ;;  %v10529_v58 = vld [vmem:[%s12142_s6 + $0x1e0] ss:$48 sps:$4 sm:$0xff]   ;;  %v10597_v34 = vld [vmem:[%s12142_s6 + $0x604] ss:$48 sps:$4 sm:$0xff]  }
 0x11c   : > { %1322 = vmatpush1.bf16.msra.mxu0 %v8623_v41  ;;  %v10513_v41 = vld [vmem:[%s12142_s6 + $0xc4] ss:$48 sps:$4 sm:$0xff]  }
 0x11d   : > { %1323 = vmatprep.subr.bf16.mxu0 %v8632_v44  ;;  %v10511_v44 = vld [vmem:[%s12142_s6 + $0xc0] ss:$48 sps:$4 sm:$0xff]  }
 0x11e   : > { %1395 = vmatpush1.bf16.msra.mxu1 %v8625_v62  ;;  %v10532_v62 = vld [vmem:[%s12142_s6 + $0x1e8] ss:$48 sps:$4 sm:$0xff]  }
 0x11f   : > { %1396 = vmatprep.subr.bf16.mxu1 %v8634_v1  ;;  %v10538_v1 = vld [vmem:[%s12142_s6 + $0x248] ss:$48 sps:$4 sm:$0xff]  }
 0x120   : > { %1324 = vmatpush1.bf16.msra.mxu0 %v8631_v50  ;;  %v10525_v50 = vld [vmem:[%s12142_s6 + $0x184] ss:$48 sps:$4 sm:$0xff]  }
 0x121   : > { %1325 = vmatprep.subr.bf16.mxu0 %v8640_v54  ;;  %v10523_v54 = vld [vmem:[%s12142_s6 + $0x180] ss:$48 sps:$4 sm:$0xff]  }
 0x122   : > { %1397 = vmatpush1.bf16.msra.mxu1 %v8633_v7  ;;  %v10552_v7 = vld [vmem:[%s12142_s6 + $0x30c] ss:$48 sps:$4 sm:$0xff]  }
 0x123   : > { %1398 = vmatprep.subr.bf16.mxu1 %v8642_v12  ;;  %v10567_v12 = vld [vmem:[%s12142_s6 + $0x424] ss:$48 sps:$4 sm:$0xff]  }
 0x124   : > { %1326 = vmatpush1.bf16.msra.mxu0 %v8639_v59  ;;  %v10528_v59 = vld [vmem:[%s12142_s6 + $0x18c] ss:$48 sps:$4 sm:$0xff]  }
 0x125   : > { %1327 = vmatprep.subr.bf16.mxu0 %v8648_v24  ;;  %v10543_v24 = vld [vmem:[%s12142_s6 + $0x2a4] ss:$48 sps:$4 sm:$0xff]  }
 0x126   : > { %1399 = vmatpush1.bf16.msra.mxu1 %v8641_v17  ;;  %v10562_v17 = vld [vmem:[%s12142_s6 + $0x3c8] ss:$48 sps:$4 sm:$0xff]  }
 0x127   : > { %1400 = vmatprep.subr.bf16.mxu1 %v8650_v20  ;;  %v10570_v20 = vld [vmem:[%s12142_s6 + $0x42c] ss:$48 sps:$4 sm:$0xff]  }
 0x128   : > { %1328 = vmatpush1.bf16.msra.mxu0 %v8647_v2  ;;  %v10547_v2 = vld [vmem:[%s12142_s6 + $0x300] ss:$48 sps:$4 sm:$0xff]  }
 0x129   : > { %1329 = vmatprep.subr.bf16.mxu0 %v8656_v6  ;;  %v10544_v6 = vld [vmem:[%s12142_s6 + $0x2a8] ss:$48 sps:$4 sm:$0xff]  }
 0x12a   : > { %1401 = vmatpush1.bf16.msra.mxu1 %v8649_v23  ;;  %v10585_v23 = vld [vmem:[%s12142_s6 + $0x544] ss:$48 sps:$4 sm:$0xff]  }
 0x12b   : > { %1402 = vmatprep.subr.bf16.mxu1 %v8658_v28  ;;  %v10583_v28 = vld [vmem:[%s12142_s6 + $0x540] ss:$48 sps:$4 sm:$0xff]  }
 0x12c   : > { %1330 = vmatpush1.bf16.msra.mxu0 %v8655_v13  ;;  %v10558_v13 = vld [vmem:[%s12142_s6 + $0x36c] ss:$48 sps:$4 sm:$0xff]  }
 0x12d   : > { %1331 = vmatprep.subr.bf16.mxu0 %v8664_v16  ;;  %v10564_v16 = vld [vmem:[%s12142_s6 + $0x3cc] ss:$48 sps:$4 sm:$0xff]  }
 0x12e   : > { %1403 = vmatpush1.bf16.msra.mxu1 %v8657_v32  ;;  %v10580_v32 = vld [vmem:[%s12142_s6 + $0x4e8] ss:$48 sps:$4 sm:$0xff]  }
 0x12f   : > { %1404 = vmatprep.subr.bf16.mxu1 %v8666_v36  ;;  %v10586_v36 = vld [vmem:[%s12142_s6 + $0x548] ss:$48 sps:$4 sm:$0xff]  }
 0x130   : > { %1332 = vmatpush1.bf16.msra.mxu0 %v8663_v21  ;;  %v10568_v21 = vld [vmem:[%s12142_s6 + $0x428] ss:$48 sps:$4 sm:$0xff]  }
 0x131   : > { %1333 = vmatprep.subr.bf16.mxu0 %v8672_v22  ;;  %v10577_v22 = vld [vmem:[%s12142_s6 + $0x4e0] ss:$48 sps:$4 sm:$0xff]  }
 0x132   : > { %1405 = vmatpush1.bf16.msra.mxu1 %v8665_v38  ;;  %v10592_v38 = vld [vmem:[%s12142_s6 + $0x5a8] ss:$48 sps:$4 sm:$0xff]  }
 0x133   : > { %1406 = vmatprep.subr.bf16.mxu1 %v8674_v40  ;;  %v477_v40 = vlaneseq }
 0x134   : > { %1334 = vmatpush1.bf16.msra.mxu0 %v8671_v30  ;;  %v10582_v30 = vld [vmem:[%s12142_s6 + $0x4ec] ss:$48 sps:$4 sm:$0xff]  }
 0x135   : > { %6153 = vmatprep.subr.bf16.mxu0 %v10501_v29  ;;  %v10591_v29 = vld [vmem:[%s12142_s6 + $0x5a4] ss:$48 sps:$4 sm:$0xff]  }
 0x136   : > { %1407 = vmatpush1.bf16.msra.mxu1 %v8673_v43 }
 0x137   : > { %1336 = vmatmul.mubr.bf16.vlgmr.msra.gmra.mrb[16].mxu0 %v12152_v4  ;;  %6445 = vmatprep.subr.bf16.mxu1 %v10504_v42  ;;  %v12264_v42 = vld [vmem:[#allocation7] sm:$0xff] }
 0x138   : > { %1345 = vmatprep.mubr.bf16.mxu0 %v12154_v8  ;;  %6154 = vmatpush1.bf16.msra.mxu0 %v10499_v35  ;;  %v10588_v35 = vld [vmem:[%s12142_s6 + $0x54c] ss:$48 sps:$4 sm:$0xff]  }
 0x139   : > { %6155 = vmatprep.subr.bf16.mxu0 %v10507_v37  ;;  %1409 = vmatmul.mubr.bf16.vlgmr.msra.gmra.mrb[16].mxu1 %v12152_v4  ;;  %v10522_v4 = vld [vmem:[%s12142_s6 + $0x12c] ss:$48 sps:$4 sm:$0xff]  }
 0x13a   : > { %6446 = vmatpush1.bf16.msra.mxu1 %v10502_v46  ;;  %1418 = vmatprep.mubr.bf16.mxu1 %v12154_v8  ;;  %v10537_v8 = vld [vmem:[%s12142_s6 + $0x244] ss:$48 sps:$4 sm:$0xff]   ;;  %v10594_v37 = vld [vmem:[%s12142_s6 + $0x5ac] ss:$48 sps:$4 sm:$0xff]  }
 0x13b   : > { %6447 = vmatprep.subr.bf16.mxu1 %v10510_v47 }
 0x13c   : > { %6156 = vmatpush1.bf16.msra.mxu0 %v10505_v39  ;;  %v10600_v39 = vld [vmem:[%s12142_s6 + $0x60c] ss:$48 sps:$4 sm:$0xff]  }
 0x13d   : > { %6157 = vmatprep.subr.bf16.mxu0 %v10513_v41  ;;  %v12262_v41 = vshrl.u32 %v477_v40, 7 }
 0x13e   : > { %6448 = vmatpush1.bf16.msra.mxu1 %v10508_v51 }
 0x13f   : > { %1346 = vmatmul.mubr.bf16.gmra.mrb[20].mxu0 %v12158_v27  ;;  %6449 = vmatprep.subr.bf16.mxu1 %v10516_v52  ;;  %v12267_v43 = vsub.s32 0, %v12262_v41 }
 0x140   : > { %1355 = vmatprep.mubr.bf16.mxu0 %v12160_v31  ;;  %6158 = vmatpush1.bf16.msra.mxu0 %v10511_v44  ;;  %v12270_v44 = vsub.s32 1, %v12262_v41 }
 0x141   : > { %6159 = vmatprep.subr.bf16.mxu0 %v10519_v45  ;;  %1419 = vmatmul.mubr.bf16.gmra.mrb[20].mxu1 %v12158_v27  ;;  %v10534_v27 = vld [vmem:[%s12142_s6 + $0x1ec] ss:$48 sps:$4 sm:$0xff]   ;;  %v12274_v45 = vrot.slane %v12264_v42, %v12267_v43 }
 0x142   : > { %6450 = vmatpush1.bf16.msra.mxu1 %v10514_v56  ;;  %1428 = vmatprep.mubr.bf16.mxu1 %v12160_v31  ;;  %v10541_v31 = vld [vmem:[%s12142_s6 + $0x2a0] ss:$48 sps:$4 sm:$0xff]   ;;  %v12278_v47 = vrot.slane %v12264_v42, %v12270_v44 }
 0x143   : > { %6451 = vmatprep.subr.bf16.mxu1 %v10522_v4  ;;  %v10595_v4 = vld [vmem:[%s12142_s6 + $0x600] ss:$48 sps:$4 sm:$0xff]  }
 0x144   : > { %6160 = vmatpush1.bf16.msra.mxu0 %v10517_v48 }
 0x145   : > { %6161 = vmatprep.subr.bf16.mxu0 %v10525_v50 }
 0x146   : > { %6452 = vmatpush1.bf16.msra.mxu1 %v10520_v57  ;;  %v10598_v57 = vld [vmem:[%s12142_s6 + $0x608] ss:$48 sps:$4 sm:$0xff]  }
 0x147   : > { %1356 = vmatmul.mubr.bf16.gmra.mrb[24].mxu0 %v12165_v49  ;;  %6453 = vmatprep.subr.bf16.mxu1 %v10528_v59  ;;  %v12292_v59 = vsub.s32 3, %v12262_v41 }
 0x148   : > { %1365 = vmatprep.mubr.bf16.mxu0 %v12168_v53  ;;  %6162 = vmatpush1.bf16.msra.mxu0 %v10523_v54 }
 0x149   : > { %6163 = vmatprep.subr.bf16.mxu0 %v10531_v55  ;;  %1429 = vmatmul.mubr.bf16.gmra.mrb[24].mxu1 %v12165_v49  ;;  %v10553_v49 = vld [vmem:[%s12142_s6 + $0x360] ss:$48 sps:$4 sm:$0xff]  }
 0x14a   : > { %6454 = vmatpush1.bf16.msra.mxu1 %v10526_v60  ;;  %1438 = vmatprep.mubr.bf16.mxu1 %v12168_v53  ;;  %v10561_v53 = vld [vmem:[%s12142_s6 + $0x3c4] ss:$48 sps:$4 sm:$0xff]  }
 0x14b   : > { %6455 = vmatprep.subr.bf16.mxu1 %v10534_v27 }
 0x14c   : > { %6164 = vmatpush1.bf16.msra.mxu0 %v10529_v58  ;;  %v12287_v58 = vsub.s32 2, %v12262_v41 }
 0x14d   : > { %6165 = vmatprep.subr.bf16.mxu0 %v10537_v8 }
 0x14e   : > { %6456 = vmatpush1.bf16.msra.mxu1 %v10532_v62  ;;  %v12302_v62 = vrot.slane %v12264_v42, %v12287_v58 }
 0x14f   : > { %1366 = vmatmul.mubr.bf16.gmra.mrb[28].mxu0 %v12173_v9  ;;  %6457 = vmatprep.subr.bf16.mxu1 %v10540_v0  ;;  %v12309_v0 = vrot.slane %v12264_v42, %v12292_v59 }
 0x150   : > { %6166 = vmatpush1.bf16.msra.mxu0 %v10535_v61  ;;  %v10603_v61 = vld [vmem:[%s12142_s6 + $0x664] ss:$48 sps:$4 sm:$0xff]  }
 0x151   : > { %6167 = vmatprep.subr.bf16.mxu0 %v10543_v24  ;;  %1439 = vmatmul.mubr.bf16.gmra.mrb[28].mxu1 %v12173_v9  ;;  %v10565_v9 = vld [vmem:[%s12142_s6 + $0x420] ss:$48 sps:$4 sm:$0xff]   ;;  %v10606_v24 = vld [vmem:[%s12142_s6 + $0x66c] ss:$48 sps:$4 sm:$0xff]  }
 0x152   : > { %6458 = vmatpush1.bf16.msra.mxu1 %v10538_v1  ;;  %v10601_v1 = vld [vmem:[%s12142_s6 + $0x660] ss:$48 sps:$4 sm:$0xff]  }
 0x153   : > { %6459 = vmatprep.subr.bf16.mxu1 %v10546_v5 }
 0x154   : > { %6168 = vmatpush1.bf16.msra.mxu0 %v10541_v31 }
 0x155   : > { %6169 = vmatprep.subr.bf16.mxu0 %v10549_v63 }
 0x156   : > { %6460 = vmatpush1.bf16.msra.mxu1 %v10544_v6  ;;  %v10609_v6 = vld [vmem:[%s12142_s6 + $0x6c4] ss:$48 sps:$4 sm:$0xff]  }
 0x157   : > { %6461 = vmatprep.subr.bf16.mxu1 %v10552_v7 }
 0x158   : > { %6170 = vmatpush1.bf16.msra.mxu0 %v10547_v2  ;;  %v10604_v2 = vld [vmem:[%s12142_s6 + $0x668] ss:$48 sps:$4 sm:$0xff]  }
 0x159   : > { %6171 = vmatprep.subr.bf16.mxu0 %v10555_v3 }
 0x15a   : > { %6462 = vmatpush1.bf16.msra.mxu1 %v10550_v10 }
 0x15b   : > { %6463 = vmatprep.subr.bf16.mxu1 %v10558_v13 }
 0x15c   : > { %6172 = vmatpush1.bf16.msra.mxu0 %v10553_v49  ;;  %v10612_v49 = vld [vmem:[%s12142_s6 + $0x6cc] ss:$48 sps:$4 sm:$0xff]  }
 0x15d   : > { %6173 = vmatprep.subr.bf16.mxu0 %v10561_v53 }
 0x15e   : > { %6464 = vmatpush1.bf16.msra.mxu1 %v10556_v14 }
 0x15f   : > { %6465 = vmatprep.subr.bf16.mxu1 %v10564_v16 }
 0x160   : > { %6174 = vmatpush1.bf16.msra.mxu0 %v10559_v11  ;;  %v10607_v11 = vld [vmem:[%s12142_s6 + $0x6c0] ss:$48 sps:$4 sm:$0xff]  }
 0x161   : > { %6175 = vmatprep.subr.bf16.mxu0 %v10567_v12  ;;  %v10610_v12 = vld [vmem:[%s12142_s6 + $0x6c8] ss:$48 sps:$4 sm:$0xff]  }
 0x162   : > { %6466 = vmatpush1.bf16.msra.mxu1 %v10562_v17 }
 0x163   : > { %6467 = vmatprep.subr.bf16.mxu1 %v10570_v20 }
 0x164   : > { %6176 = vmatpush1.bf16.msra.mxu0 %v10565_v9 }
 0x165   : > { %6177 = vmatprep.subr.bf16.mxu0 %v10573_v15 }
 0x166   : > { %6468 = vmatpush1.bf16.msra.mxu1 %v10568_v21  ;;  %v10615_v21 = vld [vmem:[%s12142_s6 + $0x724] ss:$48 sps:$4 sm:$0xff]  }
 0x167   : > { %6469 = vmatprep.subr.bf16.mxu1 %v10576_v25 }
 0x168   : > { %6178 = vmatpush1.bf16.msra.mxu0 %v10571_v18 }
 0x169   : > { %6179 = vmatprep.subr.bf16.mxu0 %v10579_v19 }
 0x16a   : > { %6470 = vmatpush1.bf16.msra.mxu1 %v10574_v26 }
 0x16b   : > { %6471 = vmatprep.subr.bf16.mxu1 %v10582_v30 }
 0x16c   : > { %6180 = vmatpush1.bf16.msra.mxu0 %v10577_v22  ;;  %v10618_v22 = vld [vmem:[%s12142_s6 + $0x72c] ss:$48 sps:$4 sm:$0xff]  }
 0x16d   : > { %6181 = vmatprep.subr.bf16.mxu0 %v10585_v23 }
 0x16e   : > { %6472 = vmatpush1.bf16.msra.mxu1 %v10580_v32  ;;  %v10613_v32 = vld [vmem:[%s12142_s6 + $0x720] ss:$48 sps:$4 sm:$0xff]  }
 0x16f   : > { %6473 = vmatprep.subr.bf16.mxu1 %v10588_v35 }
 0x170   : > { %6182 = vmatpush1.bf16.msra.mxu0 %v10583_v28 }
 0x171   : > { %6183 = vmatprep.subr.bf16.mxu0 %v10591_v29 }
 0x172   : > { %6474 = vmatpush1.bf16.msra.mxu1 %v10586_v36  ;;  %v10621_v36 = vld [vmem:[%s12142_s6 + $0x784] ss:$48 sps:$4 sm:$0xff]  }
 0x173   : > { %6475 = vmatprep.subr.bf16.mxu1 %v10594_v37  ;;  %v10624_v37 = vld [vmem:[%s12142_s6 + $0x78c] ss:$48 sps:$4 sm:$0xff]  }
 0x174   : > { %6184 = vmatpush1.bf16.msra.mxu0 %v10589_v33  ;;  %v10616_v33 = vld [vmem:[%s12142_s6 + $0x728] ss:$48 sps:$4 sm:$0xff]  }
 0x175   : > { %6226 = vmatprep.subr.bf16.mxu0 %v10597_v34 }
 0x176   : > { %6476 = vmatpush1.bf16.msra.mxu1 %v10592_v38 }
 0x177   : > { %6518 = vmatprep.subr.bf16.mxu1 %v10600_v39 }
 0x1ca   : > { %v1191_v46 = vpop.f32.mrb[0].mxu0 }
 0x1cb   : > { %v1193_v48 = vpop.f32.mrb[1].mxu0  ;;  %v1192_v51 = vadd.f32 %v1191_v46, %v12274_v45  ;;  %v10619_v46 = vld [vmem:[%s12142_s6 + $0x780] ss:$48 sps:$4 sm:$0xff]  }
 0x1cc   : > { %v1195_v50 = vpop.f32.mrb[2].mxu0  ;;  %v1194_v55 = vadd.f32 %v1193_v48, %v12278_v47  ;;  %v1264_v10 = vpop.f32.mrb[0].mxu1  ;;  %v10622_v48 = vld [vmem:[%s12142_s6 + $0x788] ss:$48 sps:$4 sm:$0xff]  }
 0x1cd   : > { %v1196_v52 = vadd.f32 %v1195_v50, %v12274_v45  ;;  %v1197_v54 = vpop.f32.mrb[3].mxu0  ;;  %v1265_v14 = vadd.f32 %v1264_v10, %v12302_v62  ;;  %v1266_v9 = vpop.f32.mrb[1].mxu1  ;;  %v10633_v10 = vld [vmem:[%s12142_s6 + $0x844] ss:$48 sps:$4 sm:$0xff]  }
 0x1ce   : > { %v1198_v56 = vadd.f32 %v1197_v54, %v12278_v47  ;;  %v1267_v16 = vadd.f32 %v1266_v9, %v12309_v0  ;;  %v1268_v17 = vpop.f32.mrb[2].mxu1  ;;  %v10631_v9 = vld [vmem:[%s12142_s6 + $0x840] ss:$48 sps:$4 sm:$0xff]  }
 0x1cf   : > { %v12289_v8 = vpack.c.bf16 %v1196_v52, %v1192_v51  ;;  %v1269_v19 = vadd.f32 %v1268_v17, %v12302_v62  ;;  %v1270_v20 = vpop.f32.mrb[3].mxu1 }
 0x1d0   : > { %v12294_v60 = vpack.c.bf16 %v1198_v56, %v1194_v55  ;;  %v1271_v23 = vadd.f32 %v1270_v20, %v12309_v0 }
 0x1d1   : > { %v12332_v26 = vpack.c.bf16 %v1269_v19, %v1265_v14 }
 0x1d2   : > { %6185 = vmatprep.mubr.bf16.mxu0 %v12294_v60  ;;  %6477 = vmatprep.mubr.bf16.mxu1 %v12294_v60  ;;  %v1201_v27 = vpop.f32.mrb[4].mxu0  ;;  %v12337_v30 = vpack.c.bf16 %v1271_v23, %v1267_v16  ;;  %v10634_v16 = vld [vmem:[%s12142_s6 + $0x848] ss:$48 sps:$4 sm:$0xff]  }
 0x1d3   : > { %6186 = vmatmul.mubr.bf16.vlgmr.msra.gmra.mrb[32].mxu0 %v12289_v8  ;;  %6478 = vmatmul.mubr.bf16.vlgmr.msra.gmra.mrb[32].mxu1 %v12289_v8  ;;  %v1202_v31 = vadd.f32 %v1201_v27, %v12274_v45  ;;  %v1203_v63 = vpop.f32.mrb[5].mxu0  ;;  %v10630_v27 = vld [vmem:[%s12142_s6 + $0x7ec] ss:$48 sps:$4 sm:$0xff]  }
 0x1d4   : > { %6227 = vmatpush1.bf16.msra.mxu0 %v10595_v4  ;;  %6519 = vmatpush1.bf16.msra.mxu1 %v10598_v57  ;;  %v1204_v3 = vadd.f32 %v1203_v63, %v12278_v47  ;;  %v1205_v5 = vpop.f32.mrb[6].mxu0  ;;  %v1274_v40 = vpop.f32.mrb[4].mxu1 }
 0x1d5   : > { %6228 = vmatprep.subr.bf16.mxu0 %v10603_v61  ;;  %6520 = vmatprep.subr.bf16.mxu1 %v10606_v24  ;;  %v1206_v53 = vadd.f32 %v1205_v5, %v12274_v45  ;;  %v1207_v7 = vpop.f32.mrb[7].mxu0  ;;  %v1275_v51 = vadd.f32 %v1274_v40, %v12302_v62  ;;  %v1276_v52 = vpop.f32.mrb[5].mxu1  ;;  %v10627_v24 = vld [vmem:[%s12142_s6 + $0x7e4] ss:$48 sps:$4 sm:$0xff]   ;;  %v10643_v40 = vld [vmem:[%s12142_s6 + $0x900] ss:$48 sps:$4 sm:$0xff]  }
 0x1d6   : > { %v1208_v13 = vadd.f32 %v1207_v7, %v12278_v47  ;;  %v1277_v55 = vadd.f32 %v1276_v52, %v12309_v0  ;;  %v1278_v56 = vpop.f32.mrb[6].mxu1 }
 0x1d7   : > { %v12321_v15 = vpack.c.bf16 %v1206_v53, %v1202_v31  ;;  %v1279_v57 = vadd.f32 %v1278_v56, %v12302_v62  ;;  %v1280_v61 = vpop.f32.mrb[7].mxu1 }
 0x1d8   : > { %6229 = vmatpush1.bf16.msra.mxu0 %v10601_v1  ;;  %6521 = vmatpush1.bf16.msra.mxu1 %v10604_v2  ;;  %v12324_v18 = vpack.c.bf16 %v1208_v13, %v1204_v3  ;;  %v1281_v31 = vadd.f32 %v1280_v61, %v12309_v0  ;;  %v10654_v61 = vld [vmem:[%s12142_s6 + $0x96c] ss:$48 sps:$4 sm:$0xff]  }
 0x1d9   : > { %6230 = vmatprep.subr.bf16.mxu0 %v10609_v6  ;;  %6522 = vmatprep.subr.bf16.mxu1 %v10612_v49  ;;  %v12360_v1 = vpack.c.bf16 %v1279_v57, %v1275_v51  ;;  %v10625_v6 = vld [vmem:[%s12142_s6 + $0x7e0] ss:$48 sps:$4 sm:$0xff]   ;;  %v10628_v49 = vld [vmem:[%s12142_s6 + $0x7e8] ss:$48 sps:$4 sm:$0xff]   ;;  %v10651_v57 = vld [vmem:[%s12142_s6 + $0x964] ss:$48 sps:$4 sm:$0xff]  }
 0x1da   : > { %v1211_v25 = vpop.f32.mrb[8].mxu0  ;;  %6195 = vmatprep.mubr.bf16.mxu0 %v12324_v18  ;;  %6487 = vmatprep.mubr.bf16.mxu1 %v12324_v18  ;;  %v12365_v5 = vpack.c.bf16 %v1281_v31, %v1277_v55  ;;  %v10652_v31 = vld [vmem:[%s12142_s6 + $0x968] ss:$48 sps:$4 sm:$0xff]  }
 0x1db   : > { %v1212_v28 = vadd.f32 %v1211_v25, %v12274_v45  ;;  %v1213_v29 = vpop.f32.mrb[9].mxu0  ;;  %6196 = vmatmul.mubr.bf16.gmra.mrb[36].mxu0 %v12321_v15  ;;  %6488 = vmatmul.mubr.bf16.gmra.mrb[36].mxu1 %v12321_v15 }
 0x1dc   : > { %6231 = vmatpush1.bf16.msra.mxu0 %v10607_v11  ;;  %6523 = vmatpush1.bf16.msra.mxu1 %v10610_v12  ;;  %v1214_v34 = vadd.f32 %v1213_v29, %v12278_v47  ;;  %v1215_v35 = vpop.f32.mrb[10].mxu0  ;;  %v10636_v11 = vld [vmem:[%s12142_s6 + $0x84c] ss:$48 sps:$4 sm:$0xff]   ;;  %v1284_v14 = vpop.f32.mrb[8].mxu1 }
 0x1dd   : > { %6232 = vmatprep.subr.bf16.mxu0 %v10615_v21  ;;  %6524 = vmatprep.subr.bf16.mxu1 %v10618_v22  ;;  %v1216_v38 = vadd.f32 %v1215_v35, %v12274_v45  ;;  %v1217_v39 = vpop.f32.mrb[11].mxu0  ;;  %v1285_v19 = vadd.f32 %v1284_v14, %v12302_v62  ;;  %v1286_v20 = vpop.f32.mrb[9].mxu1  ;;  %v10642_v29 = vld [vmem:[%s12142_s6 + $0x8ac] ss:$48 sps:$4 sm:$0xff]   ;;  %v10670_v14 = vld [vmem:[%s12142_s6 + $0xa88] ss:$48 sps:$4 sm:$0xff]  }
 0x1de   : > { %v1218_v50 = vadd.f32 %v1217_v39, %v12278_v47  ;;  %v1287_v22 = vadd.f32 %v1286_v20, %v12309_v0  ;;  %v1288_v23 = vpop.f32.mrb[10].mxu1  ;;  %v495_v20 = vsub.s32 4, %v12262_v41 }
 0x1df   : > { %v12349_v54 = vpack.c.bf16 %v1216_v38, %v1212_v28  ;;  %v1289_v25 = vadd.f32 %v1288_v23, %v12302_v62  ;;  %v1290_v28 = vpop.f32.mrb[11].mxu1  ;;  %v10648_v38 = vld [vmem:[%s12142_s6 + $0x90c] ss:$48 sps:$4 sm:$0xff]  }
 0x1e0   : > { %6233 = vmatpush1.bf16.msra.mxu0 %v10613_v32  ;;  %6525 = vmatpush1.bf16.msra.mxu1 %v10616_v33  ;;  %v12352_v4 = vpack.c.bf16 %v1218_v50, %v1214_v34  ;;  %v1291_v32 = vadd.f32 %v1290_v28, %v12309_v0  ;;  %v10637_v33 = vld [vmem:[%s12142_s6 + $0x8a0] ss:$48 sps:$4 sm:$0xff]   ;;  %v10640_v34 = vld [vmem:[%s12142_s6 + $0x8a8] ss:$48 sps:$4 sm:$0xff]   ;;  %v10684_v23 = vld [vmem:[%s12142_s6 + $0xb4c] ss:$48 sps:$4 sm:$0xff]  }
 0x1e1   : > { %6234 = vmatprep.subr.bf16.mxu0 %v10621_v36  ;;  %6526 = vmatprep.subr.bf16.mxu1 %v10624_v37  ;;  %v12390_v35 = vpack.c.bf16 %v1289_v25, %v1285_v19  ;;  %v10645_v37 = vld [vmem:[%s12142_s6 + $0x904] ss:$48 sps:$4 sm:$0xff]   ;;  %v10676_v19 = vld [vmem:[%s12142_s6 + $0xae8] ss:$48 sps:$4 sm:$0xff]   ;;  %v13607_v25 = vsub.s32 5, %v12262_v41 }
 0x1e2   : > { %v1221_v63 = vpop.f32.mrb[12].mxu0  ;;  %6205 = vmatprep.mubr.bf16.mxu0 %v12352_v4  ;;  %6497 = vmatprep.mubr.bf16.mxu1 %v12352_v4  ;;  %v12394_v36 = vpack.c.bf16 %v1291_v32, %v1287_v22  ;;  %v10681_v22 = vld [vmem:[%s12142_s6 + $0xb44] ss:$48 sps:$4 sm:$0xff]   ;;  %v10679_v28 = vld [vmem:[%s12142_s6 + $0xb40] ss:$48 sps:$4 sm:$0xff]  }
 0x1e3   : > { %v1222_v2 = vadd.f32 %v1221_v63, %v12274_v45  ;;  %v1223_v3 = vpop.f32.mrb[13].mxu0  ;;  %6206 = vmatmul.mubr.bf16.gmra.mrb[40].mxu0 %v12349_v54  ;;  %6498 = vmatmul.mubr.bf16.gmra.mrb[40].mxu1 %v12349_v54  ;;  %v10687_v32 = vld [vmem:[%s12142_s6 + $0xba4] ss:$48 sps:$4 sm:$0xff]  }
 0x1e4   : > { %6235 = vmatpush1.bf16.msra.mxu0 %v10619_v46  ;;  %6527 = vmatpush1.bf16.msra.mxu1 %v10622_v48  ;;  %v1224_v53 = vadd.f32 %v1223_v3, %v12278_v47  ;;  %v1225_v7 = vpop.f32.mrb[14].mxu0  ;;  %v1294_v39 = vpop.f32.mrb[12].mxu1  ;;  %v10646_v46 = vld [vmem:[%s12142_s6 + $0x908] ss:$48 sps:$4 sm:$0xff]   ;;  %v10660_v3 = vld [vmem:[%s12142_s6 + $0x9cc] ss:$48 sps:$4 sm:$0xff]  }
 0x1e5   : > { %6236 = vmatprep.subr.bf16.mxu0 %v10627_v24  ;;  %6528 = vmatprep.subr.bf16.mxu1 %v10630_v27  ;;  %v1226_v12 = vadd.f32 %v1225_v7, %v12274_v45  ;;  %v1227_v13 = vpop.f32.mrb[15].mxu0  ;;  %v1295_v48 = vadd.f32 %v1294_v39, %v12302_v62  ;;  %v1296_v50 = vpop.f32.mrb[13].mxu1  ;;  %v10649_v27 = vld [vmem:[%s12142_s6 + $0x960] ss:$48 sps:$4 sm:$0xff]  }
 0x1e6   : > { %v1228_v17 = vadd.f32 %v1227_v13, %v12278_v47  ;;  %v10639_v47 = vld [vmem:[%s12142_s6 + $0x8a4] ss:$48 sps:$4 sm:$0xff]   ;;  %v1297_v51 = vadd.f32 %v1296_v50, %v12309_v0  ;;  %v1298_v52 = vpop.f32.mrb[14].mxu1  ;;  %v10661_v7 = vld [vmem:[%s12142_s6 + $0xa20] ss:$48 sps:$4 sm:$0xff]  }
 0x1e7   : > { %v12377_v21 = vpack.c.bf16 %v1226_v12, %v1222_v2  ;;  %v1299_v55 = vadd.f32 %v1298_v52, %v12302_v62  ;;  %v1300_v56 = vpop.f32.mrb[15].mxu1  ;;  %v10657_v62 = vld [vmem:[%s12142_s6 + $0x9c4] ss:$48 sps:$4 sm:$0xff]   ;;  %v10672_v12 = vld [vmem:[%s12142_s6 + $0xa8c] ss:$48 sps:$4 sm:$0xff]  }
 0x1e8   : > { %6237 = vmatpush1.bf16.msra.mxu0 %v10625_v6  ;;  %6529 = vmatpush1.bf16.msra.mxu1 %v10628_v49  ;;  %v12380_v45 = vpack.c.bf16 %v1228_v17, %v1224_v53  ;;  %v1301_v24 = vadd.f32 %v1300_v56, %v12309_v0  ;;  %v10655_v6 = vld [vmem:[%s12142_s6 + $0x9c0] ss:$48 sps:$4 sm:$0xff]   ;;  %v10658_v0 = vld [vmem:[%s12142_s6 + $0x9c8] ss:$48 sps:$4 sm:$0xff]   ;;  %v10663_v49 = vld [vmem:[%s12142_s6 + $0xa24] ss:$48 sps:$4 sm:$0xff]  }
 0x1e9   : > { %6238 = vmatprep.subr.bf16.mxu0 %v10633_v10  ;;  %6530 = vmatprep.subr.bf16.mxu1 %v10636_v11  ;;  %v12410_v63 = vpack.c.bf16 %v1299_v55, %v1295_v48  ;;  %v10666_v53 = vld [vmem:[%s12142_s6 + $0xa2c] ss:$48 sps:$4 sm:$0xff]   ;;  %v10664_v10 = vld [vmem:[%s12142_s6 + $0xa28] ss:$48 sps:$4 sm:$0xff]   ;;  %v10669_v11 = vld [vmem:[%s12142_s6 + $0xa84] ss:$48 sps:$4 sm:$0xff]  }
 0x1ea   : > { %6215 = vmatprep.mubr.bf16.mxu0 %v12380_v45  ;;  %6507 = vmatprep.mubr.bf16.mxu1 %v12380_v45  ;;  %v12412_v2 = vpack.c.bf16 %v1301_v24, %v1297_v51  ;;  %v10667_v13 = vld [vmem:[%s12142_s6 + $0xa80] ss:$48 sps:$4 sm:$0xff]   ;;  %v10693_v48 = vld [vmem:[%s12142_s6 + $0xc04] ss:$48 sps:$4 sm:$0xff]   ;;  %v10696_v50 = vld [vmem:[%s12142_s6 + $0xc0c] ss:$48 sps:$4 sm:$0xff]  }
 0x1eb   : > { %6216 = vmatmul.mubr.bf16.gmra.mrb[44].mxu0 %v12377_v21  ;;  %6508 = vmatmul.mubr.bf16.gmra.mrb[44].mxu1 %v12377_v21  ;;  %v10673_v17 = vld [vmem:[%s12142_s6 + $0xae0] ss:$48 sps:$4 sm:$0xff]   ;;  %v10694_v56 = vld [vmem:[%s12142_s6 + $0xc08] ss:$48 sps:$4 sm:$0xff]   ;;  %v13608_v24 = vsub.s32 6, %v12262_v41 }
 0x1ec   : > { %6239 = vmatpush1.bf16.msra.mxu0 %v10631_v9  ;;  %6531 = vmatpush1.bf16.msra.mxu1 %v10634_v16  ;;  %v10675_v9 = vld [vmem:[%s12142_s6 + $0xae4] ss:$48 sps:$4 sm:$0xff]   ;;  %v10678_v16 = vld [vmem:[%s12142_s6 + $0xaec] ss:$48 sps:$4 sm:$0xff]   ;;  %v10691_v55 = vld [vmem:[%s12142_s6 + $0xc00] ss:$48 sps:$4 sm:$0xff]  }
 0x1ed   : > { %6240 = vmatprep.subr.bf16.mxu0 %v10639_v47  ;;  %6532 = vmatprep.subr.bf16.mxu1 %v10642_v29  ;;  %v10682_v47 = vld [vmem:[%s12142_s6 + $0xb48] ss:$48 sps:$4 sm:$0xff]   ;;  %v12439_v29 = vrot.slane %v12264_v42, %v495_v20 }
 0x1ee   : > { %6258 = vmatprep.mubr.bf16.mxu0 %v12337_v30  ;;  %6550 = vmatprep.mubr.bf16.mxu1 %v12337_v30 }
 0x1f0   : > { %6241 = vmatpush1.bf16.msra.mxu0 %v10637_v33  ;;  %6533 = vmatpush1.bf16.msra.mxu1 %v10640_v34  ;;  %v10690_v33 = vld [vmem:[%s12142_s6 + $0xbac] ss:$48 sps:$4 sm:$0xff]   ;;  %v12446_v34 = vrot.slane %v12264_v42, %v13607_v25 }
 0x1f1   : > { %6242 = vmatprep.subr.bf16.mxu0 %v10645_v37  ;;  %6534 = vmatprep.subr.bf16.mxu1 %v10648_v38  ;;  %v10685_v37 = vld [vmem:[%s12142_s6 + $0xba0] ss:$48 sps:$4 sm:$0xff]   ;;  %v10688_v38 = vld [vmem:[%s12142_s6 + $0xba8] ss:$48 sps:$4 sm:$0xff]  }
 0x1f4   : > { %6243 = vmatpush1.bf16.msra.mxu0 %v10643_v40  ;;  %6535 = vmatpush1.bf16.msra.mxu1 %v10646_v46 }
 0x1f5   : > { %6244 = vmatprep.subr.bf16.mxu0 %v10651_v57  ;;  %6536 = vmatprep.subr.bf16.mxu1 %v10654_v61 }
 0x1f8   : > { %6245 = vmatpush1.bf16.msra.mxu0 %v10649_v27  ;;  %6537 = vmatpush1.bf16.msra.mxu1 %v10652_v31  ;;  %v10699_v27 = vld [vmem:[%s12142_s6 + $0xc64] ss:$48 sps:$4 sm:$0xff]   ;;  %v10702_v31 = vld [vmem:[%s12142_s6 + $0xc6c] ss:$48 sps:$4 sm:$0xff]  }
 0x1f9   : > { %6246 = vmatprep.subr.bf16.mxu0 %v10657_v62  ;;  %6538 = vmatprep.subr.bf16.mxu1 %v10660_v3  ;;  %v13606_v3 = vsub.s32 7, %v12262_v41 }
 0x1fc   : > { %6247 = vmatpush1.bf16.msra.mxu0 %v10655_v6  ;;  %6539 = vmatpush1.bf16.msra.mxu1 %v10658_v0 }
 0x1fd   : > { %6248 = vmatprep.subr.bf16.mxu0 %v10663_v49  ;;  %6540 = vmatprep.subr.bf16.mxu1 %v10666_v53  ;;  %v10697_v49 = vld [vmem:[%s12142_s6 + $0xc60] ss:$48 sps:$4 sm:$0xff]   ;;  %v10700_v53 = vld [vmem:[%s12142_s6 + $0xc68] ss:$48 sps:$4 sm:$0xff]  }
 0x200   : > { %6249 = vmatpush1.bf16.msra.mxu0 %v10661_v7  ;;  %6541 = vmatpush1.bf16.msra.mxu1 %v10664_v10  ;;  %v12471_v7 = vrot.slane %v12264_v42, %v13608_v24  ;;  %v10705_v10 = vld [vmem:[%s12142_s6 + $0xcc4] ss:$48 sps:$4 sm:$0xff]   ;;  %v11207_v24 = vld [vmem:[%s12142_s6 + $0x1450] ss:$48 sps:$4 sm:$0xff]  }
 0x201   : > { %6250 = vmatprep.subr.bf16.mxu0 %v10669_v11  ;;  %6542 = vmatprep.subr.bf16.mxu1 %v10672_v12  ;;  %v10708_v11 = vld [vmem:[%s12142_s6 + $0xccc] ss:$48 sps:$4 sm:$0xff]  }
 0x204   : > { %6251 = vmatpush1.bf16.msra.mxu0 %v10667_v13  ;;  %6543 = vmatpush1.bf16.msra.mxu1 %v10670_v14  ;;  %v12480_v13 = vrot.slane %v12264_v42, %v13606_v3 }
 0x205   : > { %6252 = vmatprep.subr.bf16.mxu0 %v10675_v9  ;;  %6544 = vmatprep.subr.bf16.mxu1 %v10678_v16 }
 0x208   : > { %6253 = vmatpush1.bf16.msra.mxu0 %v10673_v17  ;;  %6545 = vmatpush1.bf16.msra.mxu1 %v10676_v19 }
 0x209   : > { %6254 = vmatprep.subr.bf16.mxu0 %v10681_v22  ;;  %6546 = vmatprep.subr.bf16.mxu1 %v10684_v23  ;;  %v10703_v22 = vld [vmem:[%s12142_s6 + $0xcc0] ss:$48 sps:$4 sm:$0xff]   ;;  %v10706_v23 = vld [vmem:[%s12142_s6 + $0xcc8] ss:$48 sps:$4 sm:$0xff]  }
 0x20a   : > { %v1337_v39 = vpop.f32.mrb[16].mxu0 }
 0x20b   : > { %v1338_v40 = vadd.f32 %v1337_v39, %v12439_v29  ;;  %v1339_v46 = vpop.f32.mrb[17].mxu0 }
 0x20c   : > { %6255 = vmatpush1.bf16.msra.mxu0 %v10679_v28  ;;  %6547 = vmatpush1.bf16.msra.mxu1 %v10682_v47  ;;  %v1340_v51 = vadd.f32 %v1339_v46, %v12446_v34  ;;  %v1341_v52 = vpop.f32.mrb[18].mxu0  ;;  %v1410_v19 = vpop.f32.mrb[16].mxu1 }
 0x20d   : > { %6256 = vmatprep.subr.bf16.mxu0 %v10687_v32  ;;  %6548 = vmatprep.subr.bf16.mxu1 %v10690_v33  ;;  %v1342_v57 = vadd.f32 %v1341_v52, %v12439_v29  ;;  %v1343_v61 = vpop.f32.mrb[19].mxu0  ;;  %v1411_v47 = vadd.f32 %v1410_v19, %v12471_v7  ;;  %v1412_v32 = vpop.f32.mrb[17].mxu1  ;;  %v10711_v33 = vld [vmem:[%s12142_s6 + $0xd24] ss:$48 sps:$4 sm:$0xff]  }
 0x20e   : > { %v1344_v62 = vadd.f32 %v1343_v61, %v12446_v34  ;;  %v1413_v39 = vadd.f32 %v1412_v32, %v12480_v13 }
 0x20f   : > { %v12462_v6 = vpack.c.bf16 %v1342_v57, %v1338_v40  ;;  %v1414_v40 = vpop.f32.mrb[18].mxu1  ;;  %v10712_v57 = vld [vmem:[%s12142_s6 + $0xd28] ss:$48 sps:$4 sm:$0xff]  }
 0x210   : > { %6257 = vmatpush1.bf16.msra.mxu0 %v10685_v37  ;;  %6549 = vmatpush1.bf16.msra.mxu1 %v10688_v38  ;;  %v12464_v0 = vpack.c.bf16 %v1344_v62, %v1340_v51  ;;  %v10714_v37 = vld [vmem:[%s12142_s6 + $0xd2c] ss:$48 sps:$4 sm:$0xff]  }
 0x211   : > { %6299 = vmatprep.subr.bf16.mxu0 %v10693_v48  ;;  %6591 = vmatprep.subr.bf16.mxu1 %v10696_v50  ;;  %v1415_v48 = vadd.f32 %v1414_v40, %v12471_v7  ;;  %v1416_v50 = vpop.f32.mrb[19].mxu1  ;;  %v10720_v62 = vld [vmem:[%s12142_s6 + $0xd8c] ss:$48 sps:$4 sm:$0xff]  }
 0x212   : > { %v1347_v12 = vpop.f32.mrb[20].mxu0  ;;  %v1417_v52 = vadd.f32 %v1416_v50, %v12480_v13  ;;  %v10721_v50 = vld [vmem:[%s12142_s6 + $0xde0] ss:$48 sps:$4 sm:$0xff]  }
 0x213   : > { %6259 = vmatmul.mubr.bf16.vlgmr.msra.gmra.mrb[32].mxu0 %v12332_v26  ;;  %6551 = vmatmul.mubr.bf16.vlgmr.msra.gmra.mrb[32].mxu1 %v12332_v26  ;;  %v1348_v14 = vadd.f32 %v1347_v12, %v12439_v29  ;;  %v1349_v9 = vpop.f32.mrb[21].mxu0 }
 0x214   : > { %6300 = vmatpush1.bf16.msra.mxu0 %v10691_v55  ;;  %6592 = vmatpush1.bf16.msra.mxu1 %v10694_v56  ;;  %v1350_v16 = vadd.f32 %v1349_v9, %v12446_v34  ;;  %v1351_v17 = vpop.f32.mrb[22].mxu0  ;;  %v12500_v55 = vpack.c.bf16 %v1415_v48, %v1411_v47  ;;  %v10709_v56 = vld [vmem:[%s12142_s6 + $0xd20] ss:$48 sps:$4 sm:$0xff]   ;;  %v1420_v12 = vpop.f32.mrb[20].mxu1  ;;  %v10718_v9 = vld [vmem:[%s12142_s6 + $0xd88] ss:$48 sps:$4 sm:$0xff]  }
 0x215   : > { %6301 = vmatprep.subr.bf16.mxu0 %v10699_v27  ;;  %6593 = vmatprep.subr.bf16.mxu1 %v10702_v31  ;;  %v1352_v42 = vadd.f32 %v1351_v17, %v12439_v29  ;;  %v1353_v28 = vpop.f32.mrb[23].mxu0  ;;  %v12506_v27 = vpack.c.bf16 %v1417_v52, %v1413_v39  ;;  %v10717_v31 = vld [vmem:[%s12142_s6 + $0xd84] ss:$48 sps:$4 sm:$0xff]   ;;  %v1421_v19 = vadd.f32 %v1420_v12, %v12471_v7  ;;  %v10724_v52 = vld [vmem:[%s12142_s6 + $0xde8] ss:$48 sps:$4 sm:$0xff]  }
 0x216   : > { %6268 = vmatprep.mubr.bf16.mxu0 %v12365_v5  ;;  %6560 = vmatprep.mubr.bf16.mxu1 %v12365_v5  ;;  %v1354_v38 = vadd.f32 %v1353_v28, %v12446_v34  ;;  %v10727_v12 = vld [vmem:[%s12142_s6 + $0xe40] ss:$48 sps:$4 sm:$0xff]  }
 0x217   : > { %v12494_v46 = vpack.c.bf16 %v1352_v42, %v1348_v14  ;;  %v10715_v14 = vld [vmem:[%s12142_s6 + $0xd80] ss:$48 sps:$4 sm:$0xff]   ;;  %v10726_v42 = vld [vmem:[%s12142_s6 + $0xdec] ss:$48 sps:$4 sm:$0xff]  }
 0x218   : > { %6302 = vmatpush1.bf16.msra.mxu0 %v10697_v49  ;;  %6594 = vmatpush1.bf16.msra.mxu1 %v10700_v53  ;;  %v12497_v51 = vpack.c.bf16 %v1354_v38, %v1350_v16 }
 0x219   : > { %6303 = vmatprep.subr.bf16.mxu0 %v10705_v10  ;;  %6595 = vmatprep.subr.bf16.mxu1 %v10708_v11 }
 0x21a   : > { %v1357_v61 = vpop.f32.mrb[24].mxu0 }
 0x21b   : > { %6269 = vmatmul.mubr.bf16.gmra.mrb[36].mxu0 %v12360_v1  ;;  %6561 = vmatmul.mubr.bf16.gmra.mrb[36].mxu1 %v12360_v1  ;;  %v1358_v49 = vadd.f32 %v1357_v61, %v12439_v29  ;;  %v1359_v53 = vpop.f32.mrb[25].mxu0  ;;  %v10729_v61 = vld [vmem:[%s12142_s6 + $0xe44] ss:$48 sps:$4 sm:$0xff]  }
 0x21c   : > { %6304 = vmatpush1.bf16.msra.mxu0 %v10703_v22  ;;  %6596 = vmatpush1.bf16.msra.mxu1 %v10706_v23  ;;  %v1360_v10 = vadd.f32 %v1359_v53, %v12446_v34  ;;  %v1361_v11 = vpop.f32.mrb[26].mxu0  ;;  %v1422_v22 = vpop.f32.mrb[21].mxu1  ;;  %v10723_v23 = vld [vmem:[%s12142_s6 + $0xde4] ss:$48 sps:$4 sm:$0xff]  }
 0x21d   : > { %6305 = vmatprep.subr.bf16.mxu0 %v10711_v33  ;;  %6597 = vmatprep.subr.bf16.mxu1 %v10714_v37  ;;  %v1362_v16 = vadd.f32 %v1361_v11, %v12439_v29  ;;  %v1363_v17 = vpop.f32.mrb[27].mxu0  ;;  %v1423_v47 = vadd.f32 %v1422_v22, %v12480_v13  ;;  %v1424_v32 = vpop.f32.mrb[22].mxu1  ;;  %v10735_v22 = vld [vmem:[%s12142_s6 + $0xea4] ss:$48 sps:$4 sm:$0xff]  }
 0x21e   : > { %6278 = vmatprep.mubr.bf16.mxu0 %v12394_v36  ;;  %6570 = vmatprep.mubr.bf16.mxu1 %v12394_v36  ;;  %v1364_v28 = vadd.f32 %v1363_v17, %v12446_v34  ;;  %v1425_v37 = vadd.f32 %v1424_v32, %v12471_v7  ;;  %v1426_v38 = vpop.f32.mrb[23].mxu1 }
 0x21f   : > { %v12522_v33 = vpack.c.bf16 %v1362_v16, %v1358_v49  ;;  %v1427_v40 = vadd.f32 %v1426_v38, %v12480_v13  ;;  %v1430_v11 = vpop.f32.mrb[24].mxu1  ;;  %v10730_v16 = vld [vmem:[%s12142_s6 + $0xe48] ss:$48 sps:$4 sm:$0xff]  }
 0x220   : > { %6306 = vmatpush1.bf16.msra.mxu0 %v10709_v56  ;;  %6598 = vmatpush1.bf16.msra.mxu1 %v10712_v57  ;;  %v12525_v39 = vpack.c.bf16 %v1364_v28, %v1360_v10  ;;  %v12528_v48 = vpack.c.bf16 %v1425_v37, %v1421_v19  ;;  %v1431_v17 = vadd.f32 %v1430_v11, %v12471_v7  ;;  %v1432_v19 = vpop.f32.mrb[25].mxu1 }
 0x221   : > { %6307 = vmatprep.subr.bf16.mxu0 %v10717_v31  ;;  %6599 = vmatprep.subr.bf16.mxu1 %v10720_v62  ;;  %v12534_v57 = vpack.c.bf16 %v1427_v40, %v1423_v47  ;;  %v10732_v31 = vld [vmem:[%s12142_s6 + $0xe4c] ss:$48 sps:$4 sm:$0xff]   ;;  %v1433_v28 = vadd.f32 %v1432_v19, %v12480_v13  ;;  %v1434_v47 = vpop.f32.mrb[26].mxu1 }
 0x222   : > { %v1367_v56 = vpop.f32.mrb[28].mxu0  ;;  %v1436_v37 = vpop.f32.mrb[27].mxu1 }
 0x223   : > { %6279 = vmatmul.mubr.bf16.gmra.mrb[40].mxu0 %v12390_v35  ;;  %6571 = vmatmul.mubr.bf16.gmra.mrb[40].mxu1 %v12390_v35  ;;  %v1368_v62 = vadd.f32 %v1367_v56, %v12439_v29  ;;  %v1369_v49 = vpop.f32.mrb[29].mxu0  ;;  %v10733_v56 = vld [vmem:[%s12142_s6 + $0xea0] ss:$48 sps:$4 sm:$0xff]  }
 0x224   : > { %6308 = vmatpush1.bf16.msra.mxu0 %v10715_v14  ;;  %6600 = vmatpush1.bf16.msra.mxu1 %v10718_v9  ;;  %v1370_v53 = vadd.f32 %v1369_v49, %v12446_v34  ;;  %v1371_v10 = vpop.f32.mrb[30].mxu0  ;;  %v10739_v49 = vld [vmem:[%s12142_s6 + $0xf00] ss:$48 sps:$4 sm:$0xff]  }
 0x225   : > { %6309 = vmatprep.subr.bf16.mxu0 %v10723_v23  ;;  %6601 = vmatprep.subr.bf16.mxu1 %v10726_v42  ;;  %v1372_v14 = vadd.f32 %v1371_v10, %v12439_v29  ;;  %v1373_v9 = vpop.f32.mrb[31].mxu0  ;;  %v10738_v23 = vld [vmem:[%s12142_s6 + $0xeac] ss:$48 sps:$4 sm:$0xff]   ;;  %v1435_v29 = vadd.f32 %v1434_v47, %v12471_v7  ;;  %v10753_v47 = vld [vmem:[%s12142_s6 + $0xfc4] ss:$48 sps:$4 sm:$0xff]  }
 0x226   : > { %6288 = vmatprep.mubr.bf16.mxu0 %v12412_v2  ;;  %6580 = vmatprep.mubr.bf16.mxu1 %v12412_v2  ;;  %v1374_v42 = vadd.f32 %v1373_v9, %v12446_v34  ;;  %v1437_v34 = vadd.f32 %v1436_v37, %v12480_v13 }
 0x227   : > { %v12550_v32 = vpack.c.bf16 %v1372_v14, %v1368_v62  ;;  %v12556_v40 = vpack.c.bf16 %v1435_v29, %v1431_v17  ;;  %v1440_v62 = vpop.f32.mrb[28].mxu1  ;;  %v10756_v29 = vld [vmem:[%s12142_s6 + $0xfcc] ss:$48 sps:$4 sm:$0xff]  }
 0x228   : > { %6310 = vmatpush1.bf16.msra.mxu0 %v10721_v50  ;;  %6602 = vmatpush1.bf16.msra.mxu1 %v10724_v52  ;;  %v12553_v38 = vpack.c.bf16 %v1374_v42, %v1370_v53  ;;  %v10736_v50 = vld [vmem:[%s12142_s6 + $0xea8] ss:$48 sps:$4 sm:$0xff]   ;;  %v12562_v52 = vpack.c.bf16 %v1437_v34, %v1433_v28  ;;  %v1441_v10 = vadd.f32 %v1440_v62, %v12471_v7  ;;  %v1442_v11 = vpop.f32.mrb[29].mxu1  ;;  %v10768_v62 = vld [vmem:[%s12142_s6 + $0x108c] ss:$48 sps:$4 sm:$0xff]  }
 0x229   : > { %6311 = vmatprep.subr.bf16.mxu0 %v10729_v61  ;;  %6603 = vmatprep.subr.bf16.mxu1 %v10732_v31  ;;  %v10741_v61 = vld [vmem:[%s12142_s6 + $0xf04] ss:$48 sps:$4 sm:$0xff]   ;;  %v10744_v31 = vld [vmem:[%s12142_s6 + $0xf0c] ss:$48 sps:$4 sm:$0xff]   ;;  %v10742_v53 = vld [vmem:[%s12142_s6 + $0xf08] ss:$48 sps:$4 sm:$0xff]   ;;  %v1443_v14 = vadd.f32 %v1442_v11, %v12480_v13 }
 0x22a   : > { %v1444_v9 = vpop.f32.mrb[30].mxu1  ;;  %v10748_v42 = vld [vmem:[%s12142_s6 + $0xf68] ss:$48 sps:$4 sm:$0xff]   ;;  %v10774_v11 = vld [vmem:[%s12142_s6 + $0x10ec] ss:$48 sps:$4 sm:$0xff]  }
 0x22b   : > { %6289 = vmatmul.mubr.bf16.gmra.mrb[44].mxu0 %v12410_v63  ;;  %6581 = vmatmul.mubr.bf16.gmra.mrb[44].mxu1 %v12410_v63  ;;  %v1445_v17 = vadd.f32 %v1444_v9, %v12471_v7  ;;  %v1446_v19 = vpop.f32.mrb[31].mxu1  ;;  %v10751_v7 = vld [vmem:[%s12142_s6 + $0xfc0] ss:$48 sps:$4 sm:$0xff]   ;;  %v10754_v34 = vld [vmem:[%s12142_s6 + $0xfc8] ss:$48 sps:$4 sm:$0xff]  }
 0x22c   : > { %6312 = vmatpush1.bf16.msra.mxu0 %v10727_v12  ;;  %6604 = vmatpush1.bf16.msra.mxu1 %v10730_v16  ;;  %v10747_v12 = vld [vmem:[%s12142_s6 + $0xf64] ss:$48 sps:$4 sm:$0xff]   ;;  %v10750_v16 = vld [vmem:[%s12142_s6 + $0xf6c] ss:$48 sps:$4 sm:$0xff]  }
 0x22d   : > { %6313 = vmatprep.subr.bf16.mxu0 %v10735_v22  ;;  %6605 = vmatprep.subr.bf16.mxu1 %v10738_v23  ;;  %v1447_v22 = vadd.f32 %v1446_v19, %v12480_v13  ;;  %v10745_v23 = vld [vmem:[%s12142_s6 + $0xf60] ss:$48 sps:$4 sm:$0xff]   ;;  %v12578_v28 = vpack.c.bf16 %v1445_v17, %v1441_v10  ;;  %v10759_v13 = vld [vmem:[%s12142_s6 + $0x1024] ss:$48 sps:$4 sm:$0xff]   ;;  %v10780_v9 = vld [vmem:[%s12142_s6 + $0x114c] ss:$48 sps:$4 sm:$0xff]  }
 0x22e   : > { %6331 = vmatprep.mubr.bf16.mxu0 %v12464_v0  ;;  %6623 = vmatprep.mubr.bf16.mxu1 %v12464_v0  ;;  %v10771_v10 = vld [vmem:[%s12142_s6 + $0x10e4] ss:$48 sps:$4 sm:$0xff]   ;;  %v10775_v17 = vld [vmem:[%s12142_s6 + $0x1140] ss:$48 sps:$4 sm:$0xff]   ;;  %v10778_v19 = vld [vmem:[%s12142_s6 + $0x1148] ss:$48 sps:$4 sm:$0xff]  }
 0x22f   : > { %v12582_v37 = vpack.c.bf16 %v1447_v22, %v1443_v14  ;;  %v10777_v14 = vld [vmem:[%s12142_s6 + $0x1144] ss:$48 sps:$4 sm:$0xff]  }
 0x230   : > { %6314 = vmatpush1.bf16.msra.mxu0 %v10733_v56  ;;  %6606 = vmatpush1.bf16.msra.mxu1 %v10736_v50  ;;  %v10762_v56 = vld [vmem:[%s12142_s6 + $0x102c] ss:$48 sps:$4 sm:$0xff]   ;;  %v10757_v50 = vld [vmem:[%s12142_s6 + $0x1020] ss:$48 sps:$4 sm:$0xff]   ;;  %v10783_v22 = vld [vmem:[%s12142_s6 + $0x11a4] ss:$48 sps:$4 sm:$0xff]  }
 0x231   : > { %6315 = vmatprep.subr.bf16.mxu0 %v10741_v61  ;;  %6607 = vmatprep.subr.bf16.mxu1 %v10744_v31  ;;  %v10760_v61 = vld [vmem:[%s12142_s6 + $0x1028] ss:$48 sps:$4 sm:$0xff]   ;;  %v10765_v31 = vld [vmem:[%s12142_s6 + $0x1084] ss:$48 sps:$4 sm:$0xff]  }
 0x234   : > { %6316 = vmatpush1.bf16.msra.mxu0 %v10739_v49  ;;  %6608 = vmatpush1.bf16.msra.mxu1 %v10742_v53  ;;  %v10763_v49 = vld [vmem:[%s12142_s6 + $0x1080] ss:$48 sps:$4 sm:$0xff]   ;;  %v10766_v53 = vld [vmem:[%s12142_s6 + $0x1088] ss:$48 sps:$4 sm:$0xff]  }
 0x235   : > { %6317 = vmatprep.subr.bf16.mxu0 %v10747_v12  ;;  %6609 = vmatprep.subr.bf16.mxu1 %v10750_v16  ;;  %v10769_v12 = vld [vmem:[%s12142_s6 + $0x10e0] ss:$48 sps:$4 sm:$0xff]   ;;  %v10772_v16 = vld [vmem:[%s12142_s6 + $0x10e8] ss:$48 sps:$4 sm:$0xff]  }
 0x238   : > { %6318 = vmatpush1.bf16.msra.mxu0 %v10745_v23  ;;  %6610 = vmatpush1.bf16.msra.mxu1 %v10748_v42  ;;  %v10786_v23 = vld [vmem:[%s12142_s6 + $0x11ac] ss:$48 sps:$4 sm:$0xff]   ;;  %v10781_v42 = vld [vmem:[%s12142_s6 + $0x11a0] ss:$48 sps:$4 sm:$0xff]  }
 0x239   : > { %6319 = vmatprep.subr.bf16.mxu0 %v10753_v47  ;;  %6611 = vmatprep.subr.bf16.mxu1 %v10756_v29  ;;  %v10784_v47 = vld [vmem:[%s12142_s6 + $0x11a8] ss:$48 sps:$4 sm:$0xff]   ;;  %v10789_v29 = vld [vmem:[%s12142_s6 + $0x1204] ss:$48 sps:$4 sm:$0xff]  }
 0x23c   : > { %6320 = vmatpush1.bf16.msra.mxu0 %v10751_v7  ;;  %6612 = vmatpush1.bf16.msra.mxu1 %v10754_v34  ;;  %v10792_v7 = vld [vmem:[%s12142_s6 + $0x120c] ss:$48 sps:$4 sm:$0xff]   ;;  %v10787_v34 = vld [vmem:[%s12142_s6 + $0x1200] ss:$48 sps:$4 sm:$0xff]  }
 0x23d   : > { %6321 = vmatprep.subr.bf16.mxu0 %v10759_v13  ;;  %6613 = vmatprep.subr.bf16.mxu1 %v10762_v56  ;;  %v10790_v13 = vld [vmem:[%s12142_s6 + $0x1208] ss:$48 sps:$4 sm:$0xff]   ;;  %v10795_v56 = vld [vmem:[%s12142_s6 + $0x1264] ss:$48 sps:$4 sm:$0xff]  }
 0x240   : > { %6322 = vmatpush1.bf16.msra.mxu0 %v10757_v50  ;;  %6614 = vmatpush1.bf16.msra.mxu1 %v10760_v61  ;;  %v10798_v50 = vld [vmem:[%s12142_s6 + $0x126c] ss:$48 sps:$4 sm:$0xff]   ;;  %v10793_v61 = vld [vmem:[%s12142_s6 + $0x1260] ss:$48 sps:$4 sm:$0xff]  }
 0x241   : > { %6323 = vmatprep.subr.bf16.mxu0 %v10765_v31  ;;  %6615 = vmatprep.subr.bf16.mxu1 %v10768_v62  ;;  %v10796_v31 = vld [vmem:[%s12142_s6 + $0x1268] ss:$48 sps:$4 sm:$0xff]   ;;  %v10801_v62 = vld [vmem:[%s12142_s6 + $0x12c4] ss:$48 sps:$4 sm:$0xff]  }
 0x244   : > { %6324 = vmatpush1.bf16.msra.mxu0 %v10763_v49  ;;  %6616 = vmatpush1.bf16.msra.mxu1 %v10766_v53  ;;  %v10804_v49 = vld [vmem:[%s12142_s6 + $0x12cc] ss:$48 sps:$4 sm:$0xff]   ;;  %v10799_v53 = vld [vmem:[%s12142_s6 + $0x12c0] ss:$48 sps:$4 sm:$0xff]  }
 0x245   : > { %6325 = vmatprep.subr.bf16.mxu0 %v10771_v10  ;;  %6617 = vmatprep.subr.bf16.mxu1 %v10774_v11  ;;  %v10802_v10 = vld [vmem:[%s12142_s6 + $0x12c8] ss:$48 sps:$4 sm:$0xff]   ;;  %v10807_v11 = vld [vmem:[%s12142_s6 + $0x1324] ss:$48 sps:$4 sm:$0xff]  }
 0x248   : > { %6326 = vmatpush1.bf16.msra.mxu0 %v10769_v12  ;;  %6618 = vmatpush1.bf16.msra.mxu1 %v10772_v16  ;;  %v10810_v12 = vld [vmem:[%s12142_s6 + $0x132c] ss:$48 sps:$4 sm:$0xff]   ;;  %v10805_v16 = vld [vmem:[%s12142_s6 + $0x1320] ss:$48 sps:$4 sm:$0xff]  }
 0x249   : > { %6327 = vmatprep.subr.bf16.mxu0 %v10777_v14  ;;  %6619 = vmatprep.subr.bf16.mxu1 %v10780_v9  ;;  %v10808_v14 = vld [vmem:[%s12142_s6 + $0x1328] ss:$48 sps:$4 sm:$0xff]   ;;  %v10813_v9 = vld [vmem:[%s12142_s6 + $0x1384] ss:$48 sps:$4 sm:$0xff]  }
 0x24c   : > { %6328 = vmatpush1.bf16.msra.mxu0 %v10775_v17  ;;  %6620 = vmatpush1.bf16.msra.mxu1 %v10778_v19  ;;  %v10816_v17 = vld [vmem:[%s12142_s6 + $0x138c] ss:$48 sps:$4 sm:$0xff]   ;;  %v10811_v19 = vld [vmem:[%s12142_s6 + $0x1380] ss:$48 sps:$4 sm:$0xff]  }
 0x24d   : > { %6329 = vmatprep.subr.bf16.mxu0 %v10783_v22  ;;  %6621 = vmatprep.subr.bf16.mxu1 %v10786_v23  ;;  %v10814_v22 = vld [vmem:[%s12142_s6 + $0x1388] ss:$48 sps:$4 sm:$0xff]   ;;  %v10819_v23 = vld [vmem:[%s12142_s6 + $0x13e4] ss:$48 sps:$4 sm:$0xff]  }
 0x250   : > { %6330 = vmatpush1.bf16.msra.mxu0 %v10781_v42  ;;  %6622 = vmatpush1.bf16.msra.mxu1 %v10784_v47  ;;  %v10822_v42 = vld [vmem:[%s12142_s6 + $0x13ec] ss:$48 sps:$4 sm:$0xff]   ;;  %v10817_v47 = vld [vmem:[%s12142_s6 + $0x13e0] ss:$48 sps:$4 sm:$0xff]  }
 0x251   : > { %6372 = vmatprep.subr.bf16.mxu0 %v10789_v29  ;;  %6664 = vmatprep.subr.bf16.mxu1 %v10792_v7  ;;  %v10820_v29 = vld [vmem:[%s12142_s6 + $0x13e8] ss:$48 sps:$4 sm:$0xff]   ;;  %v10825_v7 = vld [vmem:[%s12142_s6 + $0x1444] ss:$48 sps:$4 sm:$0xff]  }
 0x253   : > { %6332 = vmatmul.mubr.bf16.vlgmr.msra.gmra.mrb[32].mxu0 %v12462_v6  ;;  %6624 = vmatmul.mubr.bf16.vlgmr.msra.gmra.mrb[32].mxu1 %v12462_v6 }
 0x254   : > { %6373 = vmatpush1.bf16.msra.mxu0 %v10787_v34  ;;  %6665 = vmatpush1.bf16.msra.mxu1 %v10790_v13  ;;  %v10828_v34 = vld [vmem:[%s12142_s6 + $0x144c] ss:$48 sps:$4 sm:$0xff]   ;;  %v10823_v13 = vld [vmem:[%s12142_s6 + $0x1440] ss:$48 sps:$4 sm:$0xff]  }
 0x255   : > { %6374 = vmatprep.subr.bf16.mxu0 %v10795_v56  ;;  %6666 = vmatprep.subr.bf16.mxu1 %v10798_v50  ;;  %v10826_v56 = vld [vmem:[%s12142_s6 + $0x1448] ss:$48 sps:$4 sm:$0xff]   ;;  %v10831_v50 = vld [vmem:[%s12142_s6 + $0x14a4] ss:$48 sps:$4 sm:$0xff]  }
 0x256   : > { %6341 = vmatprep.mubr.bf16.mxu0 %v12497_v51  ;;  %6633 = vmatprep.mubr.bf16.mxu1 %v12497_v51 }
 0x258   : > { %6375 = vmatpush1.bf16.msra.mxu0 %v10793_v61  ;;  %6667 = vmatpush1.bf16.msra.mxu1 %v10796_v31  ;;  %v10834_v61 = vld [vmem:[%s12142_s6 + $0x14ac] ss:$48 sps:$4 sm:$0xff]   ;;  %v10829_v31 = vld [vmem:[%s12142_s6 + $0x14a0] ss:$48 sps:$4 sm:$0xff]  }
 0x259   : > { %6376 = vmatprep.subr.bf16.mxu0 %v10801_v62  ;;  %6668 = vmatprep.subr.bf16.mxu1 %v10804_v49  ;;  %v10832_v62 = vld [vmem:[%s12142_s6 + $0x14a8] ss:$48 sps:$4 sm:$0xff]   ;;  %v10837_v49 = vld [vmem:[%s12142_s6 + $0x1504] ss:$48 sps:$4 sm:$0xff]  }
 0x25b   : > { %6342 = vmatmul.mubr.bf16.gmra.mrb[36].mxu0 %v12494_v46  ;;  %6634 = vmatmul.mubr.bf16.gmra.mrb[36].mxu1 %v12494_v46 }
 0x25c   : > { %6377 = vmatpush1.bf16.msra.mxu0 %v10799_v53  ;;  %6669 = vmatpush1.bf16.msra.mxu1 %v10802_v10  ;;  %v10840_v53 = vld [vmem:[%s12142_s6 + $0x150c] ss:$48 sps:$4 sm:$0xff]   ;;  %v10835_v10 = vld [vmem:[%s12142_s6 + $0x1500] ss:$48 sps:$4 sm:$0xff]  }
 0x25d   : > { %6378 = vmatprep.subr.bf16.mxu0 %v10807_v11  ;;  %6670 = vmatprep.subr.bf16.mxu1 %v10810_v12  ;;  %v10838_v11 = vld [vmem:[%s12142_s6 + $0x1508] ss:$48 sps:$4 sm:$0xff]   ;;  %v10843_v12 = vld [vmem:[%s12142_s6 + $0x1564] ss:$48 sps:$4 sm:$0xff]  }
 0x25e   : > { %6351 = vmatprep.mubr.bf16.mxu0 %v12525_v39  ;;  %6643 = vmatprep.mubr.bf16.mxu1 %v12525_v39 }
 0x260   : > { %6379 = vmatpush1.bf16.msra.mxu0 %v10805_v16  ;;  %6671 = vmatpush1.bf16.msra.mxu1 %v10808_v14  ;;  %v10846_v16 = vld [vmem:[%s12142_s6 + $0x156c] ss:$48 sps:$4 sm:$0xff]   ;;  %v10841_v14 = vld [vmem:[%s12142_s6 + $0x1560] ss:$48 sps:$4 sm:$0xff]  }
 0x261   : > { %6380 = vmatprep.subr.bf16.mxu0 %v10813_v9  ;;  %6672 = vmatprep.subr.bf16.mxu1 %v10816_v17  ;;  %v10844_v9 = vld [vmem:[%s12142_s6 + $0x1568] ss:$48 sps:$4 sm:$0xff]   ;;  %v10849_v17 = vld [vmem:[%s12142_s6 + $0x15c4] ss:$48 sps:$4 sm:$0xff]  }
 0x263   : > { %6352 = vmatmul.mubr.bf16.gmra.mrb[40].mxu0 %v12522_v33  ;;  %6644 = vmatmul.mubr.bf16.gmra.mrb[40].mxu1 %v12522_v33 }
 0x264   : > { %6381 = vmatpush1.bf16.msra.mxu0 %v10811_v19  ;;  %6673 = vmatpush1.bf16.msra.mxu1 %v10814_v22  ;;  %v10852_v19 = vld [vmem:[%s12142_s6 + $0x15cc] ss:$48 sps:$4 sm:$0xff]   ;;  %v10847_v22 = vld [vmem:[%s12142_s6 + $0x15c0] ss:$48 sps:$4 sm:$0xff]  }
 0x265   : > { %6382 = vmatprep.subr.bf16.mxu0 %v10819_v23  ;;  %6674 = vmatprep.subr.bf16.mxu1 %v10822_v42  ;;  %v10850_v23 = vld [vmem:[%s12142_s6 + $0x15c8] ss:$48 sps:$4 sm:$0xff]   ;;  %v10855_v42 = vld [vmem:[%s12142_s6 + $0x1624] ss:$48 sps:$4 sm:$0xff]  }
 0x266   : > { %6361 = vmatprep.mubr.bf16.mxu0 %v12553_v38  ;;  %6653 = vmatprep.mubr.bf16.mxu1 %v12553_v38 }
 0x268   : > { %6383 = vmatpush1.bf16.msra.mxu0 %v10817_v47  ;;  %6675 = vmatpush1.bf16.msra.mxu1 %v10820_v29  ;;  %v10858_v47 = vld [vmem:[%s12142_s6 + $0x162c] ss:$48 sps:$4 sm:$0xff]   ;;  %v10853_v29 = vld [vmem:[%s12142_s6 + $0x1620] ss:$48 sps:$4 sm:$0xff]  }
 0x269   : > { %6384 = vmatprep.subr.bf16.mxu0 %v10825_v7  ;;  %6676 = vmatprep.subr.bf16.mxu1 %v10828_v34  ;;  %v10856_v7 = vld [vmem:[%s12142_s6 + $0x1628] ss:$48 sps:$4 sm:$0xff]   ;;  %v10861_v34 = vld [vmem:[%s12142_s6 + $0x1684] ss:$48 sps:$4 sm:$0xff]  }
 0x26b   : > { %6362 = vmatmul.mubr.bf16.gmra.mrb[44].mxu0 %v12550_v32  ;;  %6654 = vmatmul.mubr.bf16.gmra.mrb[44].mxu1 %v12550_v32 }
 0x26c   : > { %6385 = vmatpush1.bf16.msra.mxu0 %v10823_v13  ;;  %6404 = vmatprep.mubr.bf16.mxu0 %v12506_v27  ;;  %v10864_v13 = vld [vmem:[%s12142_s6 + $0x168c] ss:$48 sps:$4 sm:$0xff]  }
 0x26d   : > { %6677 = vmatpush1.bf16.msra.mxu1 %v10826_v56  ;;  %6696 = vmatprep.mubr.bf16.mxu1 %v12506_v27  ;;  %v10859_v56 = vld [vmem:[%s12142_s6 + $0x1680] ss:$48 sps:$4 sm:$0xff]  }
 0x26e   : > { %6386 = vmatprep.subr.bf16.mxu0 %v10831_v50  ;;  %6678 = vmatprep.subr.bf16.mxu1 %v10834_v61  ;;  %v10862_v50 = vld [vmem:[%s12142_s6 + $0x1688] ss:$48 sps:$4 sm:$0xff]   ;;  %v10867_v61 = vld [vmem:[%s12142_s6 + $0x16e4] ss:$48 sps:$4 sm:$0xff]  }
 0x270   : > { %6387 = vmatpush1.bf16.msra.mxu0 %v10829_v31  ;;  %v10870_v31 = vld [vmem:[%s12142_s6 + $0x16ec] ss:$48 sps:$4 sm:$0xff]  }
 0x271   : > { %6679 = vmatpush1.bf16.msra.mxu1 %v10832_v62  ;;  %6388 = vmatprep.subr.bf16.mxu0 %v10837_v49  ;;  %v10865_v62 = vld [vmem:[%s12142_s6 + $0x16e0] ss:$48 sps:$4 sm:$0xff]   ;;  %v10868_v49 = vld [vmem:[%s12142_s6 + $0x16e8] ss:$48 sps:$4 sm:$0xff]  }
 0x272   : > { %6680 = vmatprep.subr.bf16.mxu1 %v10840_v53  ;;  %v10873_v53 = vld [vmem:[%s12142_s6 + $0x1744] ss:$48 sps:$4 sm:$0xff]  }
 0x274   : > { %6389 = vmatpush1.bf16.msra.mxu0 %v10835_v10  ;;  %v10876_v10 = vld [vmem:[%s12142_s6 + $0x174c] ss:$48 sps:$4 sm:$0xff]  }
 0x275   : > { %6681 = vmatpush1.bf16.msra.mxu1 %v10838_v11  ;;  %6390 = vmatprep.subr.bf16.mxu0 %v10843_v12  ;;  %v10871_v11 = vld [vmem:[%s12142_s6 + $0x1740] ss:$48 sps:$4 sm:$0xff]   ;;  %v10874_v12 = vld [vmem:[%s12142_s6 + $0x1748] ss:$48 sps:$4 sm:$0xff]  }
 0x276   : > { %6682 = vmatprep.subr.bf16.mxu1 %v10846_v16  ;;  %v10879_v16 = vld [vmem:[%s12142_s6 + $0x17a4] ss:$48 sps:$4 sm:$0xff]  }
 0x278   : > { %6391 = vmatpush1.bf16.msra.mxu0 %v10841_v14  ;;  %v10882_v14 = vld [vmem:[%s12142_s6 + $0x17ac] ss:$48 sps:$4 sm:$0xff]  }
 0x279   : > { %6683 = vmatpush1.bf16.msra.mxu1 %v10844_v9  ;;  %6392 = vmatprep.subr.bf16.mxu0 %v10849_v17  ;;  %v10877_v9 = vld [vmem:[%s12142_s6 + $0x17a0] ss:$48 sps:$4 sm:$0xff]   ;;  %v10880_v17 = vld [vmem:[%s12142_s6 + $0x17a8] ss:$48 sps:$4 sm:$0xff]  }
 0x27a   : > { %6684 = vmatprep.subr.bf16.mxu1 %v10852_v19  ;;  %v10885_v19 = vld [vmem:[%s12142_s6 + $0x14] ss:$48 sps:$4 sm:$0xff]  }
 0x27c   : > { %6393 = vmatpush1.bf16.msra.mxu0 %v10847_v22  ;;  %v10888_v22 = vld [vmem:[%s12142_s6 + $0x1c] ss:$48 sps:$4 sm:$0xff]  }
 0x27d   : > { %6685 = vmatpush1.bf16.msra.mxu1 %v10850_v23  ;;  %6394 = vmatprep.subr.bf16.mxu0 %v10855_v42  ;;  %v10883_v23 = vld [vmem:[%s12142_s6 + $0x10] ss:$48 sps:$4 sm:$0xff]   ;;  %v10886_v42 = vld [vmem:[%s12142_s6 + $0x18] ss:$48 sps:$4 sm:$0xff]  }
 0x27e   : > { %6686 = vmatprep.subr.bf16.mxu1 %v10858_v47  ;;  %v10891_v47 = vld [vmem:[%s12142_s6 + $0x74] ss:$48 sps:$4 sm:$0xff]  }
 0x280   : > { %6395 = vmatpush1.bf16.msra.mxu0 %v10853_v29  ;;  %v10894_v29 = vld [vmem:[%s12142_s6 + $0x7c] ss:$48 sps:$4 sm:$0xff]  }
 0x281   : > { %6687 = vmatpush1.bf16.msra.mxu1 %v10856_v7  ;;  %6396 = vmatprep.subr.bf16.mxu0 %v10861_v34  ;;  %v10889_v7 = vld [vmem:[%s12142_s6 + $0x70] ss:$48 sps:$4 sm:$0xff]   ;;  %v10892_v34 = vld [vmem:[%s12142_s6 + $0x78] ss:$48 sps:$4 sm:$0xff]  }
 0x282   : > { %6688 = vmatprep.subr.bf16.mxu1 %v10864_v13  ;;  %v10897_v13 = vld [vmem:[%s12142_s6 + $0xd4] ss:$48 sps:$4 sm:$0xff]  }
 0x284   : > { %6397 = vmatpush1.bf16.msra.mxu0 %v10859_v56  ;;  %v10900_v56 = vld [vmem:[%s12142_s6 + $0xdc] ss:$48 sps:$4 sm:$0xff]  }
 0x285   : > { %6689 = vmatpush1.bf16.msra.mxu1 %v10862_v50  ;;  %6398 = vmatprep.subr.bf16.mxu0 %v10867_v61  ;;  %v10895_v50 = vld [vmem:[%s12142_s6 + $0xd0] ss:$48 sps:$4 sm:$0xff]   ;;  %v10898_v61 = vld [vmem:[%s12142_s6 + $0xd8] ss:$48 sps:$4 sm:$0xff]  }
 0x286   : > { %6690 = vmatprep.subr.bf16.mxu1 %v10870_v31  ;;  %v10903_v31 = vld [vmem:[%s12142_s6 + $0x134] ss:$48 sps:$4 sm:$0xff]  }
 0x288   : > { %6399 = vmatpush1.bf16.msra.mxu0 %v10865_v62  ;;  %v10906_v62 = vld [vmem:[%s12142_s6 + $0x13c] ss:$48 sps:$4 sm:$0xff]  }
 0x289   : > { %6691 = vmatpush1.bf16.msra.mxu1 %v10868_v49  ;;  %6400 = vmatprep.subr.bf16.mxu0 %v10873_v53  ;;  %v10901_v49 = vld [vmem:[%s12142_s6 + $0x130] ss:$48 sps:$4 sm:$0xff]   ;;  %v10904_v53 = vld [vmem:[%s12142_s6 + $0x138] ss:$48 sps:$4 sm:$0xff]  }
 0x28a   : > { %6692 = vmatprep.subr.bf16.mxu1 %v10876_v10  ;;  %v10909_v10 = vld [vmem:[%s12142_s6 + $0x194] ss:$48 sps:$4 sm:$0xff]  }
 0x28c   : > { %6401 = vmatpush1.bf16.msra.mxu0 %v10871_v11  ;;  %v10912_v11 = vld [vmem:[%s12142_s6 + $0x19c] ss:$48 sps:$4 sm:$0xff]  }
 0x28d   : > { %6693 = vmatpush1.bf16.msra.mxu1 %v10874_v12  ;;  %6402 = vmatprep.subr.bf16.mxu0 %v10879_v16  ;;  %v10907_v12 = vld [vmem:[%s12142_s6 + $0x190] ss:$48 sps:$4 sm:$0xff]   ;;  %v10910_v16 = vld [vmem:[%s12142_s6 + $0x198] ss:$48 sps:$4 sm:$0xff]  }
 0x28e   : > { %6694 = vmatprep.subr.bf16.mxu1 %v10882_v14  ;;  %v10915_v14 = vld [vmem:[%s12142_s6 + $0x1f4] ss:$48 sps:$4 sm:$0xff]  }
 0x290   : > { %6403 = vmatpush1.bf16.msra.mxu0 %v10877_v9  ;;  %v10918_v9 = vld [vmem:[%s12142_s6 + $0x1fc] ss:$48 sps:$4 sm:$0xff]  }
 0x291   : > { %6695 = vmatpush1.bf16.msra.mxu1 %v10880_v17  ;;  %6737 = vmatprep.subr.bf16.mxu0 %v10885_v19  ;;  %v10913_v17 = vld [vmem:[%s12142_s6 + $0x1f0] ss:$48 sps:$4 sm:$0xff]   ;;  %v10916_v19 = vld [vmem:[%s12142_s6 + $0x1f8] ss:$48 sps:$4 sm:$0xff]  }
 0x292   : > { %7029 = vmatprep.subr.bf16.mxu1 %v10888_v22  ;;  %v10921_v22 = vld [vmem:[%s12142_s6 + $0x254] ss:$48 sps:$4 sm:$0xff]  }
 0x293   : > { %6405 = vmatmul.mubr.bf16.vlgmr.msra.gmra.mrb[32].mxu0 %v12500_v55 }
 0x294   : > { %6697 = vmatmul.mubr.bf16.vlgmr.msra.gmra.mrb[32].mxu1 %v12500_v55  ;;  %6414 = vmatprep.mubr.bf16.mxu0 %v12534_v57 }
 0x295   : > { %6706 = vmatprep.mubr.bf16.mxu1 %v12534_v57  ;;  %6738 = vmatpush1.bf16.msra.mxu0 %v10883_v23  ;;  %v10924_v23 = vld [vmem:[%s12142_s6 + $0x25c] ss:$48 sps:$4 sm:$0xff]  }
 0x296   : > { %7030 = vmatpush1.bf16.msra.mxu1 %v10886_v42  ;;  %6739 = vmatprep.subr.bf16.mxu0 %v10891_v47  ;;  %v10919_v42 = vld [vmem:[%s12142_s6 + $0x250] ss:$48 sps:$4 sm:$0xff]   ;;  %v10922_v47 = vld [vmem:[%s12142_s6 + $0x258] ss:$48 sps:$4 sm:$0xff]  }
 0x297   : > { %7031 = vmatprep.subr.bf16.mxu1 %v10894_v29  ;;  %v10927_v29 = vld [vmem:[%s12142_s6 + $0x2b4] ss:$48 sps:$4 sm:$0xff]  }
 0x299   : > { %6740 = vmatpush1.bf16.msra.mxu0 %v10889_v7  ;;  %v10930_v7 = vld [vmem:[%s12142_s6 + $0x2bc] ss:$48 sps:$4 sm:$0xff]  }
 0x29a   : > { %7032 = vmatpush1.bf16.msra.mxu1 %v10892_v34  ;;  %6741 = vmatprep.subr.bf16.mxu0 %v10897_v13  ;;  %v10925_v34 = vld [vmem:[%s12142_s6 + $0x2b0] ss:$48 sps:$4 sm:$0xff]   ;;  %v10928_v13 = vld [vmem:[%s12142_s6 + $0x2b8] ss:$48 sps:$4 sm:$0xff]  }
 0x29b   : > { %6415 = vmatmul.mubr.bf16.gmra.mrb[36].mxu0 %v12528_v48  ;;  %7033 = vmatprep.subr.bf16.mxu1 %v10900_v56  ;;  %v10933_v56 = vld [vmem:[%s12142_s6 + $0x314] ss:$48 sps:$4 sm:$0xff]  }
 0x29c   : > { %6707 = vmatmul.mubr.bf16.gmra.mrb[36].mxu1 %v12528_v48  ;;  %6424 = vmatprep.mubr.bf16.mxu0 %v12562_v52 }
 0x29d   : > { %6716 = vmatprep.mubr.bf16.mxu1 %v12562_v52  ;;  %6742 = vmatpush1.bf16.msra.mxu0 %v10895_v50  ;;  %v10936_v50 = vld [vmem:[%s12142_s6 + $0x31c] ss:$48 sps:$4 sm:$0xff]  }
 0x29e   : > { %7034 = vmatpush1.bf16.msra.mxu1 %v10898_v61  ;;  %6743 = vmatprep.subr.bf16.mxu0 %v10903_v31  ;;  %v10931_v61 = vld [vmem:[%s12142_s6 + $0x310] ss:$48 sps:$4 sm:$0xff]   ;;  %v10934_v31 = vld [vmem:[%s12142_s6 + $0x318] ss:$48 sps:$4 sm:$0xff]  }
 0x29f   : > { %7035 = vmatprep.subr.bf16.mxu1 %v10906_v62  ;;  %v10939_v62 = vld [vmem:[%s12142_s6 + $0x374] ss:$48 sps:$4 sm:$0xff]  }
 0x2a1   : > { %6744 = vmatpush1.bf16.msra.mxu0 %v10901_v49  ;;  %v10942_v49 = vld [vmem:[%s12142_s6 + $0x37c] ss:$48 sps:$4 sm:$0xff]  }
 0x2a2   : > { %7036 = vmatpush1.bf16.msra.mxu1 %v10904_v53  ;;  %6745 = vmatprep.subr.bf16.mxu0 %v10909_v10  ;;  %v10937_v53 = vld [vmem:[%s12142_s6 + $0x370] ss:$48 sps:$4 sm:$0xff]   ;;  %v10940_v10 = vld [vmem:[%s12142_s6 + $0x378] ss:$48 sps:$4 sm:$0xff]  }
 0x2a3   : > { %6425 = vmatmul.mubr.bf16.gmra.mrb[40].mxu0 %v12556_v40  ;;  %7037 = vmatprep.subr.bf16.mxu1 %v10912_v11  ;;  %v10945_v11 = vld [vmem:[%s12142_s6 + $0x3d4] ss:$48 sps:$4 sm:$0xff]  }
 0x2a4   : > { %6717 = vmatmul.mubr.bf16.gmra.mrb[40].mxu1 %v12556_v40  ;;  %6434 = vmatprep.mubr.bf16.mxu0 %v12582_v37 }
 0x2a5   : > { %6726 = vmatprep.mubr.bf16.mxu1 %v12582_v37  ;;  %6746 = vmatpush1.bf16.msra.mxu0 %v10907_v12  ;;  %v10948_v12 = vld [vmem:[%s12142_s6 + $0x3dc] ss:$48 sps:$4 sm:$0xff]  }
 0x2a6   : > { %7038 = vmatpush1.bf16.msra.mxu1 %v10910_v16  ;;  %6747 = vmatprep.subr.bf16.mxu0 %v10915_v14  ;;  %v10943_v16 = vld [vmem:[%s12142_s6 + $0x3d0] ss:$48 sps:$4 sm:$0xff]   ;;  %v10946_v14 = vld [vmem:[%s12142_s6 + $0x3d8] ss:$48 sps:$4 sm:$0xff]  }
 0x2a7   : > { %7039 = vmatprep.subr.bf16.mxu1 %v10918_v9  ;;  %v10951_v9 = vld [vmem:[%s12142_s6 + $0x434] ss:$48 sps:$4 sm:$0xff]  }
 0x2a9   : > { %6748 = vmatpush1.bf16.msra.mxu0 %v10913_v17  ;;  %v10954_v17 = vld [vmem:[%s12142_s6 + $0x43c] ss:$48 sps:$4 sm:$0xff]  }
 0x2aa   : > { %7040 = vmatpush1.bf16.msra.mxu1 %v10916_v19  ;;  %6749 = vmatprep.subr.bf16.mxu0 %v10921_v22  ;;  %v10949_v19 = vld [vmem:[%s12142_s6 + $0x430] ss:$48 sps:$4 sm:$0xff]   ;;  %v10952_v22 = vld [vmem:[%s12142_s6 + $0x438] ss:$48 sps:$4 sm:$0xff]  }
 0x2ab   : > { %6435 = vmatmul.mubr.bf16.gmra.mrb[44].mxu0 %v12578_v28  ;;  %7041 = vmatprep.subr.bf16.mxu1 %v10924_v23  ;;  %v10957_v23 = vld [vmem:[%s12142_s6 + $0x494] ss:$48 sps:$4 sm:$0xff]  }
 0x2ac   : > { %6727 = vmatmul.mubr.bf16.gmra.mrb[44].mxu1 %v12578_v28  ;;  %6769 = vmatprep.mubr.bf16.mxu0 %v12294_v60 }
 0x2ad   : > { %6750 = vmatpush1.bf16.msra.mxu0 %v10919_v42  ;;  %7061 = vmatprep.mubr.bf16.mxu1 %v12294_v60  ;;  %v10960_v42 = vld [vmem:[%s12142_s6 + $0x49c] ss:$48 sps:$4 sm:$0xff]  }
 0x2ae   : > { %7042 = vmatpush1.bf16.msra.mxu1 %v10922_v47  ;;  %6751 = vmatprep.subr.bf16.mxu0 %v10927_v29  ;;  %v10955_v47 = vld [vmem:[%s12142_s6 + $0x490] ss:$48 sps:$4 sm:$0xff]   ;;  %v10958_v29 = vld [vmem:[%s12142_s6 + $0x498] ss:$48 sps:$4 sm:$0xff]  }
 0x2af   : > { %7043 = vmatprep.subr.bf16.mxu1 %v10930_v7  ;;  %v10963_v7 = vld [vmem:[%s12142_s6 + $0x4f4] ss:$48 sps:$4 sm:$0xff]  }
 0x2b1   : > { %6752 = vmatpush1.bf16.msra.mxu0 %v10925_v34  ;;  %v10966_v34 = vld [vmem:[%s12142_s6 + $0x4fc] ss:$48 sps:$4 sm:$0xff]  }
 0x2b2   : > { %7044 = vmatpush1.bf16.msra.mxu1 %v10928_v13  ;;  %6753 = vmatprep.subr.bf16.mxu0 %v10933_v56  ;;  %v10961_v13 = vld [vmem:[%s12142_s6 + $0x4f0] ss:$48 sps:$4 sm:$0xff]   ;;  %v10964_v56 = vld [vmem:[%s12142_s6 + $0x4f8] ss:$48 sps:$4 sm:$0xff]  }
 0x2b3   : > { %7045 = vmatprep.subr.bf16.mxu1 %v10936_v50  ;;  %v10969_v50 = vld [vmem:[%s12142_s6 + $0x554] ss:$48 sps:$4 sm:$0xff]  }
 0x2b5   : > { %6754 = vmatpush1.bf16.msra.mxu0 %v10931_v61  ;;  %v10972_v61 = vld [vmem:[%s12142_s6 + $0x55c] ss:$48 sps:$4 sm:$0xff]  }
 0x2b6   : > { %7046 = vmatpush1.bf16.msra.mxu1 %v10934_v31  ;;  %6755 = vmatprep.subr.bf16.mxu0 %v10939_v62  ;;  %v10967_v31 = vld [vmem:[%s12142_s6 + $0x550] ss:$48 sps:$4 sm:$0xff]   ;;  %v10970_v62 = vld [vmem:[%s12142_s6 + $0x558] ss:$48 sps:$4 sm:$0xff]  }
 0x2b7   : > { %7047 = vmatprep.subr.bf16.mxu1 %v10942_v49  ;;  %v10975_v49 = vld [vmem:[%s12142_s6 + $0x5b4] ss:$48 sps:$4 sm:$0xff]  }
 0x2b9   : > { %6756 = vmatpush1.bf16.msra.mxu0 %v10937_v53  ;;  %v10978_v53 = vld [vmem:[%s12142_s6 + $0x5bc] ss:$48 sps:$4 sm:$0xff]  }
 0x2ba   : > { %7048 = vmatpush1.bf16.msra.mxu1 %v10940_v10  ;;  %6757 = vmatprep.subr.bf16.mxu0 %v10945_v11  ;;  %v10973_v10 = vld [vmem:[%s12142_s6 + $0x5b0] ss:$48 sps:$4 sm:$0xff]   ;;  %v10976_v11 = vld [vmem:[%s12142_s6 + $0x5b8] ss:$48 sps:$4 sm:$0xff]  }
 0x2bb   : > { %7049 = vmatprep.subr.bf16.mxu1 %v10948_v12  ;;  %v10981_v12 = vld [vmem:[%s12142_s6 + $0x614] ss:$48 sps:$4 sm:$0xff]  }
 0x2bd   : > { %6758 = vmatpush1.bf16.msra.mxu0 %v10943_v16  ;;  %v10984_v16 = vld [vmem:[%s12142_s6 + $0x61c] ss:$48 sps:$4 sm:$0xff]  }
 0x2be   : > { %7050 = vmatpush1.bf16.msra.mxu1 %v10946_v14  ;;  %6759 = vmatprep.subr.bf16.mxu0 %v10951_v9  ;;  %v10979_v14 = vld [vmem:[%s12142_s6 + $0x610] ss:$48 sps:$4 sm:$0xff]   ;;  %v10982_v9 = vld [vmem:[%s12142_s6 + $0x618] ss:$48 sps:$4 sm:$0xff]  }
 0x2bf   : > { %7051 = vmatprep.subr.bf16.mxu1 %v10954_v17  ;;  %v10987_v17 = vld [vmem:[%s12142_s6 + $0x674] ss:$48 sps:$4 sm:$0xff]  }
 0x2c1   : > { %6760 = vmatpush1.bf16.msra.mxu0 %v10949_v19  ;;  %v10990_v19 = vld [vmem:[%s12142_s6 + $0x67c] ss:$48 sps:$4 sm:$0xff]  }
 0x2c2   : > { %7052 = vmatpush1.bf16.msra.mxu1 %v10952_v22  ;;  %6761 = vmatprep.subr.bf16.mxu0 %v10957_v23  ;;  %v10985_v22 = vld [vmem:[%s12142_s6 + $0x670] ss:$48 sps:$4 sm:$0xff]   ;;  %v10988_v23 = vld [vmem:[%s12142_s6 + $0x678] ss:$48 sps:$4 sm:$0xff]  }
 0x2c3   : > { %7053 = vmatprep.subr.bf16.mxu1 %v10960_v42  ;;  %v10993_v42 = vld [vmem:[%s12142_s6 + $0x6d4] ss:$48 sps:$4 sm:$0xff]  }
 0x2c5   : > { %6762 = vmatpush1.bf16.msra.mxu0 %v10955_v47  ;;  %v10996_v47 = vld [vmem:[%s12142_s6 + $0x6dc] ss:$48 sps:$4 sm:$0xff]  }
 0x2c6   : > { %7054 = vmatpush1.bf16.msra.mxu1 %v10958_v29  ;;  %6763 = vmatprep.subr.bf16.mxu0 %v10963_v7  ;;  %v10991_v29 = vld [vmem:[%s12142_s6 + $0x6d0] ss:$48 sps:$4 sm:$0xff]   ;;  %v10994_v7 = vld [vmem:[%s12142_s6 + $0x6d8] ss:$48 sps:$4 sm:$0xff]  }
 0x2c7   : > { %7055 = vmatprep.subr.bf16.mxu1 %v10966_v34  ;;  %v10999_v34 = vld [vmem:[%s12142_s6 + $0x734] ss:$48 sps:$4 sm:$0xff]  }
 0x2c9   : > { %6764 = vmatpush1.bf16.msra.mxu0 %v10961_v13  ;;  %v11002_v13 = vld [vmem:[%s12142_s6 + $0x73c] ss:$48 sps:$4 sm:$0xff]  }
 0x2ca   : > { %7056 = vmatpush1.bf16.msra.mxu1 %v10964_v56  ;;  %6765 = vmatprep.subr.bf16.mxu0 %v10969_v50  ;;  %v10997_v56 = vld [vmem:[%s12142_s6 + $0x730] ss:$48 sps:$4 sm:$0xff]   ;;  %v11000_v50 = vld [vmem:[%s12142_s6 + $0x738] ss:$48 sps:$4 sm:$0xff]  }
 0x2cb   : > { %7057 = vmatprep.subr.bf16.mxu1 %v10972_v61  ;;  %v11005_v61 = vld [vmem:[%s12142_s6 + $0x794] ss:$48 sps:$4 sm:$0xff]  }
 0x2cd   : > { %6766 = vmatpush1.bf16.msra.mxu0 %v10967_v31  ;;  %v11008_v31 = vld [vmem:[%s12142_s6 + $0x79c] ss:$48 sps:$4 sm:$0xff]  }
 0x2ce   : > { %7058 = vmatpush1.bf16.msra.mxu1 %v10970_v62  ;;  %6767 = vmatprep.subr.bf16.mxu0 %v10975_v49  ;;  %v11003_v62 = vld [vmem:[%s12142_s6 + $0x790] ss:$48 sps:$4 sm:$0xff]   ;;  %v11006_v49 = vld [vmem:[%s12142_s6 + $0x798] ss:$48 sps:$4 sm:$0xff]  }
 0x2cf   : > { %7059 = vmatprep.subr.bf16.mxu1 %v10978_v53  ;;  %v11011_v53 = vld [vmem:[%s12142_s6 + $0x7f4] ss:$48 sps:$4 sm:$0xff]  }
 0x2d1   : > { %6768 = vmatpush1.bf16.msra.mxu0 %v10973_v10  ;;  %v11014_v10 = vld [vmem:[%s12142_s6 + $0x7fc] ss:$48 sps:$4 sm:$0xff]  }
 0x2d2   : > { %7060 = vmatpush1.bf16.msra.mxu1 %v10976_v11  ;;  %6810 = vmatprep.subr.bf16.mxu0 %v10981_v12  ;;  %v11009_v11 = vld [vmem:[%s12142_s6 + $0x7f0] ss:$48 sps:$4 sm:$0xff]   ;;  %v11012_v12 = vld [vmem:[%s12142_s6 + $0x7f8] ss:$48 sps:$4 sm:$0xff]  }
 0x2d3   : > { %7102 = vmatprep.subr.bf16.mxu1 %v10984_v16  ;;  %v11017_v16 = vld [vmem:[%s12142_s6 + $0x854] ss:$48 sps:$4 sm:$0xff]  }
 0x2d4   : > { %6770 = vmatmul.mubr.bf16.vlgmr.msra.gmra.mrb[48].mxu0 %v12289_v8 }
 0x2d5   : > { %7062 = vmatmul.mubr.bf16.vlgmr.msra.gmra.mrb[48].mxu1 %v12289_v8  ;;  %6779 = vmatprep.mubr.bf16.mxu0 %v12324_v18 }
 0x2d6   : > { %6811 = vmatpush1.bf16.msra.mxu0 %v10979_v14  ;;  %7071 = vmatprep.mubr.bf16.mxu1 %v12324_v18  ;;  %v11020_v14 = vld [vmem:[%s12142_s6 + $0x85c] ss:$48 sps:$4 sm:$0xff]  }
 0x2d7   : > { %7103 = vmatpush1.bf16.msra.mxu1 %v10982_v9  ;;  %6812 = vmatprep.subr.bf16.mxu0 %v10987_v17  ;;  %v11015_v9 = vld [vmem:[%s12142_s6 + $0x850] ss:$48 sps:$4 sm:$0xff]   ;;  %v11018_v17 = vld [vmem:[%s12142_s6 + $0x858] ss:$48 sps:$4 sm:$0xff]  }
 0x2d8   : > { %7104 = vmatprep.subr.bf16.mxu1 %v10990_v19  ;;  %v11023_v19 = vld [vmem:[%s12142_s6 + $0x8b4] ss:$48 sps:$4 sm:$0xff]  }
 0x2da   : > { %6813 = vmatpush1.bf16.msra.mxu0 %v10985_v22  ;;  %v11026_v22 = vld [vmem:[%s12142_s6 + $0x8bc] ss:$48 sps:$4 sm:$0xff]  }
 0x2db   : > { %7105 = vmatpush1.bf16.msra.mxu1 %v10988_v23  ;;  %6814 = vmatprep.subr.bf16.mxu0 %v10993_v42  ;;  %v11021_v23 = vld [vmem:[%s12142_s6 + $0x8b0] ss:$48 sps:$4 sm:$0xff]   ;;  %v11024_v42 = vld [vmem:[%s12142_s6 + $0x8b8] ss:$48 sps:$4 sm:$0xff]  }
 0x2dc   : > { %6780 = vmatmul.mubr.bf16.gmra.mrb[52].mxu0 %v12321_v15  ;;  %7106 = vmatprep.subr.bf16.mxu1 %v10996_v47  ;;  %v11029_v47 = vld [vmem:[%s12142_s6 + $0x914] ss:$48 sps:$4 sm:$0xff]  }
 0x2dd   : > { %7072 = vmatmul.mubr.bf16.gmra.mrb[52].mxu1 %v12321_v15  ;;  %6789 = vmatprep.mubr.bf16.mxu0 %v12352_v4 }
 0x2de   : > { %6815 = vmatpush1.bf16.msra.mxu0 %v10991_v29  ;;  %7081 = vmatprep.mubr.bf16.mxu1 %v12352_v4  ;;  %v11032_v29 = vld [vmem:[%s12142_s6 + $0x91c] ss:$48 sps:$4 sm:$0xff]  }
 0x2df   : > { %7107 = vmatpush1.bf16.msra.mxu1 %v10994_v7  ;;  %6816 = vmatprep.subr.bf16.mxu0 %v10999_v34  ;;  %v11027_v7 = vld [vmem:[%s12142_s6 + $0x910] ss:$48 sps:$4 sm:$0xff]   ;;  %v11030_v34 = vld [vmem:[%s12142_s6 + $0x918] ss:$48 sps:$4 sm:$0xff]  }
 0x2e0   : > { %7108 = vmatprep.subr.bf16.mxu1 %v11002_v13  ;;  %v11035_v13 = vld [vmem:[%s12142_s6 + $0x974] ss:$48 sps:$4 sm:$0xff]  }
 0x2e2   : > { %6817 = vmatpush1.bf16.msra.mxu0 %v10997_v56  ;;  %v11038_v56 = vld [vmem:[%s12142_s6 + $0x97c] ss:$48 sps:$4 sm:$0xff]  }
 0x2e3   : > { %7109 = vmatpush1.bf16.msra.mxu1 %v11000_v50  ;;  %6818 = vmatprep.subr.bf16.mxu0 %v11005_v61  ;;  %v11033_v50 = vld [vmem:[%s12142_s6 + $0x970] ss:$48 sps:$4 sm:$0xff]   ;;  %v11036_v61 = vld [vmem:[%s12142_s6 + $0x978] ss:$48 sps:$4 sm:$0xff]  }
 0x2e4   : > { %6790 = vmatmul.mubr.bf16.gmra.mrb[56].mxu0 %v12349_v54  ;;  %7110 = vmatprep.subr.bf16.mxu1 %v11008_v31  ;;  %v11041_v31 = vld [vmem:[%s12142_s6 + $0x9d4] ss:$48 sps:$4 sm:$0xff]  }
 0x2e5   : > { %7082 = vmatmul.mubr.bf16.gmra.mrb[56].mxu1 %v12349_v54  ;;  %6799 = vmatprep.mubr.bf16.mxu0 %v12380_v45 }
 0x2e6   : > { %6819 = vmatpush1.bf16.msra.mxu0 %v11003_v62  ;;  %7091 = vmatprep.mubr.bf16.mxu1 %v12380_v45  ;;  %v11044_v62 = vld [vmem:[%s12142_s6 + $0x9dc] ss:$48 sps:$4 sm:$0xff]  }
 0x2e7   : > { %7111 = vmatpush1.bf16.msra.mxu1 %v11006_v49  ;;  %6820 = vmatprep.subr.bf16.mxu0 %v11011_v53  ;;  %v11039_v49 = vld [vmem:[%s12142_s6 + $0x9d0] ss:$48 sps:$4 sm:$0xff]   ;;  %v11042_v53 = vld [vmem:[%s12142_s6 + $0x9d8] ss:$48 sps:$4 sm:$0xff]  }
 0x2e8   : > { %7112 = vmatprep.subr.bf16.mxu1 %v11014_v10  ;;  %v11047_v10 = vld [vmem:[%s12142_s6 + $0xa34] ss:$48 sps:$4 sm:$0xff]  }
 0x2ea   : > { %6821 = vmatpush1.bf16.msra.mxu0 %v11009_v11  ;;  %v11050_v11 = vld [vmem:[%s12142_s6 + $0xa3c] ss:$48 sps:$4 sm:$0xff]  }
 0x2eb   : > { %7113 = vmatpush1.bf16.msra.mxu1 %v11012_v12  ;;  %6822 = vmatprep.subr.bf16.mxu0 %v11017_v16  ;;  %v11045_v12 = vld [vmem:[%s12142_s6 + $0xa30] ss:$48 sps:$4 sm:$0xff]   ;;  %v11048_v16 = vld [vmem:[%s12142_s6 + $0xa38] ss:$48 sps:$4 sm:$0xff]  }
 0x2ec   : > { %6800 = vmatmul.mubr.bf16.gmra.mrb[60].mxu0 %v12377_v21  ;;  %7114 = vmatprep.subr.bf16.mxu1 %v11020_v14  ;;  %v11053_v14 = vld [vmem:[%s12142_s6 + $0xa94] ss:$48 sps:$4 sm:$0xff]  }
 0x2ed   : > { %7092 = vmatmul.mubr.bf16.gmra.mrb[60].mxu1 %v12377_v21  ;;  %6842 = vmatprep.mubr.bf16.mxu0 %v12337_v30 }
 0x2ee   : > { %6823 = vmatpush1.bf16.msra.mxu0 %v11015_v9  ;;  %7134 = vmatprep.mubr.bf16.mxu1 %v12337_v30  ;;  %v11056_v9 = vld [vmem:[%s12142_s6 + $0xa9c] ss:$48 sps:$4 sm:$0xff]  }
 0x2ef   : > { %7115 = vmatpush1.bf16.msra.mxu1 %v11018_v17  ;;  %6824 = vmatprep.subr.bf16.mxu0 %v11023_v19  ;;  %v11051_v17 = vld [vmem:[%s12142_s6 + $0xa90] ss:$48 sps:$4 sm:$0xff]   ;;  %v11054_v19 = vld [vmem:[%s12142_s6 + $0xa98] ss:$48 sps:$4 sm:$0xff]  }
 0x2f0   : > { %7116 = vmatprep.subr.bf16.mxu1 %v11026_v22  ;;  %v11059_v22 = vld [vmem:[%s12142_s6 + $0xaf4] ss:$48 sps:$4 sm:$0xff]  }
 0x2f2   : > { %6825 = vmatpush1.bf16.msra.mxu0 %v11021_v23  ;;  %v11062_v23 = vld [vmem:[%s12142_s6 + $0xafc] ss:$48 sps:$4 sm:$0xff]  }
 0x2f3   : > { %7117 = vmatpush1.bf16.msra.mxu1 %v11024_v42  ;;  %6826 = vmatprep.subr.bf16.mxu0 %v11029_v47  ;;  %v11057_v42 = vld [vmem:[%s12142_s6 + $0xaf0] ss:$48 sps:$4 sm:$0xff]   ;;  %v11060_v47 = vld [vmem:[%s12142_s6 + $0xaf8] ss:$48 sps:$4 sm:$0xff]  }
 0x2f4   : > { %7118 = vmatprep.subr.bf16.mxu1 %v11032_v29  ;;  %v11065_v29 = vld [vmem:[%s12142_s6 + $0xb54] ss:$48 sps:$4 sm:$0xff]  }
 0x2f6   : > { %6827 = vmatpush1.bf16.msra.mxu0 %v11027_v7  ;;  %v11068_v7 = vld [vmem:[%s12142_s6 + $0xb5c] ss:$48 sps:$4 sm:$0xff]  }
 0x2f7   : > { %7119 = vmatpush1.bf16.msra.mxu1 %v11030_v34  ;;  %6828 = vmatprep.subr.bf16.mxu0 %v11035_v13  ;;  %v11063_v34 = vld [vmem:[%s12142_s6 + $0xb50] ss:$48 sps:$4 sm:$0xff]   ;;  %v11066_v13 = vld [vmem:[%s12142_s6 + $0xb58] ss:$48 sps:$4 sm:$0xff]  }
 0x2f8   : > { %7120 = vmatprep.subr.bf16.mxu1 %v11038_v56  ;;  %v11071_v56 = vld [vmem:[%s12142_s6 + $0xbb4] ss:$48 sps:$4 sm:$0xff]  }
 0x2fa   : > { %6829 = vmatpush1.bf16.msra.mxu0 %v11033_v50  ;;  %v11074_v50 = vld [vmem:[%s12142_s6 + $0xbbc] ss:$48 sps:$4 sm:$0xff]  }
 0x2fb   : > { %7121 = vmatpush1.bf16.msra.mxu1 %v11036_v61  ;;  %6830 = vmatprep.subr.bf16.mxu0 %v11041_v31  ;;  %v11069_v61 = vld [vmem:[%s12142_s6 + $0xbb0] ss:$48 sps:$4 sm:$0xff]   ;;  %v11072_v31 = vld [vmem:[%s12142_s6 + $0xbb8] ss:$48 sps:$4 sm:$0xff]  }
 0x2fc   : > { %7122 = vmatprep.subr.bf16.mxu1 %v11044_v62  ;;  %v11077_v62 = vld [vmem:[%s12142_s6 + $0xc14] ss:$48 sps:$4 sm:$0xff]  }
 0x2fe   : > { %6831 = vmatpush1.bf16.msra.mxu0 %v11039_v49  ;;  %v11080_v49 = vld [vmem:[%s12142_s6 + $0xc1c] ss:$48 sps:$4 sm:$0xff]  }
 0x2ff   : > { %7123 = vmatpush1.bf16.msra.mxu1 %v11042_v53  ;;  %6832 = vmatprep.subr.bf16.mxu0 %v11047_v10  ;;  %v11075_v53 = vld [vmem:[%s12142_s6 + $0xc10] ss:$48 sps:$4 sm:$0xff]   ;;  %v11078_v10 = vld [vmem:[%s12142_s6 + $0xc18] ss:$48 sps:$4 sm:$0xff]  }
 0x300   : > { %7124 = vmatprep.subr.bf16.mxu1 %v11050_v11  ;;  %v11083_v11 = vld [vmem:[%s12142_s6 + $0xc74] ss:$48 sps:$4 sm:$0xff]  }
 0x302   : > { %6833 = vmatpush1.bf16.msra.mxu0 %v11045_v12  ;;  %v11086_v12 = vld [vmem:[%s12142_s6 + $0xc7c] ss:$48 sps:$4 sm:$0xff]  }
 0x303   : > { %7125 = vmatpush1.bf16.msra.mxu1 %v11048_v16  ;;  %6834 = vmatprep.subr.bf16.mxu0 %v11053_v14  ;;  %v11081_v16 = vld [vmem:[%s12142_s6 + $0xc70] ss:$48 sps:$4 sm:$0xff]   ;;  %v11084_v14 = vld [vmem:[%s12142_s6 + $0xc78] ss:$48 sps:$4 sm:$0xff]  }
 0x304   : > { %7126 = vmatprep.subr.bf16.mxu1 %v11056_v9  ;;  %v11089_v9 = vld [vmem:[%s12142_s6 + $0xcd4] ss:$48 sps:$4 sm:$0xff]  }
 0x306   : > { %6835 = vmatpush1.bf16.msra.mxu0 %v11051_v17  ;;  %v11092_v17 = vld [vmem:[%s12142_s6 + $0xcdc] ss:$48 sps:$4 sm:$0xff]  }
 0x307   : > { %7127 = vmatpush1.bf16.msra.mxu1 %v11054_v19  ;;  %6836 = vmatprep.subr.bf16.mxu0 %v11059_v22  ;;  %v11087_v19 = vld [vmem:[%s12142_s6 + $0xcd0] ss:$48 sps:$4 sm:$0xff]   ;;  %v11090_v22 = vld [vmem:[%s12142_s6 + $0xcd8] ss:$48 sps:$4 sm:$0xff]  }
 0x308   : > { %7128 = vmatprep.subr.bf16.mxu1 %v11062_v23  ;;  %v11095_v23 = vld [vmem:[%s12142_s6 + $0xd34] ss:$48 sps:$4 sm:$0xff]  }
 0x30a   : > { %6837 = vmatpush1.bf16.msra.mxu0 %v11057_v42  ;;  %v11098_v42 = vld [vmem:[%s12142_s6 + $0xd3c] ss:$48 sps:$4 sm:$0xff]  }
 0x30b   : > { %7129 = vmatpush1.bf16.msra.mxu1 %v11060_v47  ;;  %6838 = vmatprep.subr.bf16.mxu0 %v11065_v29  ;;  %v11093_v47 = vld [vmem:[%s12142_s6 + $0xd30] ss:$48 sps:$4 sm:$0xff]   ;;  %v11096_v29 = vld [vmem:[%s12142_s6 + $0xd38] ss:$48 sps:$4 sm:$0xff]  }
 0x30c   : > { %7130 = vmatprep.subr.bf16.mxu1 %v11068_v7  ;;  %v11101_v7 = vld [vmem:[%s12142_s6 + $0xd94] ss:$48 sps:$4 sm:$0xff]  }
 0x30e   : > { %6839 = vmatpush1.bf16.msra.mxu0 %v11063_v34  ;;  %v11104_v34 = vld [vmem:[%s12142_s6 + $0xd9c] ss:$48 sps:$4 sm:$0xff]  }
 0x30f   : > { %7131 = vmatpush1.bf16.msra.mxu1 %v11066_v13  ;;  %6840 = vmatprep.subr.bf16.mxu0 %v11071_v56  ;;  %v11099_v13 = vld [vmem:[%s12142_s6 + $0xd90] ss:$48 sps:$4 sm:$0xff]   ;;  %v11102_v56 = vld [vmem:[%s12142_s6 + $0xd98] ss:$48 sps:$4 sm:$0xff]  }
 0x310   : > { %7132 = vmatprep.subr.bf16.mxu1 %v11074_v50  ;;  %v11107_v50 = vld [vmem:[%s12142_s6 + $0xdf4] ss:$48 sps:$4 sm:$0xff]  }
 0x312   : > { %6841 = vmatpush1.bf16.msra.mxu0 %v11069_v61  ;;  %v11110_v61 = vld [vmem:[%s12142_s6 + $0xdfc] ss:$48 sps:$4 sm:$0xff]  }
 0x313   : > { %7133 = vmatpush1.bf16.msra.mxu1 %v11072_v31  ;;  %6883 = vmatprep.subr.bf16.mxu0 %v11077_v62  ;;  %v11105_v31 = vld [vmem:[%s12142_s6 + $0xdf0] ss:$48 sps:$4 sm:$0xff]   ;;  %v11108_v62 = vld [vmem:[%s12142_s6 + $0xdf8] ss:$48 sps:$4 sm:$0xff]  }
 0x314   : > { %7175 = vmatprep.subr.bf16.mxu1 %v11080_v49  ;;  %v11113_v49 = vld [vmem:[%s12142_s6 + $0xe54] ss:$48 sps:$4 sm:$0xff]  }
 0x315   : > { %6843 = vmatmul.mubr.bf16.vlgmr.msra.gmra.mrb[48].mxu0 %v12332_v26 }
 0x316   : > { %7135 = vmatmul.mubr.bf16.vlgmr.msra.gmra.mrb[48].mxu1 %v12332_v26  ;;  %6852 = vmatprep.mubr.bf16.mxu0 %v12365_v5 }
 0x317   : > { %6884 = vmatpush1.bf16.msra.mxu0 %v11075_v53  ;;  %7144 = vmatprep.mubr.bf16.mxu1 %v12365_v5  ;;  %v11116_v53 = vld [vmem:[%s12142_s6 + $0xe5c] ss:$48 sps:$4 sm:$0xff]  }
 0x318   : > { %7176 = vmatpush1.bf16.msra.mxu1 %v11078_v10  ;;  %6885 = vmatprep.subr.bf16.mxu0 %v11083_v11  ;;  %v11111_v10 = vld [vmem:[%s12142_s6 + $0xe50] ss:$48 sps:$4 sm:$0xff]   ;;  %v11114_v11 = vld [vmem:[%s12142_s6 + $0xe58] ss:$48 sps:$4 sm:$0xff]  }
 0x319   : > { %7177 = vmatprep.subr.bf16.mxu1 %v11086_v12  ;;  %v11119_v12 = vld [vmem:[%s12142_s6 + $0xeb4] ss:$48 sps:$4 sm:$0xff]  }
 0x31b   : > { %6886 = vmatpush1.bf16.msra.mxu0 %v11081_v16  ;;  %v11122_v16 = vld [vmem:[%s12142_s6 + $0xebc] ss:$48 sps:$4 sm:$0xff]  }
 0x31c   : > { %7178 = vmatpush1.bf16.msra.mxu1 %v11084_v14  ;;  %6887 = vmatprep.subr.bf16.mxu0 %v11089_v9  ;;  %v11117_v14 = vld [vmem:[%s12142_s6 + $0xeb0] ss:$48 sps:$4 sm:$0xff]   ;;  %v11120_v9 = vld [vmem:[%s12142_s6 + $0xeb8] ss:$48 sps:$4 sm:$0xff]  }
 0x31d   : > { %6853 = vmatmul.mubr.bf16.gmra.mrb[52].mxu0 %v12360_v1  ;;  %7179 = vmatprep.subr.bf16.mxu1 %v11092_v17  ;;  %v11125_v17 = vld [vmem:[%s12142_s6 + $0xf14] ss:$48 sps:$4 sm:$0xff]  }
 0x31e   : > { %7145 = vmatmul.mubr.bf16.gmra.mrb[52].mxu1 %v12360_v1  ;;  %6862 = vmatprep.mubr.bf16.mxu0 %v12394_v36 }
 0x31f   : > { %6888 = vmatpush1.bf16.msra.mxu0 %v11087_v19  ;;  %7154 = vmatprep.mubr.bf16.mxu1 %v12394_v36  ;;  %v11128_v19 = vld [vmem:[%s12142_s6 + $0xf1c] ss:$48 sps:$4 sm:$0xff]  }
 0x320   : > { %7180 = vmatpush1.bf16.msra.mxu1 %v11090_v22  ;;  %6889 = vmatprep.subr.bf16.mxu0 %v11095_v23  ;;  %v11123_v22 = vld [vmem:[%s12142_s6 + $0xf10] ss:$48 sps:$4 sm:$0xff]   ;;  %v11126_v23 = vld [vmem:[%s12142_s6 + $0xf18] ss:$48 sps:$4 sm:$0xff]  }
 0x321   : > { %7181 = vmatprep.subr.bf16.mxu1 %v11098_v42  ;;  %v11131_v42 = vld [vmem:[%s12142_s6 + $0xf74] ss:$48 sps:$4 sm:$0xff]  }
 0x323   : > { %6890 = vmatpush1.bf16.msra.mxu0 %v11093_v47  ;;  %v11134_v47 = vld [vmem:[%s12142_s6 + $0xf7c] ss:$48 sps:$4 sm:$0xff]  }
 0x324   : > { %7182 = vmatpush1.bf16.msra.mxu1 %v11096_v29  ;;  %6891 = vmatprep.subr.bf16.mxu0 %v11101_v7  ;;  %v11129_v29 = vld [vmem:[%s12142_s6 + $0xf70] ss:$48 sps:$4 sm:$0xff]   ;;  %v11132_v7 = vld [vmem:[%s12142_s6 + $0xf78] ss:$48 sps:$4 sm:$0xff]  }
 0x325   : > { %6863 = vmatmul.mubr.bf16.gmra.mrb[56].mxu0 %v12390_v35  ;;  %7183 = vmatprep.subr.bf16.mxu1 %v11104_v34  ;;  %v11137_v34 = vld [vmem:[%s12142_s6 + $0xfd4] ss:$48 sps:$4 sm:$0xff]  }
 0x326   : > { %7155 = vmatmul.mubr.bf16.gmra.mrb[56].mxu1 %v12390_v35  ;;  %6872 = vmatprep.mubr.bf16.mxu0 %v12412_v2 }
 0x327   : > { %6892 = vmatpush1.bf16.msra.mxu0 %v11099_v13  ;;  %7164 = vmatprep.mubr.bf16.mxu1 %v12412_v2  ;;  %v11140_v13 = vld [vmem:[%s12142_s6 + $0xfdc] ss:$48 sps:$4 sm:$0xff]  }
 0x328   : > { %7184 = vmatpush1.bf16.msra.mxu1 %v11102_v56  ;;  %6893 = vmatprep.subr.bf16.mxu0 %v11107_v50  ;;  %v11135_v56 = vld [vmem:[%s12142_s6 + $0xfd0] ss:$48 sps:$4 sm:$0xff]   ;;  %v11138_v50 = vld [vmem:[%s12142_s6 + $0xfd8] ss:$48 sps:$4 sm:$0xff]  }
 0x329   : > { %7185 = vmatprep.subr.bf16.mxu1 %v11110_v61  ;;  %v11143_v61 = vld [vmem:[%s12142_s6 + $0x1034] ss:$48 sps:$4 sm:$0xff]  }
 0x32b   : > { %6894 = vmatpush1.bf16.msra.mxu0 %v11105_v31  ;;  %v11146_v31 = vld [vmem:[%s12142_s6 + $0x103c] ss:$48 sps:$4 sm:$0xff]  }
 0x32c   : > { %7186 = vmatpush1.bf16.msra.mxu1 %v11108_v62  ;;  %6895 = vmatprep.subr.bf16.mxu0 %v11113_v49  ;;  %v11141_v62 = vld [vmem:[%s12142_s6 + $0x1030] ss:$48 sps:$4 sm:$0xff]   ;;  %v11144_v49 = vld [vmem:[%s12142_s6 + $0x1038] ss:$48 sps:$4 sm:$0xff]  }
 0x32d   : > { %6873 = vmatmul.mubr.bf16.gmra.mrb[60].mxu0 %v12410_v63  ;;  %7187 = vmatprep.subr.bf16.mxu1 %v11116_v53  ;;  %v11149_v53 = vld [vmem:[%s12142_s6 + $0x1094] ss:$48 sps:$4 sm:$0xff]  }
 0x32e   : > { %7165 = vmatmul.mubr.bf16.gmra.mrb[60].mxu1 %v12410_v63  ;;  %6915 = vmatprep.mubr.bf16.mxu0 %v12464_v0 }
 0x32f   : > { %6896 = vmatpush1.bf16.msra.mxu0 %v11111_v10  ;;  %7207 = vmatprep.mubr.bf16.mxu1 %v12464_v0  ;;  %v11152_v10 = vld [vmem:[%s12142_s6 + $0x109c] ss:$48 sps:$4 sm:$0xff]  }
 0x330   : > { %7188 = vmatpush1.bf16.msra.mxu1 %v11114_v11  ;;  %6897 = vmatprep.subr.bf16.mxu0 %v11119_v12  ;;  %v11147_v11 = vld [vmem:[%s12142_s6 + $0x1090] ss:$48 sps:$4 sm:$0xff]   ;;  %v11150_v12 = vld [vmem:[%s12142_s6 + $0x1098] ss:$48 sps:$4 sm:$0xff]  }
 0x331   : > { %7189 = vmatprep.subr.bf16.mxu1 %v11122_v16  ;;  %v11155_v16 = vld [vmem:[%s12142_s6 + $0x10f4] ss:$48 sps:$4 sm:$0xff]  }
 0x333   : > { %6898 = vmatpush1.bf16.msra.mxu0 %v11117_v14  ;;  %v11158_v14 = vld [vmem:[%s12142_s6 + $0x10fc] ss:$48 sps:$4 sm:$0xff]  }
 0x334   : > { %7190 = vmatpush1.bf16.msra.mxu1 %v11120_v9  ;;  %6899 = vmatprep.subr.bf16.mxu0 %v11125_v17  ;;  %v11153_v9 = vld [vmem:[%s12142_s6 + $0x10f0] ss:$48 sps:$4 sm:$0xff]   ;;  %v11156_v17 = vld [vmem:[%s12142_s6 + $0x10f8] ss:$48 sps:$4 sm:$0xff]  }
 0x335   : > { %7191 = vmatprep.subr.bf16.mxu1 %v11128_v19  ;;  %v11161_v19 = vld [vmem:[%s12142_s6 + $0x1154] ss:$48 sps:$4 sm:$0xff]  }
 0x337   : > { %6900 = vmatpush1.bf16.msra.mxu0 %v11123_v22  ;;  %v11164_v22 = vld [vmem:[%s12142_s6 + $0x115c] ss:$48 sps:$4 sm:$0xff]  }
 0x338   : > { %7192 = vmatpush1.bf16.msra.mxu1 %v11126_v23  ;;  %6901 = vmatprep.subr.bf16.mxu0 %v11131_v42  ;;  %v11159_v23 = vld [vmem:[%s12142_s6 + $0x1150] ss:$48 sps:$4 sm:$0xff]   ;;  %v11162_v42 = vld [vmem:[%s12142_s6 + $0x1158] ss:$48 sps:$4 sm:$0xff]  }
 0x339   : > { %7193 = vmatprep.subr.bf16.mxu1 %v11134_v47  ;;  %v11167_v47 = vld [vmem:[%s12142_s6 + $0x11b4] ss:$48 sps:$4 sm:$0xff]  }
 0x33b   : > { %6902 = vmatpush1.bf16.msra.mxu0 %v11129_v29  ;;  %v11170_v29 = vld [vmem:[%s12142_s6 + $0x11bc] ss:$48 sps:$4 sm:$0xff]  }
 0x33c   : > { %7194 = vmatpush1.bf16.msra.mxu1 %v11132_v7  ;;  %6903 = vmatprep.subr.bf16.mxu0 %v11137_v34  ;;  %v11165_v7 = vld [vmem:[%s12142_s6 + $0x11b0] ss:$48 sps:$4 sm:$0xff]   ;;  %v11168_v34 = vld [vmem:[%s12142_s6 + $0x11b8] ss:$48 sps:$4 sm:$0xff]  }
 0x33d   : > { %7195 = vmatprep.subr.bf16.mxu1 %v11140_v13  ;;  %v11173_v13 = vld [vmem:[%s12142_s6 + $0x1214] ss:$48 sps:$4 sm:$0xff]  }
 0x33f   : > { %6904 = vmatpush1.bf16.msra.mxu0 %v11135_v56  ;;  %v11176_v56 = vld [vmem:[%s12142_s6 + $0x121c] ss:$48 sps:$4 sm:$0xff]  }
 0x340   : > { %7196 = vmatpush1.bf16.msra.mxu1 %v11138_v50  ;;  %6905 = vmatprep.subr.bf16.mxu0 %v11143_v61  ;;  %v11171_v50 = vld [vmem:[%s12142_s6 + $0x1210] ss:$48 sps:$4 sm:$0xff]   ;;  %v11174_v61 = vld [vmem:[%s12142_s6 + $0x1218] ss:$48 sps:$4 sm:$0xff]  }
 0x341   : > { %7197 = vmatprep.subr.bf16.mxu1 %v11146_v31  ;;  %v11179_v31 = vld [vmem:[%s12142_s6 + $0x1274] ss:$48 sps:$4 sm:$0xff]  }
 0x343   : > { %6906 = vmatpush1.bf16.msra.mxu0 %v11141_v62  ;;  %v11182_v62 = vld [vmem:[%s12142_s6 + $0x127c] ss:$48 sps:$4 sm:$0xff]  }
 0x344   : > { %7198 = vmatpush1.bf16.msra.mxu1 %v11144_v49  ;;  %6907 = vmatprep.subr.bf16.mxu0 %v11149_v53  ;;  %v11177_v49 = vld [vmem:[%s12142_s6 + $0x1270] ss:$48 sps:$4 sm:$0xff]   ;;  %v11180_v53 = vld [vmem:[%s12142_s6 + $0x1278] ss:$48 sps:$4 sm:$0xff]  }
 0x345   : > { %7199 = vmatprep.subr.bf16.mxu1 %v11152_v10  ;;  %v11185_v10 = vld [vmem:[%s12142_s6 + $0x12d4] ss:$48 sps:$4 sm:$0xff]  }
 0x347   : > { %6908 = vmatpush1.bf16.msra.mxu0 %v11147_v11  ;;  %v11188_v11 = vld [vmem:[%s12142_s6 + $0x12dc] ss:$48 sps:$4 sm:$0xff]  }
 0x348   : > { %7200 = vmatpush1.bf16.msra.mxu1 %v11150_v12  ;;  %6909 = vmatprep.subr.bf16.mxu0 %v11155_v16  ;;  %v11183_v12 = vld [vmem:[%s12142_s6 + $0x12d0] ss:$48 sps:$4 sm:$0xff]   ;;  %v11186_v16 = vld [vmem:[%s12142_s6 + $0x12d8] ss:$48 sps:$4 sm:$0xff]  }
 0x349   : > { %7201 = vmatprep.subr.bf16.mxu1 %v11158_v14  ;;  %v11191_v14 = vld [vmem:[%s12142_s6 + $0x1334] ss:$48 sps:$4 sm:$0xff]  }
 0x34b   : > { %6910 = vmatpush1.bf16.msra.mxu0 %v11153_v9  ;;  %v11194_v9 = vld [vmem:[%s12142_s6 + $0x133c] ss:$48 sps:$4 sm:$0xff]  }
 0x34c   : > { %7202 = vmatpush1.bf16.msra.mxu1 %v11156_v17  ;;  %6911 = vmatprep.subr.bf16.mxu0 %v11161_v19  ;;  %v11189_v17 = vld [vmem:[%s12142_s6 + $0x1330] ss:$48 sps:$4 sm:$0xff]   ;;  %v11192_v19 = vld [vmem:[%s12142_s6 + $0x1338] ss:$48 sps:$4 sm:$0xff]  }
 0x34d   : > { %7203 = vmatprep.subr.bf16.mxu1 %v11164_v22  ;;  %v11197_v22 = vld [vmem:[%s12142_s6 + $0x1394] ss:$48 sps:$4 sm:$0xff]  }
 0x34f   : > { %6912 = vmatpush1.bf16.msra.mxu0 %v11159_v23  ;;  %v11200_v23 = vld [vmem:[%s12142_s6 + $0x139c] ss:$48 sps:$4 sm:$0xff]  }
 0x350   : > { %7204 = vmatpush1.bf16.msra.mxu1 %v11162_v42  ;;  %6913 = vmatprep.subr.bf16.mxu0 %v11167_v47  ;;  %v2249_v42 = vld [vmem:[%s12953_s16] sm:$0xff] }
 0x351   : > { %7205 = vmatprep.subr.bf16.mxu1 %v11170_v29  ;;  %v11195_v47 = vld [vmem:[%s12142_s6 + $0x1390] ss:$48 sps:$4 sm:$0xff]   ;;  %v11198_v29 = vld [vmem:[%s12142_s6 + $0x1398] ss:$48 sps:$4 sm:$0xff]  }
 0x353   : > { %6914 = vmatpush1.bf16.msra.mxu0 %v11165_v7  ;;  %v12959_v7 = vrot.slane %v2249_v42, %v12267_v43 }
 0x354   : > { %7206 = vmatpush1.bf16.msra.mxu1 %v11168_v34  ;;  %6956 = vmatprep.subr.bf16.mxu0 %v11173_v13  ;;  %v11203_v34 = vld [vmem:[%s12142_s6 + $0x13f4] ss:$48 sps:$4 sm:$0xff]  }
 0x355   : > { %7248 = vmatprep.subr.bf16.mxu1 %v11176_v56  ;;  %v12964_v56 = vrot.slane %v2249_v42, %v12287_v58 }
 0x356   : > { %6916 = vmatmul.mubr.bf16.vlgmr.msra.gmra.mrb[48].mxu0 %v12462_v6 }
 0x357   : > { %7208 = vmatmul.mubr.bf16.vlgmr.msra.gmra.mrb[48].mxu1 %v12462_v6  ;;  %6925 = vmatprep.mubr.bf16.mxu0 %v12497_v51 }
 0x358   : > { %6957 = vmatpush1.bf16.msra.mxu0 %v11171_v50  ;;  %7217 = vmatprep.mubr.bf16.mxu1 %v12497_v51  ;;  %v12967_v50 = vrot.slane %v2249_v42, %v12270_v44 }
 0x359   : > { %7249 = vmatpush1.bf16.msra.mxu1 %v11174_v61  ;;  %6958 = vmatprep.subr.bf16.mxu0 %v11179_v31  ;;  %v11206_v61 = vld [vmem:[%s12142_s6 + $0x13fc] ss:$48 sps:$4 sm:$0xff]  }
 0x35a   : > { %7250 = vmatprep.subr.bf16.mxu1 %v11182_v62 }
 0x35c   : > { %6959 = vmatpush1.bf16.msra.mxu0 %v11177_v49  ;;  %v12974_v49 = vrot.slane %v2249_v42, %v12292_v59 }
 0x35d   : > { %7251 = vmatpush1.bf16.msra.mxu1 %v11180_v53  ;;  %6960 = vmatprep.subr.bf16.mxu0 %v11185_v10  ;;  %v11201_v10 = vld [vmem:[%s12142_s6 + $0x13f0] ss:$48 sps:$4 sm:$0xff]  }
 0x35e   : > { %6926 = vmatmul.mubr.bf16.gmra.mrb[52].mxu0 %v12494_v46  ;;  %7252 = vmatprep.subr.bf16.mxu1 %v11188_v11 }
 0x35f   : > { %7218 = vmatmul.mubr.bf16.gmra.mrb[52].mxu1 %v12494_v46  ;;  %6935 = vmatprep.mubr.bf16.mxu0 %v12525_v39 }
 0x360   : > { %6961 = vmatpush1.bf16.msra.mxu0 %v11183_v12  ;;  %7227 = vmatprep.mubr.bf16.mxu1 %v12525_v39 }
 0x361   : > { %7253 = vmatpush1.bf16.msra.mxu1 %v11186_v16  ;;  %6962 = vmatprep.subr.bf16.mxu0 %v11191_v14  ;;  %v11204_v16 = vld [vmem:[%s12142_s6 + $0x13f8] ss:$48 sps:$4 sm:$0xff]  }
 0x362   : > { %7254 = vmatprep.subr.bf16.mxu1 %v11194_v9 }
 0x364   : > { %6963 = vmatpush1.bf16.msra.mxu0 %v11189_v17 }
 0x365   : > { %7255 = vmatpush1.bf16.msra.mxu1 %v11192_v19  ;;  %6964 = vmatprep.subr.bf16.mxu0 %v11197_v22  ;;  %v11209_v19 = vld [vmem:[%s12142_s6 + $0x1454] ss:$48 sps:$4 sm:$0xff]  }
 0x366   : > { %6936 = vmatmul.mubr.bf16.gmra.mrb[56].mxu0 %v12522_v33  ;;  %7256 = vmatprep.subr.bf16.mxu1 %v11200_v23  ;;  %v6406_v13 = vpop.f32.mrb[32].mxu0 }
 0x367   : > { %7228 = vmatmul.mubr.bf16.gmra.mrb[56].mxu1 %v12522_v33  ;;  %6945 = vmatprep.mubr.bf16.mxu0 %v12553_v38  ;;  %v6698_v31 = vpop.f32.mrb[32].mxu1  ;;  %v6408_v62 = vpop.f32.mrb[33].mxu0  ;;  %v10019_v12 = vadd.f32 %v6406_v13, %v12959_v7 }
 0x368   : > { %6965 = vmatpush1.bf16.msra.mxu0 %v11195_v47  ;;  %7237 = vmatprep.mubr.bf16.mxu1 %v12553_v38  ;;  %v6700_v53 = vpop.f32.mrb[33].mxu1  ;;  %v6410_v11 = vpop.f32.mrb[34].mxu0  ;;  %v10035_v22 = vadd.f32 %v6698_v31, %v12964_v56  ;;  %v10020_v23 = vadd.f32 %v6408_v62, %v12967_v50  ;;  %v11210_v62 = vld [vmem:[%s12142_s6 + $0x1458] ss:$48 sps:$4 sm:$0xff]  }
 0x369   : > { %7257 = vmatpush1.bf16.msra.mxu1 %v11198_v29  ;;  %6966 = vmatprep.subr.bf16.mxu0 %v11203_v34  ;;  %v10021_v14 = vadd.f32 %v6410_v11, %v12959_v7  ;;  %v6702_v9 = vpop.f32.mrb[34].mxu1  ;;  %v6412_v17 = vpop.f32.mrb[35].mxu0  ;;  %v11212_v34 = vld [vmem:[%s12142_s6 + $0x145c] ss:$48 sps:$4 sm:$0xff]   ;;  %v10036_v13 = vadd.f32 %v6700_v53, %v12974_v49  ;;  %v11215_v53 = vld [vmem:[%s12142_s6 + $0x14b4] ss:$48 sps:$4 sm:$0xff]  }
 0x36a   : > { %7258 = vmatprep.subr.bf16.mxu1 %v11206_v61  ;;  %v10037_v42 = vadd.f32 %v6702_v9, %v12964_v56  ;;  %v10022_v47 = vadd.f32 %v6412_v17, %v12967_v50  ;;  %v6704_v29 = vpop.f32.mrb[35].mxu1 }
 0x36b   : > { %v9734_v11 = vpack.c.bf16 %v10021_v14, %v10019_v12  ;;  %v10038_v3 = vadd.f32 %v6704_v29, %v12974_v49  ;;  %v11218_v12 = vld [vmem:[%s12142_s6 + $0x14bc] ss:$48 sps:$4 sm:$0xff]  }
 0x36c   : > { %v9774_v25 = vpack.c.bf16 %v10037_v42, %v10035_v22  ;;  %6967 = vmatpush1.bf16.msra.mxu0 %v11201_v10  ;;  %v9754_v31 = vpack.c.bf16 %v10022_v47, %v10020_v23  ;;  %v11221_v47 = vld [vmem:[%s12142_s6 + $0x1514] ss:$48 sps:$4 sm:$0xff]  }
 0x36d   : > { %9735 = vst [vmem:[%s12992_s1] sm:$0xff] %v9734_v11   ;;  %7259 = vmatpush1.bf16.msra.mxu1 %v11204_v16  ;;  %v9794_v61 = vpack.c.bf16 %v10038_v3, %v10036_v13  ;;  %6968 = vmatprep.subr.bf16.mxu0 %v11209_v19  ;;  %v11216_v19 = vld [vmem:[%s12142_s6 + $0x14b8] ss:$48 sps:$4 sm:$0xff]  }
 0x36e   : > { %9978 = vst [vmem:[%s12992_s1 + $0x40] sm:$0xff] %v9774_v25   ;;  %9974 = vst [vmem:[%s12992_s1 + $0x20] sm:$0xff] %v9754_v31   ;;  %6946 = vmatmul.mubr.bf16.gmra.mrb[60].mxu0 %v12550_v32  ;;  %7260 = vmatprep.subr.bf16.mxu1 %v11212_v34  ;;  %v6416_v10 = vpop.f32.mrb[36].mxu0  ;;  %v11213_v25 = vld [vmem:[%s12142_s6 + $0x14b0] ss:$48 sps:$4 sm:$0xff]  }
 0x36f   : > { %9982 = vst [vmem:[%s12992_s1 + $0x60] sm:$0xff] %v9794_v61   ;;  %7238 = vmatmul.mubr.bf16.gmra.mrb[60].mxu1 %v12550_v32  ;;  %6988 = vmatprep.mubr.bf16.mxu0 %v12506_v27  ;;  %v6708_v16 = vpop.f32.mrb[36].mxu1  ;;  %v6418_v3 = vpop.f32.mrb[37].mxu0  ;;  %v10023_v17 = vadd.f32 %v6416_v10, %v12959_v7  ;;  %v11224_v31 = vld [vmem:[%s12142_s6 + $0x151c] ss:$48 sps:$4 sm:$0xff]  }
 0x370   : > { %6969 = vmatpush1.bf16.msra.mxu0 %v11207_v24  ;;  %7280 = vmatprep.mubr.bf16.mxu1 %v12506_v27  ;;  %v6710_v14 = vpop.f32.mrb[37].mxu1  ;;  %v6420_v9 = vpop.f32.mrb[38].mxu0  ;;  %v10039_v24 = vadd.f32 %v6708_v16, %v12964_v56  ;;  %v10024_v29 = vadd.f32 %v6418_v3, %v12967_v50  ;;  %v11219_v16 = vld [vmem:[%s12142_s6 + $0x1510] ss:$48 sps:$4 sm:$0xff]  }
 0x371   : > { %7261 = vmatpush1.bf16.msra.mxu1 %v11210_v62  ;;  %6970 = vmatprep.subr.bf16.mxu0 %v11215_v53  ;;  %v10025_v22 = vadd.f32 %v6420_v9, %v12959_v7  ;;  %v6712_v23 = vpop.f32.mrb[38].mxu1  ;;  %v6422_v42 = vpop.f32.mrb[39].mxu0  ;;  %v10040_v61 = vadd.f32 %v6710_v14, %v12974_v49  ;;  %v11222_v9 = vld [vmem:[%s12142_s6 + $0x1518] ss:$48 sps:$4 sm:$0xff]  }
 0x372   : > { %7262 = vmatprep.subr.bf16.mxu1 %v11218_v12  ;;  %v10041_v34 = vadd.f32 %v6712_v23, %v12964_v56  ;;  %v10026_v13 = vadd.f32 %v6422_v42, %v12967_v50  ;;  %v6714_v11 = vpop.f32.mrb[39].mxu1  ;;  %v11227_v23 = vld [vmem:[%s12142_s6 + $0x1574] ss:$48 sps:$4 sm:$0xff]  }
 0x373   : > { %v9739_v62 = vpack.c.bf16 %v10025_v22, %v10023_v17  ;;  %v10042_v53 = vadd.f32 %v6714_v11, %v12974_v49  ;;  %v11230_v17 = vld [vmem:[%s12142_s6 + $0x157c] ss:$48 sps:$4 sm:$0xff]  }
 0x374   : > { %v9779_v10 = vpack.c.bf16 %v10041_v34, %v10039_v24  ;;  %6971 = vmatpush1.bf16.msra.mxu0 %v11213_v25  ;;  %v9759_v12 = vpack.c.bf16 %v10026_v13, %v10024_v29  ;;  %v11225_v24 = vld [vmem:[%s12142_s6 + $0x1570] ss:$48 sps:$4 sm:$0xff]  }
 0x375   : > { %9971 = vst [vmem:[%s12992_s1 + $0x8] sm:$0xff] %v9739_v62   ;;  %7263 = vmatpush1.bf16.msra.mxu1 %v11216_v19  ;;  %v9799_v3 = vpack.c.bf16 %v10042_v53, %v10040_v61  ;;  %6972 = vmatprep.subr.bf16.mxu0 %v11221_v47  ;;  %v11228_v47 = vld [vmem:[%s12142_s6 + $0x1578] ss:$48 sps:$4 sm:$0xff]  }
 0x376   : > { %9979 = vst [vmem:[%s12992_s1 + $0x48] sm:$0xff] %v9779_v10   ;;  %9975 = vst [vmem:[%s12992_s1 + $0x28] sm:$0xff] %v9759_v12   ;;  %7264 = vmatprep.subr.bf16.mxu1 %v11224_v31  ;;  %v6426_v14 = vpop.f32.mrb[40].mxu0  ;;  %v11233_v31 = vld [vmem:[%s12142_s6 + $0x15d4] ss:$48 sps:$4 sm:$0xff]  }
 0x377   : > { %9983 = vst [vmem:[%s12992_s1 + $0x68] sm:$0xff] %v9799_v3   ;;  %v6718_v22 = vpop.f32.mrb[40].mxu1  ;;  %v6428_v42 = vpop.f32.mrb[41].mxu0  ;;  %v10027_v19 = vadd.f32 %v6426_v14, %v12959_v7 }
 0x378   : > { %6973 = vmatpush1.bf16.msra.mxu0 %v11219_v16  ;;  %v6720_v25 = vpop.f32.mrb[41].mxu1  ;;  %v6430_v29 = vpop.f32.mrb[42].mxu0  ;;  %v10043_v61 = vadd.f32 %v6718_v22, %v12964_v56  ;;  %v10028_v62 = vadd.f32 %v6428_v42, %v12967_v50  ;;  %v11236_v16 = vld [vmem:[%s12142_s6 + $0x15dc] ss:$48 sps:$4 sm:$0xff]   ;;  %v11231_v22 = vld [vmem:[%s12142_s6 + $0x15d0] ss:$48 sps:$4 sm:$0xff]  }
 0x379   : > { %7265 = vmatpush1.bf16.msra.mxu1 %v11222_v9  ;;  %6974 = vmatprep.subr.bf16.mxu0 %v11227_v23  ;;  %v10029_v34 = vadd.f32 %v6430_v29, %v12959_v7  ;;  %v6722_v13 = vpop.f32.mrb[42].mxu1  ;;  %v6432_v11 = vpop.f32.mrb[43].mxu0  ;;  %v10044_v3 = vadd.f32 %v6720_v25, %v12974_v49  ;;  %v11234_v29 = vld [vmem:[%s12142_s6 + $0x15d8] ss:$48 sps:$4 sm:$0xff]  }
 0x37a   : > { %7266 = vmatprep.subr.bf16.mxu1 %v11230_v17  ;;  %v10045_v53 = vadd.f32 %v6722_v13, %v12964_v56  ;;  %v10030_v10 = vadd.f32 %v6432_v11, %v12967_v50  ;;  %v6724_v12 = vpop.f32.mrb[43].mxu1  ;;  %v11239_v13 = vld [vmem:[%s12142_s6 + $0x1634] ss:$48 sps:$4 sm:$0xff]  }
 0x37b   : > { %v9744_v9 = vpack.c.bf16 %v10029_v34, %v10027_v19  ;;  %v10046_v23 = vadd.f32 %v6724_v12, %v12974_v49  ;;  %v11242_v19 = vld [vmem:[%s12142_s6 + $0x163c] ss:$48 sps:$4 sm:$0xff]  }
 0x37c   : > { %v9784_v14 = vpack.c.bf16 %v10045_v53, %v10043_v61  ;;  %6975 = vmatpush1.bf16.msra.mxu0 %v11225_v24  ;;  %v9764_v17 = vpack.c.bf16 %v10030_v10, %v10028_v62  ;;  %v11237_v61 = vld [vmem:[%s12142_s6 + $0x1630] ss:$48 sps:$4 sm:$0xff]  }
 0x37d   : > { %9972 = vst [vmem:[%s12992_s1 + $0x10] sm:$0xff] %v9744_v9   ;;  %7267 = vmatpush1.bf16.msra.mxu1 %v11228_v47  ;;  %v9804_v42 = vpack.c.bf16 %v10046_v23, %v10044_v3  ;;  %6976 = vmatprep.subr.bf16.mxu0 %v11233_v31  ;;  %v11240_v31 = vld [vmem:[%s12142_s6 + $0x1638] ss:$48 sps:$4 sm:$0xff]  }
 0x37e   : > { %9980 = vst [vmem:[%s12992_s1 + $0x50] sm:$0xff] %v9784_v14   ;;  %9976 = vst [vmem:[%s12992_s1 + $0x30] sm:$0xff] %v9764_v17   ;;  %7268 = vmatprep.subr.bf16.mxu1 %v11236_v16  ;;  %v6436_v25 = vpop.f32.mrb[44].mxu0  ;;  %v11245_v16 = vld [vmem:[%s12142_s6 + $0x1694] ss:$48 sps:$4 sm:$0xff]  }
 0x37f   : > { %9984 = vst [vmem:[%s12992_s1 + $0x70] sm:$0xff] %v9804_v42   ;;  %v6728_v34 = vpop.f32.mrb[44].mxu1  ;;  %v6438_v11 = vpop.f32.mrb[45].mxu0  ;;  %v10031_v47 = vadd.f32 %v6436_v25, %v12959_v7 }
 0x380   : > { %6977 = vmatpush1.bf16.msra.mxu0 %v11231_v22  ;;  %v6730_v24 = vpop.f32.mrb[45].mxu1  ;;  %v6440_v62 = vpop.f32.mrb[46].mxu0  ;;  %v10047_v3 = vadd.f32 %v6728_v34, %v12964_v56  ;;  %v10032_v9 = vadd.f32 %v6438_v11, %v12967_v50  ;;  %v11251_v34 = vld [vmem:[%s12142_s6 + $0x16f4] ss:$48 sps:$4 sm:$0xff]   ;;  %v11249_v11 = vld [vmem:[%s12142_s6 + $0x16f0] ss:$48 sps:$4 sm:$0xff]  }
 0x381   : > { %7269 = vmatpush1.bf16.msra.mxu1 %v11234_v29  ;;  %6978 = vmatprep.subr.bf16.mxu0 %v11239_v13  ;;  %v10033_v53 = vadd.f32 %v6440_v62, %v12959_v7  ;;  %v6732_v10 = vpop.f32.mrb[46].mxu1  ;;  %v6442_v12 = vpop.f32.mrb[47].mxu0  ;;  %v11248_v7 = vld [vmem:[%s12142_s6 + $0x169c] ss:$48 sps:$4 sm:$0xff]   ;;  %v10048_v22 = vadd.f32 %v6730_v24, %v12974_v49  ;;  %v11252_v24 = vld [vmem:[%s12142_s6 + $0x16f8] ss:$48 sps:$4 sm:$0xff]  }
 0x382   : > { %7270 = vmatprep.subr.bf16.mxu1 %v11242_v19  ;;  %v10049_v23 = vadd.f32 %v6732_v10, %v12964_v56  ;;  %v10034_v14 = vadd.f32 %v6442_v12, %v12967_v50  ;;  %v6734_v17 = vpop.f32.mrb[47].mxu1  ;;  %v11243_v19 = vld [vmem:[%s12142_s6 + $0x1690] ss:$48 sps:$4 sm:$0xff]   ;;  %v11246_v50 = vld [vmem:[%s12142_s6 + $0x1698] ss:$48 sps:$4 sm:$0xff]  }
 0x383   : > { %v9749_v42 = vpack.c.bf16 %v10033_v53, %v10031_v47  ;;  %v10050_v29 = vadd.f32 %v6734_v17, %v12974_v49  ;;  %v11254_v49 = vld [vmem:[%s12142_s6 + $0x16fc] ss:$48 sps:$4 sm:$0xff]   ;;  %v11255_v47 = vld [vmem:[%s12142_s6 + $0x1750] ss:$48 sps:$4 sm:$0xff]   ;;  %v11263_v53 = vld [vmem:[%s12142_s6 + $0x17b4] ss:$48 sps:$4 sm:$0xff]  }
 0x384   : > { %v9789_v13 = vpack.c.bf16 %v10049_v23, %v10047_v3  ;;  %6979 = vmatpush1.bf16.msra.mxu0 %v11237_v61  ;;  %v9769_v25 = vpack.c.bf16 %v10034_v14, %v10032_v9  ;;  %v11257_v61 = vld [vmem:[%s12142_s6 + $0x1754] ss:$48 sps:$4 sm:$0xff]   ;;  %v11260_v62 = vld [vmem:[%s12142_s6 + $0x175c] ss:$48 sps:$4 sm:$0xff]   ;;  %v11261_v12 = vld [vmem:[%s12142_s6 + $0x17b0] ss:$48 sps:$4 sm:$0xff]  }
 0x385   : > { %9973 = vst [vmem:[%s12992_s1 + $0x18] sm:$0xff] %v9749_v42   ;;  %7271 = vmatpush1.bf16.msra.mxu1 %v11240_v31  ;;  %v9809_v56 = vpack.c.bf16 %v10050_v29, %v10048_v22  ;;  %6980 = vmatprep.subr.bf16.mxu0 %v11245_v16  ;;  %v11258_v31 = vld [vmem:[%s12142_s6 + $0x1758] ss:$48 sps:$4 sm:$0xff]   ;;  %v11266_v10 = vld [vmem:[%s12142_s6 + $0x17bc] ss:$48 sps:$4 sm:$0xff]  }
 0x386   : > { %9981 = vst [vmem:[%s12992_s1 + $0x58] sm:$0xff] %v9789_v13   ;;  %9977 = vst [vmem:[%s12992_s1 + $0x38] sm:$0xff] %v9769_v25   ;;  %7272 = vmatprep.subr.bf16.mxu1 %v11248_v7  ;;  %v11264_v16 = vld [vmem:[%s12142_s6 + $0x17b8] ss:$48 sps:$4 sm:$0xff]   ;;  %v11269_v3 = vld [vmem:[%s12142_s6 + $0x24] ss:$48 sps:$4 sm:$0xff]  }
 0x387   : > { %9985 = vst [vmem:[%s12992_s1 + $0x78] sm:$0xff] %v9809_v56   ;;  %v11272_v9 = vld [vmem:[%s12142_s6 + $0x2c] ss:$48 sps:$4 sm:$0xff]   ;;  %v11267_v23 = vld [vmem:[%s12142_s6 + $0x20] ss:$48 sps:$4 sm:$0xff]  }
 0x388   : > { %6981 = vmatpush1.bf16.msra.mxu0 %v11243_v19  ;;  %v11270_v14 = vld [vmem:[%s12142_s6 + $0x28] ss:$48 sps:$4 sm:$0xff]   ;;  %v11275_v17 = vld [vmem:[%s12142_s6 + $0x84] ss:$48 sps:$4 sm:$0xff]   ;;  %v11278_v7 = vld [vmem:[%s12142_s6 + $0x8c] ss:$48 sps:$4 sm:$0xff]  }
 0x389   : > { %7273 = vmatpush1.bf16.msra.mxu1 %v11246_v50  ;;  %6982 = vmatprep.subr.bf16.mxu0 %v11251_v34  ;;  %v11273_v22 = vld [vmem:[%s12142_s6 + $0x80] ss:$48 sps:$4 sm:$0xff]   ;;  %v11276_v42 = vld [vmem:[%s12142_s6 + $0x88] ss:$48 sps:$4 sm:$0xff]   ;;  %v11281_v29 = vld [vmem:[%s12142_s6 + $0xe4] ss:$48 sps:$4 sm:$0xff]  }
 0x38a   : > { %7274 = vmatprep.subr.bf16.mxu1 %v11254_v49  ;;  %v11284_v13 = vld [vmem:[%s12142_s6 + $0xec] ss:$48 sps:$4 sm:$0xff]   ;;  %v11279_v25 = vld [vmem:[%s12142_s6 + $0xe0] ss:$48 sps:$4 sm:$0xff]   ;;  %v11282_v19 = vld [vmem:[%s12142_s6 + $0xe8] ss:$48 sps:$4 sm:$0xff]  }
 0x38b   : > { %v11287_v56 = vld [vmem:[%s12142_s6 + $0x144] ss:$48 sps:$4 sm:$0xff]   ;;  %v11290_v50 = vld [vmem:[%s12142_s6 + $0x14c] ss:$48 sps:$4 sm:$0xff]   ;;  %v11285_v34 = vld [vmem:[%s12142_s6 + $0x140] ss:$48 sps:$4 sm:$0xff]  }
 0x38c   : > { %6983 = vmatpush1.bf16.msra.mxu0 %v11249_v11  ;;  %v11288_v49 = vld [vmem:[%s12142_s6 + $0x148] ss:$48 sps:$4 sm:$0xff]   ;;  %v11293_v11 = vld [vmem:[%s12142_s6 + $0x1a4] ss:$48 sps:$4 sm:$0xff]  }
 0x38d   : > { %7275 = vmatpush1.bf16.msra.mxu1 %v11252_v24  ;;  %6984 = vmatprep.subr.bf16.mxu0 %v11257_v61  ;;  %v11296_v24 = vld [vmem:[%s12142_s6 + $0x1ac] ss:$48 sps:$4 sm:$0xff]   ;;  %v11291_v61 = vld [vmem:[%s12142_s6 + $0x1a0] ss:$48 sps:$4 sm:$0xff]  }
 0x38e   : > { %7276 = vmatprep.subr.bf16.mxu1 %v11260_v62  ;;  %v11294_v62 = vld [vmem:[%s12142_s6 + $0x1a8] ss:$48 sps:$4 sm:$0xff]  }
 0x390   : > { %6985 = vmatpush1.bf16.msra.mxu0 %v11255_v47  ;;  %v11299_v47 = vld [vmem:[%s12142_s6 + $0x204] ss:$48 sps:$4 sm:$0xff]  }
 0x391   : > { %7277 = vmatpush1.bf16.msra.mxu1 %v11258_v31  ;;  %6986 = vmatprep.subr.bf16.mxu0 %v11263_v53  ;;  %v11302_v31 = vld [vmem:[%s12142_s6 + $0x20c] ss:$48 sps:$4 sm:$0xff]   ;;  %v11297_v53 = vld [vmem:[%s12142_s6 + $0x200] ss:$48 sps:$4 sm:$0xff]  }
 0x392   : > { %7278 = vmatprep.subr.bf16.mxu1 %v11266_v10  ;;  %v11300_v10 = vld [vmem:[%s12142_s6 + $0x208] ss:$48 sps:$4 sm:$0xff]  }
 0x394   : > { %6987 = vmatpush1.bf16.msra.mxu0 %v11261_v12  ;;  %v11305_v12 = vld [vmem:[%s12142_s6 + $0x264] ss:$48 sps:$4 sm:$0xff]  }
 0x395   : > { %7279 = vmatpush1.bf16.msra.mxu1 %v11264_v16  ;;  %7321 = vmatprep.subr.bf16.mxu0 %v11269_v3  ;;  %v11308_v16 = vld [vmem:[%s12142_s6 + $0x26c] ss:$48 sps:$4 sm:$0xff]   ;;  %v11303_v3 = vld [vmem:[%s12142_s6 + $0x260] ss:$48 sps:$4 sm:$0xff]  }
 0x396   : > { %7613 = vmatprep.subr.bf16.mxu1 %v11272_v9  ;;  %v11306_v9 = vld [vmem:[%s12142_s6 + $0x268] ss:$48 sps:$4 sm:$0xff]  }
 0x397   : > { %6989 = vmatmul.mubr.bf16.vlgmr.msra.gmra.mrb[48].mxu0 %v12500_v55 }
 0x398   : > { %7281 = vmatmul.mubr.bf16.vlgmr.msra.gmra.mrb[48].mxu1 %v12500_v55  ;;  %6998 = vmatprep.mubr.bf16.mxu0 %v12534_v57 }
 0x399   : > { %7290 = vmatprep.mubr.bf16.mxu1 %v12534_v57  ;;  %7322 = vmatpush1.bf16.msra.mxu0 %v11267_v23  ;;  %v11311_v23 = vld [vmem:[%s12142_s6 + $0x2c4] ss:$48 sps:$4 sm:$0xff]  }
 0x39a   : > { %7614 = vmatpush1.bf16.msra.mxu1 %v11270_v14  ;;  %7323 = vmatprep.subr.bf16.mxu0 %v11275_v17  ;;  %v11314_v14 = vld [vmem:[%s12142_s6 + $0x2cc] ss:$48 sps:$4 sm:$0xff]   ;;  %v11309_v17 = vld [vmem:[%s12142_s6 + $0x2c0] ss:$48 sps:$4 sm:$0xff]  }
 0x39b   : > { %7615 = vmatprep.subr.bf16.mxu1 %v11278_v7  ;;  %v11312_v7 = vld [vmem:[%s12142_s6 + $0x2c8] ss:$48 sps:$4 sm:$0xff]  }
 0x39d   : > { %7324 = vmatpush1.bf16.msra.mxu0 %v11273_v22  ;;  %v11317_v22 = vld [vmem:[%s12142_s6 + $0x324] ss:$48 sps:$4 sm:$0xff]  }
 0x39e   : > { %7616 = vmatpush1.bf16.msra.mxu1 %v11276_v42  ;;  %7325 = vmatprep.subr.bf16.mxu0 %v11281_v29  ;;  %v11320_v42 = vld [vmem:[%s12142_s6 + $0x32c] ss:$48 sps:$4 sm:$0xff]   ;;  %v11315_v29 = vld [vmem:[%s12142_s6 + $0x320] ss:$48 sps:$4 sm:$0xff]  }
 0x39f   : > { %6999 = vmatmul.mubr.bf16.gmra.mrb[52].mxu0 %v12528_v48  ;;  %7617 = vmatprep.subr.bf16.mxu1 %v11284_v13  ;;  %v11318_v13 = vld [vmem:[%s12142_s6 + $0x328] ss:$48 sps:$4 sm:$0xff]  }
 0x3a0   : > { %7291 = vmatmul.mubr.bf16.gmra.mrb[52].mxu1 %v12528_v48  ;;  %7008 = vmatprep.mubr.bf16.mxu0 %v12562_v52 }
 0x3a1   : > { %7300 = vmatprep.mubr.bf16.mxu1 %v12562_v52  ;;  %7326 = vmatpush1.bf16.msra.mxu0 %v11279_v25  ;;  %v11323_v25 = vld [vmem:[%s12142_s6 + $0x384] ss:$48 sps:$4 sm:$0xff]  }
 0x3a2   : > { %7618 = vmatpush1.bf16.msra.mxu1 %v11282_v19  ;;  %7327 = vmatprep.subr.bf16.mxu0 %v11287_v56  ;;  %v11321_v19 = vld [vmem:[%s12142_s6 + $0x380] ss:$48 sps:$4 sm:$0xff]   ;;  %v11324_v56 = vld [vmem:[%s12142_s6 + $0x388] ss:$48 sps:$4 sm:$0xff]  }
 0x3a3   : > { %7619 = vmatprep.subr.bf16.mxu1 %v11290_v50  ;;  %v11329_v50 = vld [vmem:[%s12142_s6 + $0x3e4] ss:$48 sps:$4 sm:$0xff]  }
 0x3a5   : > { %7328 = vmatpush1.bf16.msra.mxu0 %v11285_v34  ;;  %v11332_v34 = vld [vmem:[%s12142_s6 + $0x3ec] ss:$48 sps:$4 sm:$0xff]  }
 0x3a6   : > { %7620 = vmatpush1.bf16.msra.mxu1 %v11288_v49  ;;  %7329 = vmatprep.subr.bf16.mxu0 %v11293_v11  ;;  %v11327_v49 = vld [vmem:[%s12142_s6 + $0x3e0] ss:$48 sps:$4 sm:$0xff]   ;;  %v11330_v11 = vld [vmem:[%s12142_s6 + $0x3e8] ss:$48 sps:$4 sm:$0xff]  }
 0x3a7   : > { %7009 = vmatmul.mubr.bf16.gmra.mrb[56].mxu0 %v12556_v40  ;;  %7621 = vmatprep.subr.bf16.mxu1 %v11296_v24  ;;  %v11335_v24 = vld [vmem:[%s12142_s6 + $0x444] ss:$48 sps:$4 sm:$0xff]  }
 0x3a8   : > { %7301 = vmatmul.mubr.bf16.gmra.mrb[56].mxu1 %v12556_v40  ;;  %7018 = vmatprep.mubr.bf16.mxu0 %v12582_v37 }
 0x3a9   : > { %7310 = vmatprep.mubr.bf16.mxu1 %v12582_v37  ;;  %7330 = vmatpush1.bf16.msra.mxu0 %v11291_v61  ;;  %v11338_v61 = vld [vmem:[%s12142_s6 + $0x44c] ss:$48 sps:$4 sm:$0xff]  }
 0x3aa   : > { %7622 = vmatpush1.bf16.msra.mxu1 %v11294_v62  ;;  %7331 = vmatprep.subr.bf16.mxu0 %v11299_v47  ;;  %v11333_v62 = vld [vmem:[%s12142_s6 + $0x440] ss:$48 sps:$4 sm:$0xff]   ;;  %v11336_v47 = vld [vmem:[%s12142_s6 + $0x448] ss:$48 sps:$4 sm:$0xff]  }
 0x3ab   : > { %7623 = vmatprep.subr.bf16.mxu1 %v11302_v31  ;;  %v11341_v31 = vld [vmem:[%s12142_s6 + $0x4a4] ss:$48 sps:$4 sm:$0xff]  }
 0x3ad   : > { %7332 = vmatpush1.bf16.msra.mxu0 %v11297_v53  ;;  %v11344_v53 = vld [vmem:[%s12142_s6 + $0x4ac] ss:$48 sps:$4 sm:$0xff]  }
 0x3ae   : > { %7624 = vmatpush1.bf16.msra.mxu1 %v11300_v10  ;;  %7333 = vmatprep.subr.bf16.mxu0 %v11305_v12  ;;  %v11339_v10 = vld [vmem:[%s12142_s6 + $0x4a0] ss:$48 sps:$4 sm:$0xff]   ;;  %v11342_v12 = vld [vmem:[%s12142_s6 + $0x4a8] ss:$48 sps:$4 sm:$0xff]  }
 0x3af   : > { %7019 = vmatmul.mubr.bf16.gmra.mrb[60].mxu0 %v12578_v28  ;;  %7625 = vmatprep.subr.bf16.mxu1 %v11308_v16  ;;  %v11347_v16 = vld [vmem:[%s12142_s6 + $0x504] ss:$48 sps:$4 sm:$0xff]  }
 0x3b0   : > { %7311 = vmatmul.mubr.bf16.gmra.mrb[60].mxu1 %v12578_v28  ;;  %7353 = vmatprep.mubr.bf16.mxu0 %v12294_v60 }
 0x3b1   : > { %7334 = vmatpush1.bf16.msra.mxu0 %v11303_v3  ;;  %7645 = vmatprep.mubr.bf16.mxu1 %v12294_v60  ;;  %v11326_v60 = vld [vmem:[%s12142_s6 + $0x38c] ss:$48 sps:$4 sm:$0xff]  }
 0x3b2   : > { %7626 = vmatpush1.bf16.msra.mxu1 %v11306_v9  ;;  %7335 = vmatprep.subr.bf16.mxu0 %v11311_v23  ;;  %v11350_v3 = vld [vmem:[%s12142_s6 + $0x50c] ss:$48 sps:$4 sm:$0xff]   ;;  %v11345_v9 = vld [vmem:[%s12142_s6 + $0x500] ss:$48 sps:$4 sm:$0xff]   ;;  %v11348_v23 = vld [vmem:[%s12142_s6 + $0x508] ss:$48 sps:$4 sm:$0xff]  }
 0x3b3   : > { %7627 = vmatprep.subr.bf16.mxu1 %v11314_v14  ;;  %v11353_v14 = vld [vmem:[%s12142_s6 + $0x564] ss:$48 sps:$4 sm:$0xff]  }
 0x3b5   : > { %7336 = vmatpush1.bf16.msra.mxu0 %v11309_v17  ;;  %v11356_v17 = vld [vmem:[%s12142_s6 + $0x56c] ss:$48 sps:$4 sm:$0xff]  }
 0x3b6   : > { %7628 = vmatpush1.bf16.msra.mxu1 %v11312_v7  ;;  %7337 = vmatprep.subr.bf16.mxu0 %v11317_v22  ;;  %v11351_v7 = vld [vmem:[%s12142_s6 + $0x560] ss:$48 sps:$4 sm:$0xff]   ;;  %v11354_v22 = vld [vmem:[%s12142_s6 + $0x568] ss:$48 sps:$4 sm:$0xff]  }
 0x3b7   : > { %7629 = vmatprep.subr.bf16.mxu1 %v11320_v42  ;;  %v11359_v42 = vld [vmem:[%s12142_s6 + $0x5c4] ss:$48 sps:$4 sm:$0xff]  }
 0x3b9   : > { %7338 = vmatpush1.bf16.msra.mxu0 %v11315_v29  ;;  %v11362_v29 = vld [vmem:[%s12142_s6 + $0x5cc] ss:$48 sps:$4 sm:$0xff]  }
 0x3ba   : > { %7630 = vmatpush1.bf16.msra.mxu1 %v11318_v13  ;;  %7339 = vmatprep.subr.bf16.mxu0 %v11323_v25  ;;  %v11357_v13 = vld [vmem:[%s12142_s6 + $0x5c0] ss:$48 sps:$4 sm:$0xff]   ;;  %v11360_v25 = vld [vmem:[%s12142_s6 + $0x5c8] ss:$48 sps:$4 sm:$0xff]  }
 0x3bb   : > { %7631 = vmatprep.subr.bf16.mxu1 %v11326_v60  ;;  %v11365_v60 = vld [vmem:[%s12142_s6 + $0x624] ss:$48 sps:$4 sm:$0xff]  }
 0x3bd   : > { %7340 = vmatpush1.bf16.msra.mxu0 %v11321_v19  ;;  %v11368_v19 = vld [vmem:[%s12142_s6 + $0x62c] ss:$48 sps:$4 sm:$0xff]  }
 0x3be   : > { %7632 = vmatpush1.bf16.msra.mxu1 %v11324_v56  ;;  %7341 = vmatprep.subr.bf16.mxu0 %v11329_v50  ;;  %v11363_v56 = vld [vmem:[%s12142_s6 + $0x620] ss:$48 sps:$4 sm:$0xff]   ;;  %v11366_v50 = vld [vmem:[%s12142_s6 + $0x628] ss:$48 sps:$4 sm:$0xff]  }
 0x3bf   : > { %7633 = vmatprep.subr.bf16.mxu1 %v11332_v34  ;;  %v11371_v34 = vld [vmem:[%s12142_s6 + $0x684] ss:$48 sps:$4 sm:$0xff]  }
 0x3c1   : > { %7342 = vmatpush1.bf16.msra.mxu0 %v11327_v49  ;;  %v11374_v49 = vld [vmem:[%s12142_s6 + $0x68c] ss:$48 sps:$4 sm:$0xff]  }
 0x3c2   : > { %7634 = vmatpush1.bf16.msra.mxu1 %v11330_v11  ;;  %7343 = vmatprep.subr.bf16.mxu0 %v11335_v24  ;;  %v11369_v11 = vld [vmem:[%s12142_s6 + $0x680] ss:$48 sps:$4 sm:$0xff]   ;;  %v11372_v24 = vld [vmem:[%s12142_s6 + $0x688] ss:$48 sps:$4 sm:$0xff]  }
 0x3c3   : > { %7635 = vmatprep.subr.bf16.mxu1 %v11338_v61  ;;  %v11377_v61 = vld [vmem:[%s12142_s6 + $0x6e4] ss:$48 sps:$4 sm:$0xff]  }
 0x3c5   : > { %7344 = vmatpush1.bf16.msra.mxu0 %v11333_v62  ;;  %v11380_v62 = vld [vmem:[%s12142_s6 + $0x6ec] ss:$48 sps:$4 sm:$0xff]  }
 0x3c6   : > { %7636 = vmatpush1.bf16.msra.mxu1 %v11336_v47  ;;  %7345 = vmatprep.subr.bf16.mxu0 %v11341_v31  ;;  %v11375_v47 = vld [vmem:[%s12142_s6 + $0x6e0] ss:$48 sps:$4 sm:$0xff]   ;;  %v11383_v31 = vld [vmem:[%s12142_s6 + $0x744] ss:$48 sps:$4 sm:$0xff]  }
 0x3c7   : > { %7637 = vmatprep.subr.bf16.mxu1 %v11344_v53  ;;  %v11381_v53 = vld [vmem:[%s12142_s6 + $0x740] ss:$48 sps:$4 sm:$0xff]  }
 0x3c9   : > { %7346 = vmatpush1.bf16.msra.mxu0 %v11339_v10  ;;  %v11384_v10 = vld [vmem:[%s12142_s6 + $0x748] ss:$48 sps:$4 sm:$0xff]  }
 0x3ca   : > { %7638 = vmatpush1.bf16.msra.mxu1 %v11342_v12  ;;  %7347 = vmatprep.subr.bf16.mxu0 %v11347_v16  ;;  %v11389_v12 = vld [vmem:[%s12142_s6 + $0x7a4] ss:$48 sps:$4 sm:$0xff]   ;;  %v11392_v16 = vld [vmem:[%s12142_s6 + $0x7ac] ss:$48 sps:$4 sm:$0xff]  }
 0x3cb   : > { %7639 = vmatprep.subr.bf16.mxu1 %v11350_v3  ;;  %v11387_v3 = vld [vmem:[%s12142_s6 + $0x7a0] ss:$48 sps:$4 sm:$0xff]  }
 0x3cd   : > { %7348 = vmatpush1.bf16.msra.mxu0 %v11345_v9  ;;  %v11395_v9 = vld [vmem:[%s12142_s6 + $0x804] ss:$48 sps:$4 sm:$0xff]  }
 0x3ce   : > { %7640 = vmatpush1.bf16.msra.mxu1 %v11348_v23  ;;  %7349 = vmatprep.subr.bf16.mxu0 %v11353_v14  ;;  %v11393_v23 = vld [vmem:[%s12142_s6 + $0x800] ss:$48 sps:$4 sm:$0xff]   ;;  %v11396_v14 = vld [vmem:[%s12142_s6 + $0x808] ss:$48 sps:$4 sm:$0xff]  }
 0x3cf   : > { %7641 = vmatprep.subr.bf16.mxu1 %v11356_v17  ;;  %v11401_v17 = vld [vmem:[%s12142_s6 + $0x864] ss:$48 sps:$4 sm:$0xff]  }
 0x3d1   : > { %7350 = vmatpush1.bf16.msra.mxu0 %v11351_v7  ;;  %v11404_v7 = vld [vmem:[%s12142_s6 + $0x86c] ss:$48 sps:$4 sm:$0xff]  }
 0x3d2   : > { %7642 = vmatpush1.bf16.msra.mxu1 %v11354_v22  ;;  %7351 = vmatprep.subr.bf16.mxu0 %v11359_v42  ;;  %v11399_v22 = vld [vmem:[%s12142_s6 + $0x860] ss:$48 sps:$4 sm:$0xff]   ;;  %v11407_v42 = vld [vmem:[%s12142_s6 + $0x8c4] ss:$48 sps:$4 sm:$0xff]  }
 0x3d3   : > { %7643 = vmatprep.subr.bf16.mxu1 %v11362_v29  ;;  %v11405_v29 = vld [vmem:[%s12142_s6 + $0x8c0] ss:$48 sps:$4 sm:$0xff]  }
 0x3d5   : > { %7352 = vmatpush1.bf16.msra.mxu0 %v11357_v13  ;;  %v11408_v13 = vld [vmem:[%s12142_s6 + $0x8c8] ss:$48 sps:$4 sm:$0xff]  }
 0x3d6   : > { %7644 = vmatpush1.bf16.msra.mxu1 %v11360_v25  ;;  %7394 = vmatprep.subr.bf16.mxu0 %v11365_v60  ;;  %v11413_v25 = vld [vmem:[%s12142_s6 + $0x924] ss:$48 sps:$4 sm:$0xff]   ;;  %v11416_v60 = vld [vmem:[%s12142_s6 + $0x92c] ss:$48 sps:$4 sm:$0xff]  }
 0x3d7   : > { %7686 = vmatprep.subr.bf16.mxu1 %v11368_v19  ;;  %v11414_v19 = vld [vmem:[%s12142_s6 + $0x928] ss:$48 sps:$4 sm:$0xff]  }
 0x3d8   : > { %7354 = vmatmul.mubr.bf16.vlgmr.msra.gmra.mrb[64].mxu0 %v12289_v8 }
 0x3d9   : > { %7646 = vmatmul.mubr.bf16.vlgmr.msra.gmra.mrb[64].mxu1 %v12289_v8  ;;  %7363 = vmatprep.mubr.bf16.mxu0 %v12324_v18  ;;  %v11378_v8 = vld [vmem:[%s12142_s6 + $0x6e8] ss:$48 sps:$4 sm:$0xff]  }
 0x3da   : > { %7395 = vmatpush1.bf16.msra.mxu0 %v11363_v56  ;;  %7655 = vmatprep.mubr.bf16.mxu1 %v12324_v18  ;;  %v11386_v18 = vld [vmem:[%s12142_s6 + $0x74c] ss:$48 sps:$4 sm:$0xff]   ;;  %v11419_v56 = vld [vmem:[%s12142_s6 + $0x984] ss:$48 sps:$4 sm:$0xff]  }
 0x3db   : > { %7687 = vmatpush1.bf16.msra.mxu1 %v11366_v50  ;;  %7396 = vmatprep.subr.bf16.mxu0 %v11371_v34  ;;  %v11417_v50 = vld [vmem:[%s12142_s6 + $0x980] ss:$48 sps:$4 sm:$0xff]   ;;  %v11420_v34 = vld [vmem:[%s12142_s6 + $0x988] ss:$48 sps:$4 sm:$0xff]  }
 0x3dc   : > { %7688 = vmatprep.subr.bf16.mxu1 %v11374_v49  ;;  %v11425_v49 = vld [vmem:[%s12142_s6 + $0x9e4] ss:$48 sps:$4 sm:$0xff]  }
 0x3de   : > { %7397 = vmatpush1.bf16.msra.mxu0 %v11369_v11  ;;  %v11428_v11 = vld [vmem:[%s12142_s6 + $0x9ec] ss:$48 sps:$4 sm:$0xff]  }
 0x3df   : > { %7689 = vmatpush1.bf16.msra.mxu1 %v11372_v24  ;;  %7398 = vmatprep.subr.bf16.mxu0 %v11377_v61  ;;  %v11423_v24 = vld [vmem:[%s12142_s6 + $0x9e0] ss:$48 sps:$4 sm:$0xff]   ;;  %v11426_v61 = vld [vmem:[%s12142_s6 + $0x9e8] ss:$48 sps:$4 sm:$0xff]  }
 0x3e0   : > { %7364 = vmatmul.mubr.bf16.gmra.mrb[68].mxu0 %v12321_v15  ;;  %7690 = vmatprep.subr.bf16.mxu1 %v11380_v62  ;;  %v11431_v62 = vld [vmem:[%s12142_s6 + $0xa44] ss:$48 sps:$4 sm:$0xff]  }
 0x3e1   : > { %7656 = vmatmul.mubr.bf16.gmra.mrb[68].mxu1 %v12321_v15  ;;  %7373 = vmatprep.mubr.bf16.mxu0 %v12352_v4  ;;  %v11390_v15 = vld [vmem:[%s12142_s6 + $0x7a8] ss:$48 sps:$4 sm:$0xff]  }
 0x3e2   : > { %7399 = vmatpush1.bf16.msra.mxu0 %v11375_v47  ;;  %7665 = vmatprep.mubr.bf16.mxu1 %v12352_v4  ;;  %v11398_v4 = vld [vmem:[%s12142_s6 + $0x80c] ss:$48 sps:$4 sm:$0xff]  }
 0x3e3   : > { %7691 = vmatpush1.bf16.msra.mxu1 %v11378_v8  ;;  %7400 = vmatprep.subr.bf16.mxu0 %v11383_v31  ;;  %v11434_v47 = vld [vmem:[%s12142_s6 + $0xa4c] ss:$48 sps:$4 sm:$0xff]   ;;  %v11429_v8 = vld [vmem:[%s12142_s6 + $0xa40] ss:$48 sps:$4 sm:$0xff]   ;;  %v11432_v31 = vld [vmem:[%s12142_s6 + $0xa48] ss:$48 sps:$4 sm:$0xff]  }
 0x3e4   : > { %7692 = vmatprep.subr.bf16.mxu1 %v11386_v18  ;;  %v11437_v18 = vld [vmem:[%s12142_s6 + $0xaa4] ss:$48 sps:$4 sm:$0xff]  }
 0x3e6   : > { %7401 = vmatpush1.bf16.msra.mxu0 %v11381_v53  ;;  %v11440_v53 = vld [vmem:[%s12142_s6 + $0xaac] ss:$48 sps:$4 sm:$0xff]  }
 0x3e7   : > { %7693 = vmatpush1.bf16.msra.mxu1 %v11384_v10  ;;  %7402 = vmatprep.subr.bf16.mxu0 %v11389_v12  ;;  %v11435_v10 = vld [vmem:[%s12142_s6 + $0xaa0] ss:$48 sps:$4 sm:$0xff]   ;;  %v11438_v12 = vld [vmem:[%s12142_s6 + $0xaa8] ss:$48 sps:$4 sm:$0xff]  }
 0x3e8   : > { %7374 = vmatmul.mubr.bf16.gmra.mrb[72].mxu0 %v12349_v54  ;;  %7694 = vmatprep.subr.bf16.mxu1 %v11392_v16  ;;  %v11443_v16 = vld [vmem:[%s12142_s6 + $0xb04] ss:$48 sps:$4 sm:$0xff]  }
 0x3e9   : > { %7666 = vmatmul.mubr.bf16.gmra.mrb[72].mxu1 %v12349_v54  ;;  %7383 = vmatprep.mubr.bf16.mxu0 %v12380_v45  ;;  %v11402_v54 = vld [vmem:[%s12142_s6 + $0x868] ss:$48 sps:$4 sm:$0xff]  }
 0x3ea   : > { %7403 = vmatpush1.bf16.msra.mxu0 %v11387_v3  ;;  %7675 = vmatprep.mubr.bf16.mxu1 %v12380_v45  ;;  %v11410_v45 = vld [vmem:[%s12142_s6 + $0x8cc] ss:$48 sps:$4 sm:$0xff]  }
 0x3eb   : > { %7695 = vmatpush1.bf16.msra.mxu1 %v11390_v15  ;;  %7404 = vmatprep.subr.bf16.mxu0 %v11395_v9  ;;  %v11446_v3 = vld [vmem:[%s12142_s6 + $0xb0c] ss:$48 sps:$4 sm:$0xff]   ;;  %v11441_v15 = vld [vmem:[%s12142_s6 + $0xb00] ss:$48 sps:$4 sm:$0xff]   ;;  %v11444_v9 = vld [vmem:[%s12142_s6 + $0xb08] ss:$48 sps:$4 sm:$0xff]  }
 0x3ec   : > { %7696 = vmatprep.subr.bf16.mxu1 %v11398_v4  ;;  %v11449_v4 = vld [vmem:[%s12142_s6 + $0xb64] ss:$48 sps:$4 sm:$0xff]  }
 0x3ee   : > { %7405 = vmatpush1.bf16.msra.mxu0 %v11393_v23  ;;  %v11452_v23 = vld [vmem:[%s12142_s6 + $0xb6c] ss:$48 sps:$4 sm:$0xff]  }
 0x3ef   : > { %7697 = vmatpush1.bf16.msra.mxu1 %v11396_v14  ;;  %7406 = vmatprep.subr.bf16.mxu0 %v11401_v17  ;;  %v11447_v14 = vld [vmem:[%s12142_s6 + $0xb60] ss:$48 sps:$4 sm:$0xff]   ;;  %v11450_v17 = vld [vmem:[%s12142_s6 + $0xb68] ss:$48 sps:$4 sm:$0xff]  }
 0x3f0   : > { %7384 = vmatmul.mubr.bf16.gmra.mrb[76].mxu0 %v12377_v21  ;;  %7698 = vmatprep.subr.bf16.mxu1 %v11404_v7  ;;  %v11455_v7 = vld [vmem:[%s12142_s6 + $0xbc4] ss:$48 sps:$4 sm:$0xff]  }
 0x3f1   : > { %7676 = vmatmul.mubr.bf16.gmra.mrb[76].mxu1 %v12377_v21  ;;  %7426 = vmatprep.mubr.bf16.mxu0 %v12337_v30  ;;  %v11411_v21 = vld [vmem:[%s12142_s6 + $0x920] ss:$48 sps:$4 sm:$0xff]  }
 0x3f2   : > { %7407 = vmatpush1.bf16.msra.mxu0 %v11399_v22  ;;  %7718 = vmatprep.mubr.bf16.mxu1 %v12337_v30  ;;  %v11422_v30 = vld [vmem:[%s12142_s6 + $0x98c] ss:$48 sps:$4 sm:$0xff]  }
 0x3f3   : > { %7699 = vmatpush1.bf16.msra.mxu1 %v11402_v54  ;;  %7408 = vmatprep.subr.bf16.mxu0 %v11407_v42  ;;  %v11458_v22 = vld [vmem:[%s12142_s6 + $0xbcc] ss:$48 sps:$4 sm:$0xff]   ;;  %v11453_v54 = vld [vmem:[%s12142_s6 + $0xbc0] ss:$48 sps:$4 sm:$0xff]   ;;  %v11456_v42 = vld [vmem:[%s12142_s6 + $0xbc8] ss:$48 sps:$4 sm:$0xff]  }
 0x3f4   : > { %7700 = vmatprep.subr.bf16.mxu1 %v11410_v45  ;;  %v11461_v45 = vld [vmem:[%s12142_s6 + $0xc24] ss:$48 sps:$4 sm:$0xff]  }
 0x3f6   : > { %7409 = vmatpush1.bf16.msra.mxu0 %v11405_v29  ;;  %v11464_v29 = vld [vmem:[%s12142_s6 + $0xc2c] ss:$48 sps:$4 sm:$0xff]  }
 0x3f7   : > { %7701 = vmatpush1.bf16.msra.mxu1 %v11408_v13  ;;  %7410 = vmatprep.subr.bf16.mxu0 %v11413_v25  ;;  %v11459_v13 = vld [vmem:[%s12142_s6 + $0xc20] ss:$48 sps:$4 sm:$0xff]   ;;  %v11462_v25 = vld [vmem:[%s12142_s6 + $0xc28] ss:$48 sps:$4 sm:$0xff]  }
 0x3f8   : > { %7702 = vmatprep.subr.bf16.mxu1 %v11416_v60  ;;  %v11467_v60 = vld [vmem:[%s12142_s6 + $0xc84] ss:$48 sps:$4 sm:$0xff]  }
 0x3fa   : > { %7411 = vmatpush1.bf16.msra.mxu0 %v11411_v21  ;;  %v11470_v21 = vld [vmem:[%s12142_s6 + $0xc8c] ss:$48 sps:$4 sm:$0xff]  }
 0x3fb   : > { %7703 = vmatpush1.bf16.msra.mxu1 %v11414_v19  ;;  %7412 = vmatprep.subr.bf16.mxu0 %v11419_v56  ;;  %v11465_v19 = vld [vmem:[%s12142_s6 + $0xc80] ss:$48 sps:$4 sm:$0xff]   ;;  %v11468_v56 = vld [vmem:[%s12142_s6 + $0xc88] ss:$48 sps:$4 sm:$0xff]  }
 0x3fc   : > { %7704 = vmatprep.subr.bf16.mxu1 %v11422_v30  ;;  %v11473_v30 = vld [vmem:[%s12142_s6 + $0xce4] ss:$48 sps:$4 sm:$0xff]  }
 0x3fe   : > { %7413 = vmatpush1.bf16.msra.mxu0 %v11417_v50  ;;  %v11476_v50 = vld [vmem:[%s12142_s6 + $0xcec] ss:$48 sps:$4 sm:$0xff]  }
 0x3ff   : > { %7705 = vmatpush1.bf16.msra.mxu1 %v11420_v34  ;;  %7414 = vmatprep.subr.bf16.mxu0 %v11425_v49  ;;  %v11471_v34 = vld [vmem:[%s12142_s6 + $0xce0] ss:$48 sps:$4 sm:$0xff]   ;;  %v11479_v49 = vld [vmem:[%s12142_s6 + $0xd44] ss:$48 sps:$4 sm:$0xff]  }
 0x400   : > { %7706 = vmatprep.subr.bf16.mxu1 %v11428_v11  ;;  %v11477_v11 = vld [vmem:[%s12142_s6 + $0xd40] ss:$48 sps:$4 sm:$0xff]  }
 0x402   : > { %7415 = vmatpush1.bf16.msra.mxu0 %v11423_v24  ;;  %v11480_v24 = vld [vmem:[%s12142_s6 + $0xd48] ss:$48 sps:$4 sm:$0xff]  }
 0x403   : > { %7707 = vmatpush1.bf16.msra.mxu1 %v11426_v61  ;;  %7416 = vmatprep.subr.bf16.mxu0 %v11431_v62  ;;  %v11485_v61 = vld [vmem:[%s12142_s6 + $0xda4] ss:$48 sps:$4 sm:$0xff]   ;;  %v11488_v62 = vld [vmem:[%s12142_s6 + $0xdac] ss:$48 sps:$4 sm:$0xff]  }
 0x404   : > { %7708 = vmatprep.subr.bf16.mxu1 %v11434_v47  ;;  %v11483_v47 = vld [vmem:[%s12142_s6 + $0xda0] ss:$48 sps:$4 sm:$0xff]  }
 0x406   : > { %7417 = vmatpush1.bf16.msra.mxu0 %v11429_v8  ;;  %v11491_v8 = vld [vmem:[%s12142_s6 + $0xe04] ss:$48 sps:$4 sm:$0xff]  }
 0x407   : > { %7709 = vmatpush1.bf16.msra.mxu1 %v11432_v31  ;;  %7418 = vmatprep.subr.bf16.mxu0 %v11437_v18  ;;  %v11489_v31 = vld [vmem:[%s12142_s6 + $0xe00] ss:$48 sps:$4 sm:$0xff]   ;;  %v11492_v18 = vld [vmem:[%s12142_s6 + $0xe08] ss:$48 sps:$4 sm:$0xff]  }
 0x408   : > { %7710 = vmatprep.subr.bf16.mxu1 %v11440_v53  ;;  %v11497_v53 = vld [vmem:[%s12142_s6 + $0xe64] ss:$48 sps:$4 sm:$0xff]  }
 0x40a   : > { %7419 = vmatpush1.bf16.msra.mxu0 %v11435_v10  ;;  %v11500_v10 = vld [vmem:[%s12142_s6 + $0xe6c] ss:$48 sps:$4 sm:$0xff]  }
 0x40b   : > { %7711 = vmatpush1.bf16.msra.mxu1 %v11438_v12  ;;  %7420 = vmatprep.subr.bf16.mxu0 %v11443_v16  ;;  %v11495_v12 = vld [vmem:[%s12142_s6 + $0xe60] ss:$48 sps:$4 sm:$0xff]   ;;  %v11503_v16 = vld [vmem:[%s12142_s6 + $0xec4] ss:$48 sps:$4 sm:$0xff]  }
 0x40c   : > { %7712 = vmatprep.subr.bf16.mxu1 %v11446_v3  ;;  %v11501_v3 = vld [vmem:[%s12142_s6 + $0xec0] ss:$48 sps:$4 sm:$0xff]  }
 0x40e   : > { %7421 = vmatpush1.bf16.msra.mxu0 %v11441_v15  ;;  %v11504_v15 = vld [vmem:[%s12142_s6 + $0xec8] ss:$48 sps:$4 sm:$0xff]  }
 0x40f   : > { %7713 = vmatpush1.bf16.msra.mxu1 %v11444_v9  ;;  %7422 = vmatprep.subr.bf16.mxu0 %v11449_v4  ;;  %v11509_v9 = vld [vmem:[%s12142_s6 + $0xf24] ss:$48 sps:$4 sm:$0xff]   ;;  %v11512_v4 = vld [vmem:[%s12142_s6 + $0xf2c] ss:$48 sps:$4 sm:$0xff]  }
 0x410   : > { %7714 = vmatprep.subr.bf16.mxu1 %v11452_v23  ;;  %v11510_v23 = vld [vmem:[%s12142_s6 + $0xf28] ss:$48 sps:$4 sm:$0xff]  }
 0x412   : > { %7423 = vmatpush1.bf16.msra.mxu0 %v11447_v14  ;;  %v11515_v14 = vld [vmem:[%s12142_s6 + $0xf84] ss:$48 sps:$4 sm:$0xff]  }
 0x413   : > { %7715 = vmatpush1.bf16.msra.mxu1 %v11450_v17  ;;  %7424 = vmatprep.subr.bf16.mxu0 %v11455_v7  ;;  %v11513_v17 = vld [vmem:[%s12142_s6 + $0xf80] ss:$48 sps:$4 sm:$0xff]   ;;  %v11516_v7 = vld [vmem:[%s12142_s6 + $0xf88] ss:$48 sps:$4 sm:$0xff]  }
 0x414   : > { %7716 = vmatprep.subr.bf16.mxu1 %v11458_v22  ;;  %v11521_v22 = vld [vmem:[%s12142_s6 + $0xfe4] ss:$48 sps:$4 sm:$0xff]  }
 0x416   : > { %7425 = vmatpush1.bf16.msra.mxu0 %v11453_v54  ;;  %v11524_v54 = vld [vmem:[%s12142_s6 + $0xfec] ss:$48 sps:$4 sm:$0xff]  }
 0x417   : > { %7717 = vmatpush1.bf16.msra.mxu1 %v11456_v42  ;;  %7467 = vmatprep.subr.bf16.mxu0 %v11461_v45  ;;  %v11519_v42 = vld [vmem:[%s12142_s6 + $0xfe0] ss:$48 sps:$4 sm:$0xff]   ;;  %v11522_v45 = vld [vmem:[%s12142_s6 + $0xfe8] ss:$48 sps:$4 sm:$0xff]  }
 0x418   : > { %7759 = vmatprep.subr.bf16.mxu1 %v11464_v29  ;;  %v11527_v29 = vld [vmem:[%s12142_s6 + $0x1044] ss:$48 sps:$4 sm:$0xff]  }
 0x419   : > { %7427 = vmatmul.mubr.bf16.vlgmr.msra.gmra.mrb[64].mxu0 %v12332_v26 }
 0x41a   : > { %7719 = vmatmul.mubr.bf16.vlgmr.msra.gmra.mrb[64].mxu1 %v12332_v26  ;;  %7436 = vmatprep.mubr.bf16.mxu0 %v12365_v5  ;;  %v11474_v26 = vld [vmem:[%s12142_s6 + $0xce8] ss:$48 sps:$4 sm:$0xff]  }
 0x41b   : > { %7468 = vmatpush1.bf16.msra.mxu0 %v11459_v13  ;;  %7728 = vmatprep.mubr.bf16.mxu1 %v12365_v5  ;;  %v11482_v5 = vld [vmem:[%s12142_s6 + $0xd4c] ss:$48 sps:$4 sm:$0xff]  }
 0x41c   : > { %7760 = vmatpush1.bf16.msra.mxu1 %v11462_v25  ;;  %7469 = vmatprep.subr.bf16.mxu0 %v11467_v60  ;;  %v11530_v13 = vld [vmem:[%s12142_s6 + $0x104c] ss:$48 sps:$4 sm:$0xff]   ;;  %v11525_v25 = vld [vmem:[%s12142_s6 + $0x1040] ss:$48 sps:$4 sm:$0xff]   ;;  %v11528_v60 = vld [vmem:[%s12142_s6 + $0x1048] ss:$48 sps:$4 sm:$0xff]  }
 0x41d   : > { %7761 = vmatprep.subr.bf16.mxu1 %v11470_v21  ;;  %v11533_v21 = vld [vmem:[%s12142_s6 + $0x10a4] ss:$48 sps:$4 sm:$0xff]  }
 0x41f   : > { %7470 = vmatpush1.bf16.msra.mxu0 %v11465_v19  ;;  %v11536_v19 = vld [vmem:[%s12142_s6 + $0x10ac] ss:$48 sps:$4 sm:$0xff]  }
 0x420   : > { %7762 = vmatpush1.bf16.msra.mxu1 %v11468_v56  ;;  %7471 = vmatprep.subr.bf16.mxu0 %v11473_v30  ;;  %v11531_v56 = vld [vmem:[%s12142_s6 + $0x10a0] ss:$48 sps:$4 sm:$0xff]   ;;  %v11534_v30 = vld [vmem:[%s12142_s6 + $0x10a8] ss:$48 sps:$4 sm:$0xff]  }
 0x421   : > { %7437 = vmatmul.mubr.bf16.gmra.mrb[68].mxu0 %v12360_v1  ;;  %7763 = vmatprep.subr.bf16.mxu1 %v11476_v50  ;;  %v11539_v50 = vld [vmem:[%s12142_s6 + $0x1104] ss:$48 sps:$4 sm:$0xff]  }
 0x422   : > { %7729 = vmatmul.mubr.bf16.gmra.mrb[68].mxu1 %v12360_v1  ;;  %7446 = vmatprep.mubr.bf16.mxu0 %v12394_v36  ;;  %v11486_v1 = vld [vmem:[%s12142_s6 + $0xda8] ss:$48 sps:$4 sm:$0xff]  }
 0x423   : > { %7472 = vmatpush1.bf16.msra.mxu0 %v11471_v34  ;;  %7738 = vmatprep.mubr.bf16.mxu1 %v12394_v36  ;;  %v11494_v36 = vld [vmem:[%s12142_s6 + $0xe0c] ss:$48 sps:$4 sm:$0xff]  }
 0x424   : > { %7764 = vmatpush1.bf16.msra.mxu1 %v11474_v26  ;;  %7473 = vmatprep.subr.bf16.mxu0 %v11479_v49  ;;  %v11542_v34 = vld [vmem:[%s12142_s6 + $0x110c] ss:$48 sps:$4 sm:$0xff]   ;;  %v11537_v26 = vld [vmem:[%s12142_s6 + $0x1100] ss:$48 sps:$4 sm:$0xff]   ;;  %v11540_v49 = vld [vmem:[%s12142_s6 + $0x1108] ss:$48 sps:$4 sm:$0xff]  }
 0x425   : > { %7765 = vmatprep.subr.bf16.mxu1 %v11482_v5  ;;  %v11545_v5 = vld [vmem:[%s12142_s6 + $0x1164] ss:$48 sps:$4 sm:$0xff]  }
 0x427   : > { %7474 = vmatpush1.bf16.msra.mxu0 %v11477_v11  ;;  %v11548_v11 = vld [vmem:[%s12142_s6 + $0x116c] ss:$48 sps:$4 sm:$0xff]  }
 0x428   : > { %7766 = vmatpush1.bf16.msra.mxu1 %v11480_v24  ;;  %7475 = vmatprep.subr.bf16.mxu0 %v11485_v61  ;;  %v11543_v24 = vld [vmem:[%s12142_s6 + $0x1160] ss:$48 sps:$4 sm:$0xff]   ;;  %v11546_v61 = vld [vmem:[%s12142_s6 + $0x1168] ss:$48 sps:$4 sm:$0xff]  }
 0x429   : > { %7447 = vmatmul.mubr.bf16.gmra.mrb[72].mxu0 %v12390_v35  ;;  %7767 = vmatprep.subr.bf16.mxu1 %v11488_v62  ;;  %v11551_v62 = vld [vmem:[%s12142_s6 + $0x11c4] ss:$48 sps:$4 sm:$0xff]  }
 0x42a   : > { %7739 = vmatmul.mubr.bf16.gmra.mrb[72].mxu1 %v12390_v35  ;;  %7456 = vmatprep.mubr.bf16.mxu0 %v12412_v2  ;;  %v11498_v35 = vld [vmem:[%s12142_s6 + $0xe68] ss:$48 sps:$4 sm:$0xff]  }
 0x42b   : > { %7476 = vmatpush1.bf16.msra.mxu0 %v11483_v47  ;;  %7748 = vmatprep.mubr.bf16.mxu1 %v12412_v2  ;;  %v11506_v2 = vld [vmem:[%s12142_s6 + $0xecc] ss:$48 sps:$4 sm:$0xff]  }
 0x42c   : > { %7768 = vmatpush1.bf16.msra.mxu1 %v11486_v1  ;;  %7477 = vmatprep.subr.bf16.mxu0 %v11491_v8  ;;  %v11554_v47 = vld [vmem:[%s12142_s6 + $0x11cc] ss:$48 sps:$4 sm:$0xff]   ;;  %v11549_v1 = vld [vmem:[%s12142_s6 + $0x11c0] ss:$48 sps:$4 sm:$0xff]   ;;  %v11552_v8 = vld [vmem:[%s12142_s6 + $0x11c8] ss:$48 sps:$4 sm:$0xff]  }
 0x42d   : > { %7769 = vmatprep.subr.bf16.mxu1 %v11494_v36  ;;  %v11557_v36 = vld [vmem:[%s12142_s6 + $0x1224] ss:$48 sps:$4 sm:$0xff]  }
 0x42f   : > { %7478 = vmatpush1.bf16.msra.mxu0 %v11489_v31  ;;  %v11560_v31 = vld [vmem:[%s12142_s6 + $0x122c] ss:$48 sps:$4 sm:$0xff]  }
 0x430   : > { %7770 = vmatpush1.bf16.msra.mxu1 %v11492_v18  ;;  %7479 = vmatprep.subr.bf16.mxu0 %v11497_v53  ;;  %v11555_v18 = vld [vmem:[%s12142_s6 + $0x1220] ss:$48 sps:$4 sm:$0xff]   ;;  %v11558_v53 = vld [vmem:[%s12142_s6 + $0x1228] ss:$48 sps:$4 sm:$0xff]  }
 0x431   : > { %7457 = vmatmul.mubr.bf16.gmra.mrb[76].mxu0 %v12410_v63  ;;  %7771 = vmatprep.subr.bf16.mxu1 %v11500_v10  ;;  %v11563_v10 = vld [vmem:[%s12142_s6 + $0x1284] ss:$48 sps:$4 sm:$0xff]  }
 0x432   : > { %7749 = vmatmul.mubr.bf16.gmra.mrb[76].mxu1 %v12410_v63  ;;  %7499 = vmatprep.mubr.bf16.mxu0 %v12464_v0  ;;  %v11507_v63 = vld [vmem:[%s12142_s6 + $0xf20] ss:$48 sps:$4 sm:$0xff]  }
 0x433   : > { %7480 = vmatpush1.bf16.msra.mxu0 %v11495_v12  ;;  %7791 = vmatprep.mubr.bf16.mxu1 %v12464_v0  ;;  %v11518_v0 = vld [vmem:[%s12142_s6 + $0xf8c] ss:$48 sps:$4 sm:$0xff]  }
 0x434   : > { %7772 = vmatpush1.bf16.msra.mxu1 %v11498_v35  ;;  %7481 = vmatprep.subr.bf16.mxu0 %v11503_v16  ;;  %v11566_v12 = vld [vmem:[%s12142_s6 + $0x128c] ss:$48 sps:$4 sm:$0xff]   ;;  %v11561_v35 = vld [vmem:[%s12142_s6 + $0x1280] ss:$48 sps:$4 sm:$0xff]   ;;  %v11564_v16 = vld [vmem:[%s12142_s6 + $0x1288] ss:$48 sps:$4 sm:$0xff]  }
 0x435   : > { %7773 = vmatprep.subr.bf16.mxu1 %v11506_v2  ;;  %v11569_v2 = vld [vmem:[%s12142_s6 + $0x12e4] ss:$48 sps:$4 sm:$0xff]  }
 0x437   : > { %7482 = vmatpush1.bf16.msra.mxu0 %v11501_v3  ;;  %v11572_v3 = vld [vmem:[%s12142_s6 + $0x12ec] ss:$48 sps:$4 sm:$0xff]  }
 0x438   : > { %7774 = vmatpush1.bf16.msra.mxu1 %v11504_v15  ;;  %7483 = vmatprep.subr.bf16.mxu0 %v11509_v9  ;;  %v11567_v15 = vld [vmem:[%s12142_s6 + $0x12e0] ss:$48 sps:$4 sm:$0xff]   ;;  %v11575_v9 = vld [vmem:[%s12142_s6 + $0x1344] ss:$48 sps:$4 sm:$0xff]  }
 0x439   : > { %7775 = vmatprep.subr.bf16.mxu1 %v11512_v4  ;;  %v11573_v4 = vld [vmem:[%s12142_s6 + $0x1340] ss:$48 sps:$4 sm:$0xff]  }
 0x43b   : > { %7484 = vmatpush1.bf16.msra.mxu0 %v11507_v63  ;;  %v11576_v63 = vld [vmem:[%s12142_s6 + $0x1348] ss:$48 sps:$4 sm:$0xff]  }
 0x43c   : > { %7776 = vmatpush1.bf16.msra.mxu1 %v11510_v23  ;;  %7485 = vmatprep.subr.bf16.mxu0 %v11515_v14  ;;  %v11581_v23 = vld [vmem:[%s12142_s6 + $0x13a4] ss:$48 sps:$4 sm:$0xff]   ;;  %v11584_v14 = vld [vmem:[%s12142_s6 + $0x13ac] ss:$48 sps:$4 sm:$0xff]  }
 0x43d   : > { %7777 = vmatprep.subr.bf16.mxu1 %v11518_v0  ;;  %v11579_v0 = vld [vmem:[%s12142_s6 + $0x13a0] ss:$48 sps:$4 sm:$0xff]  }
 0x43f   : > { %7486 = vmatpush1.bf16.msra.mxu0 %v11513_v17  ;;  %v11651_v17 = vld [vmem:[%s12953_s16] sm:$0xff] }
 0x440   : > { %7778 = vmatpush1.bf16.msra.mxu1 %v11516_v7  ;;  %7487 = vmatprep.subr.bf16.mxu0 %v11521_v22  ;;  %v13346_v7 = vrot.slane %v11651_v17, %v495_v20 }
 0x441   : > { %7779 = vmatprep.subr.bf16.mxu1 %v11524_v54  ;;  %v13638_v54 = vsub.s32 6, %v12262_v41 }
 0x443   : > { %7488 = vmatpush1.bf16.msra.mxu0 %v11519_v42  ;;  %v13352_v42 = vrot.slane %v11651_v17, %v13638_v54 }
 0x444   : > { %7780 = vmatpush1.bf16.msra.mxu1 %v11522_v45  ;;  %7489 = vmatprep.subr.bf16.mxu0 %v11527_v29  ;;  %v13639_v45 = vsub.s32 5, %v12262_v41 }
 0x445   : > { %7781 = vmatprep.subr.bf16.mxu1 %v11530_v13  ;;  %v11590_v13 = vld [vmem:[%s12142_s6 + $0x140c] ss:$48 sps:$4 sm:$0xff]  }
 0x446   : > { %v13356_v29 = vrot.slane %v11651_v17, %v13639_v45 }
 0x447   : > { %7490 = vmatpush1.bf16.msra.mxu0 %v11525_v25 }
 0x448   : > { %7782 = vmatpush1.bf16.msra.mxu1 %v11528_v60  ;;  %7491 = vmatprep.subr.bf16.mxu0 %v11533_v21  ;;  %v13640_v60 = vsub.s32 7, %v12262_v41  ;;  %v11593_v41 = vld [vmem:[%s12142_s6 + $0x1464] ss:$48 sps:$4 sm:$0xff]  }
 0x449   : > { %7783 = vmatprep.subr.bf16.mxu1 %v11536_v19 }
 0x44a   : > { %v13363_v21 = vrot.slane %v11651_v17, %v13640_v60  ;;  %v11603_v60 = vld [vmem:[%s12142_s6 + $0x1520] ss:$48 sps:$4 sm:$0xff]  }
 0x44b   : > { %7492 = vmatpush1.bf16.msra.mxu0 %v11531_v56  ;;  %v11585_v56 = vld [vmem:[%s12142_s6 + $0x1400] ss:$48 sps:$4 sm:$0xff]  }
 0x44c   : > { %7784 = vmatpush1.bf16.msra.mxu1 %v11534_v30  ;;  %7493 = vmatprep.subr.bf16.mxu0 %v11539_v50 }
 0x44d   : > { %7785 = vmatprep.subr.bf16.mxu1 %v11542_v34 }
 0x44f   : > { %7494 = vmatpush1.bf16.msra.mxu0 %v11537_v26 }
 0x450   : > { %7786 = vmatpush1.bf16.msra.mxu1 %v11540_v49  ;;  %7495 = vmatprep.subr.bf16.mxu0 %v11545_v5 }
 0x451   : > { %7787 = vmatprep.subr.bf16.mxu1 %v11548_v11 }
 0x453   : > { %7496 = vmatpush1.bf16.msra.mxu0 %v11543_v24 }
 0x454   : > { %7788 = vmatpush1.bf16.msra.mxu1 %v11546_v61  ;;  %7497 = vmatprep.subr.bf16.mxu0 %v11551_v62  ;;  %v11596_v62 = vld [vmem:[%s12142_s6 + $0x146c] ss:$48 sps:$4 sm:$0xff]  }
 0x455   : > { %7789 = vmatprep.subr.bf16.mxu1 %v11554_v47 }
 0x457   : > { %7498 = vmatpush1.bf16.msra.mxu0 %v11549_v1 }
 0x458   : > { %7790 = vmatpush1.bf16.msra.mxu1 %v11552_v8  ;;  %7540 = vmatprep.subr.bf16.mxu0 %v11557_v36 }
 0x459   : > { %7832 = vmatprep.subr.bf16.mxu1 %v11560_v31 }
 0x45a   : > { %7500 = vmatmul.mubr.bf16.vlgmr.msra.gmra.mrb[64].mxu0 %v12462_v6 }
 0x45b   : > { %7792 = vmatmul.mubr.bf16.vlgmr.msra.gmra.mrb[64].mxu1 %v12462_v6  ;;  %7509 = vmatprep.mubr.bf16.mxu0 %v12497_v51  ;;  %v11570_v6 = vld [vmem:[%s12142_s6 + $0x12e8] ss:$48 sps:$4 sm:$0xff]  }
 0x45c   : > { %7541 = vmatpush1.bf16.msra.mxu0 %v11555_v18  ;;  %7801 = vmatprep.mubr.bf16.mxu1 %v12497_v51  ;;  %v11578_v51 = vld [vmem:[%s12142_s6 + $0x134c] ss:$48 sps:$4 sm:$0xff]   ;;  %v11591_v18 = vld [vmem:[%s12142_s6 + $0x1460] ss:$48 sps:$4 sm:$0xff]  }
 0x45d   : > { %7833 = vmatpush1.bf16.msra.mxu1 %v11558_v53  ;;  %7542 = vmatprep.subr.bf16.mxu0 %v11563_v10  ;;  %v11594_v10 = vld [vmem:[%s12142_s6 + $0x1468] ss:$48 sps:$4 sm:$0xff]  }
 0x45e   : > { %7834 = vmatprep.subr.bf16.mxu1 %v11566_v12  ;;  %v11599_v12 = vld [vmem:[%s12142_s6 + $0x14c4] ss:$48 sps:$4 sm:$0xff]  }
 0x460   : > { %7543 = vmatpush1.bf16.msra.mxu0 %v11561_v35 }
 0x461   : > { %7835 = vmatpush1.bf16.msra.mxu1 %v11564_v16  ;;  %7544 = vmatprep.subr.bf16.mxu0 %v11569_v2  ;;  %v11602_v16 = vld [vmem:[%s12142_s6 + $0x14cc] ss:$48 sps:$4 sm:$0xff]  }
 0x462   : > { %7510 = vmatmul.mubr.bf16.gmra.mrb[68].mxu0 %v12494_v46  ;;  %7836 = vmatprep.subr.bf16.mxu1 %v11572_v3 }
 0x463   : > { %7802 = vmatmul.mubr.bf16.gmra.mrb[68].mxu1 %v12494_v46  ;;  %7519 = vmatprep.mubr.bf16.mxu0 %v12525_v39  ;;  %v11582_v46 = vld [vmem:[%s12142_s6 + $0x13a8] ss:$48 sps:$4 sm:$0xff]  }
 0x464   : > { %7545 = vmatpush1.bf16.msra.mxu0 %v11567_v15  ;;  %7811 = vmatprep.mubr.bf16.mxu1 %v12525_v39  ;;  %v11587_v39 = vld [vmem:[%s12142_s6 + $0x1404] ss:$48 sps:$4 sm:$0xff]  }
 0x465   : > { %7837 = vmatpush1.bf16.msra.mxu1 %v11570_v6  ;;  %7546 = vmatprep.subr.bf16.mxu0 %v11575_v9  ;;  %v11597_v6 = vld [vmem:[%s12142_s6 + $0x14c0] ss:$48 sps:$4 sm:$0xff]  }
 0x466   : > { %7838 = vmatprep.subr.bf16.mxu1 %v11578_v51 }
 0x468   : > { %7547 = vmatpush1.bf16.msra.mxu0 %v11573_v4  ;;  %v11600_v4 = vld [vmem:[%s12142_s6 + $0x14c8] ss:$48 sps:$4 sm:$0xff]  }
 0x469   : > { %7839 = vmatpush1.bf16.msra.mxu1 %v11576_v63  ;;  %7548 = vmatprep.subr.bf16.mxu0 %v11581_v23 }
 0x46a   : > { %7520 = vmatmul.mubr.bf16.gmra.mrb[72].mxu0 %v12522_v33  ;;  %7840 = vmatprep.subr.bf16.mxu1 %v11584_v14  ;;  %v6990_v22 = vpop.f32.mrb[48].mxu0  ;;  %v11605_v14 = vld [vmem:[%s12142_s6 + $0x1524] ss:$48 sps:$4 sm:$0xff]  }
 0x46b   : > { %7812 = vmatmul.mubr.bf16.gmra.mrb[72].mxu1 %v12522_v33  ;;  %7529 = vmatprep.mubr.bf16.mxu0 %v12553_v38  ;;  %v7282_v20 = vpop.f32.mrb[48].mxu1  ;;  %v6992_v25 = vpop.f32.mrb[49].mxu0  ;;  %v10051_v50 = vadd.f32 %v6990_v22, %v13346_v7  ;;  %v11588_v33 = vld [vmem:[%s12142_s6 + $0x1408] ss:$48 sps:$4 sm:$0xff]   ;;  %v11608_v22 = vld [vmem:[%s12142_s6 + $0x152c] ss:$48 sps:$4 sm:$0xff]  }
 0x46c   : > { %7549 = vmatpush1.bf16.msra.mxu0 %v11579_v0  ;;  %7821 = vmatprep.mubr.bf16.mxu1 %v12553_v38  ;;  %v7284_v19 = vpop.f32.mrb[49].mxu1  ;;  %v6994_v30 = vpop.f32.mrb[50].mxu0  ;;  %v10067_v5 = vadd.f32 %v7282_v20, %v13352_v42  ;;  %v10052_v38 = vadd.f32 %v6992_v25, %v13356_v29 }
 0x46d   : > { %7841 = vmatpush1.bf16.msra.mxu1 %v11582_v46  ;;  %7550 = vmatprep.subr.bf16.mxu0 %v11587_v39  ;;  %v10053_v34 = vadd.f32 %v6994_v30, %v13346_v7  ;;  %v7286_v26 = vpop.f32.mrb[50].mxu1  ;;  %v6996_v49 = vpop.f32.mrb[51].mxu0  ;;  %v10068_v47 = vadd.f32 %v7284_v19, %v13363_v21  ;;  %v11611_v30 = vld [vmem:[%s12142_s6 + $0x1584] ss:$48 sps:$4 sm:$0xff]  }
 0x46e   : > { %7842 = vmatprep.subr.bf16.mxu1 %v11590_v13  ;;  %v10069_v11 = vadd.f32 %v7286_v26, %v13352_v42  ;;  %v10054_v24 = vadd.f32 %v6996_v49, %v13356_v29  ;;  %v7288_v61 = vpop.f32.mrb[51].mxu1 }
 0x46f   : > { %v9814_v1 = vpack.c.bf16 %v10053_v34, %v10051_v50  ;;  %v10070_v8 = vadd.f32 %v7288_v61, %v13363_v21 }
 0x470   : > { %v9854_v36 = vpack.c.bf16 %v10069_v11, %v10067_v5  ;;  %7551 = vmatpush1.bf16.msra.mxu0 %v11585_v56  ;;  %v9834_v31 = vpack.c.bf16 %v10054_v24, %v10052_v38  ;;  %v11606_v56 = vld [vmem:[%s12142_s6 + $0x1528] ss:$48 sps:$4 sm:$0xff]  }
 0x471   : > { %9986 = vst [vmem:[%s12992_s1 + $0x80] sm:$0xff] %v9814_v1   ;;  %7843 = vmatpush1.bf16.msra.mxu1 %v11588_v33  ;;  %v9874_v53 = vpack.c.bf16 %v10070_v8, %v10068_v47  ;;  %7552 = vmatprep.subr.bf16.mxu0 %v11593_v41  ;;  %v11614_v33 = vld [vmem:[%s12142_s6 + $0x158c] ss:$48 sps:$4 sm:$0xff]   ;;  %v11609_v41 = vld [vmem:[%s12142_s6 + $0x1580] ss:$48 sps:$4 sm:$0xff]  }
 0x472   : > { %9994 = vst [vmem:[%s12992_s1 + $0xc0] sm:$0xff] %v9854_v36   ;;  %9990 = vst [vmem:[%s12992_s1 + $0xa0] sm:$0xff] %v9834_v31   ;;  %7530 = vmatmul.mubr.bf16.gmra.mrb[76].mxu0 %v12550_v32  ;;  %7844 = vmatprep.subr.bf16.mxu1 %v11596_v62  ;;  %v7000_v35 = vpop.f32.mrb[52].mxu0  ;;  %v11612_v11 = vld [vmem:[%s12142_s6 + $0x1588] ss:$48 sps:$4 sm:$0xff]  }
 0x473   : > { %9998 = vst [vmem:[%s12992_s1 + $0xe0] sm:$0xff] %v9874_v53   ;;  %7822 = vmatmul.mubr.bf16.gmra.mrb[76].mxu1 %v12550_v32  ;;  %7572 = vmatprep.mubr.bf16.mxu0 %v12506_v27  ;;  %v7292_v2 = vpop.f32.mrb[52].mxu1  ;;  %v7002_v3 = vpop.f32.mrb[53].mxu0  ;;  %v10055_v51 = vadd.f32 %v7000_v35, %v13346_v7  ;;  %v11617_v47 = vld [vmem:[%s12142_s6 + $0x15e4] ss:$48 sps:$4 sm:$0xff]  }
 0x474   : > { %7553 = vmatpush1.bf16.msra.mxu0 %v11591_v18  ;;  %7864 = vmatprep.mubr.bf16.mxu1 %v12506_v27  ;;  %v7294_v15 = vpop.f32.mrb[53].mxu1  ;;  %v7004_v9 = vpop.f32.mrb[54].mxu0  ;;  %v10071_v0 = vadd.f32 %v7292_v2, %v13352_v42  ;;  %v10056_v27 = vadd.f32 %v7002_v3, %v13356_v29  ;;  %v11620_v53 = vld [vmem:[%s12142_s6 + $0x15ec] ss:$48 sps:$4 sm:$0xff]   ;;  %v11615_v3 = vld [vmem:[%s12142_s6 + $0x15e0] ss:$48 sps:$4 sm:$0xff]  }
 0x475   : > { %7845 = vmatpush1.bf16.msra.mxu1 %v11594_v10  ;;  %7554 = vmatprep.subr.bf16.mxu0 %v11599_v12  ;;  %v10057_v63 = vadd.f32 %v7004_v9, %v13346_v7  ;;  %v7296_v32 = vpop.f32.mrb[54].mxu1  ;;  %v7006_v23 = vpop.f32.mrb[55].mxu0  ;;  %v10072_v54 = vadd.f32 %v7294_v15, %v13363_v21  ;;  %v11623_v9 = vld [vmem:[%s12142_s6 + $0x1644] ss:$48 sps:$4 sm:$0xff]  }
 0x476   : > { %7846 = vmatprep.subr.bf16.mxu1 %v11602_v16  ;;  %v10073_v46 = vadd.f32 %v7296_v32, %v13352_v42  ;;  %v10058_v17 = vadd.f32 %v7006_v23, %v13356_v29  ;;  %v7298_v39 = vpop.f32.mrb[55].mxu1 }
 0x477   : > { %v9819_v45 = vpack.c.bf16 %v10057_v63, %v10055_v51  ;;  %v10074_v13 = vadd.f32 %v7298_v39, %v13363_v21 }
 0x478   : > { %v9859_v20 = vpack.c.bf16 %v10073_v46, %v10071_v0  ;;  %7555 = vmatpush1.bf16.msra.mxu0 %v11597_v6  ;;  %v9839_v25 = vpack.c.bf16 %v10058_v17, %v10056_v27  ;;  %v11618_v6 = vld [vmem:[%s12142_s6 + $0x15e8] ss:$48 sps:$4 sm:$0xff]  }
 0x479   : > { %9987 = vst [vmem:[%s12992_s1 + $0x88] sm:$0xff] %v9819_v45   ;;  %7847 = vmatpush1.bf16.msra.mxu1 %v11600_v4  ;;  %v9879_v19 = vpack.c.bf16 %v10074_v13, %v10072_v54  ;;  %7556 = vmatprep.subr.bf16.mxu0 %v11605_v14  ;;  %v11626_v4 = vld [vmem:[%s12142_s6 + $0x164c] ss:$48 sps:$4 sm:$0xff]   ;;  %v11621_v14 = vld [vmem:[%s12142_s6 + $0x1640] ss:$48 sps:$4 sm:$0xff]  }
 0x47a   : > { %9995 = vst [vmem:[%s12992_s1 + $0xc8] sm:$0xff] %v9859_v20   ;;  %9991 = vst [vmem:[%s12992_s1 + $0xa8] sm:$0xff] %v9839_v25   ;;  %7848 = vmatprep.subr.bf16.mxu1 %v11608_v22  ;;  %v7010_v50 = vpop.f32.mrb[56].mxu0  ;;  %v11624_v46 = vld [vmem:[%s12142_s6 + $0x1648] ss:$48 sps:$4 sm:$0xff]  }
 0x47b   : > { %9999 = vst [vmem:[%s12992_s1 + $0xe8] sm:$0xff] %v9879_v19   ;;  %v7302_v34 = vpop.f32.mrb[56].mxu1  ;;  %v7012_v26 = vpop.f32.mrb[57].mxu0  ;;  %v10059_v38 = vadd.f32 %v7010_v50, %v13346_v7  ;;  %v11629_v54 = vld [vmem:[%s12142_s6 + $0x16a4] ss:$48 sps:$4 sm:$0xff]  }
 0x47c   : > { %7557 = vmatpush1.bf16.msra.mxu0 %v11603_v60  ;;  %v7304_v49 = vpop.f32.mrb[57].mxu1  ;;  %v7014_v5 = vpop.f32.mrb[58].mxu0  ;;  %v10075_v1 = vadd.f32 %v7302_v34, %v13352_v42  ;;  %v10060_v8 = vadd.f32 %v7012_v26, %v13356_v29  ;;  %v11627_v34 = vld [vmem:[%s12142_s6 + $0x16a0] ss:$48 sps:$4 sm:$0xff]   ;;  %v11635_v26 = vld [vmem:[%s12142_s6 + $0x1704] ss:$48 sps:$4 sm:$0xff]  }
 0x47d   : > { %7849 = vmatpush1.bf16.msra.mxu1 %v11606_v56  ;;  %7558 = vmatprep.subr.bf16.mxu0 %v11611_v30  ;;  %v10061_v24 = vadd.f32 %v7014_v5, %v13346_v7  ;;  %v7306_v61 = vpop.f32.mrb[58].mxu1  ;;  %v7016_v62 = vpop.f32.mrb[59].mxu0  ;;  %v10076_v10 = vadd.f32 %v7304_v49, %v13363_v21  ;;  %v11633_v49 = vld [vmem:[%s12142_s6 + $0x1700] ss:$48 sps:$4 sm:$0xff]   ;;  %v11641_v5 = vld [vmem:[%s12142_s6 + $0x1764] ss:$48 sps:$4 sm:$0xff]  }
 0x47e   : > { %7850 = vmatprep.subr.bf16.mxu1 %v11614_v33  ;;  %v10077_v36 = vadd.f32 %v7306_v61, %v13352_v42  ;;  %v10062_v31 = vadd.f32 %v7016_v62, %v13356_v29  ;;  %v7308_v18 = vpop.f32.mrb[59].mxu1  ;;  %v11647_v61 = vld [vmem:[%s12142_s6 + $0x17c4] ss:$48 sps:$4 sm:$0xff]   ;;  %v11650_v62 = vld [vmem:[%s12142_s6 + $0x17cc] ss:$48 sps:$4 sm:$0xff]  }
 0x47f   : > { %v9824_v12 = vpack.c.bf16 %v10061_v24, %v10059_v38  ;;  %v10078_v35 = vadd.f32 %v7308_v18, %v13363_v21  ;;  %v11644_v38 = vld [vmem:[%s12142_s6 + $0x176c] ss:$48 sps:$4 sm:$0xff]   ;;  %v11642_v24 = vld [vmem:[%s12142_s6 + $0x1768] ss:$48 sps:$4 sm:$0xff]  }
 0x480   : > { %v9864_v16 = vpack.c.bf16 %v10077_v36, %v10075_v1  ;;  %7559 = vmatpush1.bf16.msra.mxu0 %v11609_v41  ;;  %v9844_v2 = vpack.c.bf16 %v10062_v31, %v10060_v8  ;;  %v11636_v41 = vld [vmem:[%s12142_s6 + $0x1708] ss:$48 sps:$4 sm:$0xff]  }
 0x481   : > { %9988 = vst [vmem:[%s12992_s1 + $0x90] sm:$0xff] %v9824_v12   ;;  %7851 = vmatpush1.bf16.msra.mxu1 %v11612_v11  ;;  %v9884_v15 = vpack.c.bf16 %v10078_v35, %v10076_v10  ;;  %7560 = vmatprep.subr.bf16.mxu0 %v11617_v47  ;;  %v11639_v11 = vld [vmem:[%s12142_s6 + $0x1760] ss:$48 sps:$4 sm:$0xff]   ;;  %v11648_v1 = vld [vmem:[%s12142_s6 + $0x17c8] ss:$48 sps:$4 sm:$0xff]  }
 0x482   : > { %9996 = vst [vmem:[%s12992_s1 + $0xd0] sm:$0xff] %v9864_v16   ;;  %9992 = vst [vmem:[%s12992_s1 + $0xb0] sm:$0xff] %v9844_v2   ;;  %7852 = vmatprep.subr.bf16.mxu1 %v11620_v53  ;;  %v7020_v51 = vpop.f32.mrb[60].mxu0  ;;  %v11645_v47 = vld [vmem:[%s12142_s6 + $0x17c0] ss:$48 sps:$4 sm:$0xff]  }
 0x483   : > { %10000 = vst [vmem:[%s12992_s1 + $0xf0] sm:$0xff] %v9884_v15   ;;  %v7312_v63 = vpop.f32.mrb[60].mxu1  ;;  %v7022_v32 = vpop.f32.mrb[61].mxu0  ;;  %v10063_v27 = vadd.f32 %v7020_v51, %v13346_v7 }
 0x484   : > { %7561 = vmatpush1.bf16.msra.mxu0 %v11615_v3  ;;  %v7314_v23 = vpop.f32.mrb[61].mxu1  ;;  %v7024_v0 = vpop.f32.mrb[62].mxu0  ;;  %v10079_v45 = vadd.f32 %v7312_v63, %v13352_v42  ;;  %v10064_v13 = vadd.f32 %v7022_v32, %v13356_v29 }
 0x485   : > { %7853 = vmatpush1.bf16.msra.mxu1 %v11618_v6  ;;  %7562 = vmatprep.subr.bf16.mxu0 %v11623_v9  ;;  %v10065_v17 = vadd.f32 %v7024_v0, %v13346_v7  ;;  %v7316_v39 = vpop.f32.mrb[62].mxu1  ;;  %v7026_v22 = vpop.f32.mrb[63].mxu0  ;;  %v11632_v7 = vld [vmem:[%s12142_s6 + $0x16ac] ss:$48 sps:$4 sm:$0xff]   ;;  %v10080_v19 = vadd.f32 %v7314_v23, %v13363_v21 }
 0x486   : > { %7854 = vmatprep.subr.bf16.mxu1 %v11626_v4  ;;  %v10081_v20 = vadd.f32 %v7316_v39, %v13352_v42  ;;  %v10066_v25 = vadd.f32 %v7026_v22, %v13356_v29  ;;  %v7318_v60 = vpop.f32.mrb[63].mxu1  ;;  %v11630_v29 = vld [vmem:[%s12142_s6 + $0x16a8] ss:$48 sps:$4 sm:$0xff]  }
 0x487   : > { %v9829_v56 = vpack.c.bf16 %v10065_v17, %v10063_v27  ;;  %v10082_v30 = vadd.f32 %v7318_v60, %v13363_v21  ;;  %v11638_v21 = vld [vmem:[%s12142_s6 + $0x170c] ss:$48 sps:$4 sm:$0xff]  }
 0x488   : > { %v9869_v50 = vpack.c.bf16 %v10081_v20, %v10079_v45  ;;  %7563 = vmatpush1.bf16.msra.mxu0 %v11621_v14  ;;  %v9849_v33 = vpack.c.bf16 %v10066_v25, %v10064_v13 }
 0x489   : > { %9989 = vst [vmem:[%s12992_s1 + $0x98] sm:$0xff] %v9829_v56   ;;  %7855 = vmatpush1.bf16.msra.mxu1 %v11624_v46  ;;  %v9889_v42 = vpack.c.bf16 %v10082_v30, %v10080_v19  ;;  %7564 = vmatprep.subr.bf16.mxu0 %v11629_v54 }
 0x48a   : > { %9997 = vst [vmem:[%s12992_s1 + $0xd8] sm:$0xff] %v9869_v50   ;;  %9993 = vst [vmem:[%s12992_s1 + $0xb8] sm:$0xff] %v9849_v33   ;;  %7856 = vmatprep.subr.bf16.mxu1 %v11632_v7 }
 0x48b   : > { %10001 = vst [vmem:[%s12992_s1 + $0xf8] sm:$0xff] %v9889_v42  }
 0x48c   : > { %7565 = vmatpush1.bf16.msra.mxu0 %v11627_v34 }
 0x48d   : > { %7857 = vmatpush1.bf16.msra.mxu1 %v11630_v29  ;;  %7566 = vmatprep.subr.bf16.mxu0 %v11635_v26 }
 0x48e   : > { %7858 = vmatprep.subr.bf16.mxu1 %v11638_v21 }
 0x490   : > { %7567 = vmatpush1.bf16.msra.mxu0 %v11633_v49 }
 0x491   : > { %7859 = vmatpush1.bf16.msra.mxu1 %v11636_v41  ;;  %7568 = vmatprep.subr.bf16.mxu0 %v11641_v5 }
 0x492   : > { %7860 = vmatprep.subr.bf16.mxu1 %v11644_v38 }
 0x494   : > { %7569 = vmatpush1.bf16.msra.mxu0 %v11639_v11 }
 0x495   : > { %7861 = vmatpush1.bf16.msra.mxu1 %v11642_v24  ;;  %7570 = vmatprep.subr.bf16.mxu0 %v11647_v61 }
 0x496   : > { %7862 = vmatprep.subr.bf16.mxu1 %v11650_v62 }
 0x498   : > { %7571 = vmatpush1.bf16.msra.mxu0 %v11645_v47 }
 0x499   : > { %7863 = vmatpush1.bf16.msra.mxu1 %v11648_v1 }
 0x49b   : > { %7573 = vmatmul.mubr.bf16.vlgmr.msra.gmra.mrb[64].mxu0 %v12500_v55 }
 0x49c   : > { %7865 = vmatmul.mubr.bf16.vlgmr.msra.gmra.mrb[64].mxu1 %v12500_v55  ;;  %7582 = vmatprep.mubr.bf16.mxu0 %v12534_v57  ;;  %v2250_v55 = vld [vmem:[%s12953_s16 + $0x8] sm:$0xf] }
 0x49d   : > { %7874 = vmatprep.mubr.bf16.mxu1 %v12534_v57  ;;  %v13476_v57 = vrot.slane %v2250_v55, %v12267_v43  ;;  %v13479_v8 = vrot.slane %v2250_v55, %v12287_v58  ;;  %v13485_v31 = vrot.slane %v2250_v55, %v12292_v59 }
 0x4a3   : > { %7583 = vmatmul.mubr.bf16.gmra.mrb[68].mxu0 %v12528_v48 }
 0x4a4   : > { %7875 = vmatmul.mubr.bf16.gmra.mrb[68].mxu1 %v12528_v48  ;;  %7592 = vmatprep.mubr.bf16.mxu0 %v12562_v52 }
 0x4a5   : > { %7884 = vmatprep.mubr.bf16.mxu1 %v12562_v52  ;;  %v13482_v52 = vrot.slane %v2250_v55, %v12270_v44 }
 0x4ab   : > { %7593 = vmatmul.mubr.bf16.gmra.mrb[72].mxu0 %v12556_v40 }
 0x4ac   : > { %7885 = vmatmul.mubr.bf16.gmra.mrb[72].mxu1 %v12556_v40  ;;  %7602 = vmatprep.mubr.bf16.mxu0 %v12582_v37 }
 0x4ad   : > { %7894 = vmatprep.mubr.bf16.mxu1 %v12582_v37 }
 0x4b3   : > { %7603 = vmatmul.mubr.bf16.gmra.mrb[76].mxu0 %v12578_v28 }
 0x4b4   : > { %7895 = vmatmul.mubr.bf16.gmra.mrb[76].mxu1 %v12578_v28 }
 0x56e   : > { %v7574_v48 = vpop.f32.mrb[64].mxu0 }
 0x56f   : > { %v7866_v40 = vpop.f32.mrb[64].mxu1  ;;  %v7576_v36 = vpop.f32.mrb[65].mxu0  ;;  %v10083_v28 = vadd.f32 %v7574_v48, %v13476_v57 }
 0x570   : > { %v7868_v37 = vpop.f32.mrb[65].mxu1  ;;  %v7578_v18 = vpop.f32.mrb[66].mxu0  ;;  %v10099_v44 = vadd.f32 %v7866_v40, %v13479_v8  ;;  %v10084_v10 = vadd.f32 %v7576_v36, %v13482_v52 }
 0x571   : > { %v10085_v43 = vadd.f32 %v7578_v18, %v13476_v57  ;;  %v7870_v53 = vpop.f32.mrb[66].mxu1  ;;  %v7580_v58 = vpop.f32.mrb[67].mxu0  ;;  %v10100_v16 = vadd.f32 %v7868_v37, %v13485_v31 }
 0x572   : > { %v10101_v12 = vadd.f32 %v7870_v53, %v13479_v8  ;;  %v10086_v59 = vadd.f32 %v7580_v58, %v13482_v52  ;;  %v7872_v35 = vpop.f32.mrb[67].mxu1 }
 0x573   : > { %v9894_v2 = vpack.c.bf16 %v10085_v43, %v10083_v28  ;;  %v10102_v3 = vadd.f32 %v7872_v35, %v13485_v31 }
 0x574   : > { %v9934_v15 = vpack.c.bf16 %v10101_v12, %v10099_v44  ;;  %v9914_v6 = vpack.c.bf16 %v10086_v59, %v10084_v10 }
 0x575   : > { %10002 = vst [vmem:[%s12992_s1 + $0x100] sm:$0xff] %v9894_v2   ;;  %v9954_v9 = vpack.c.bf16 %v10102_v3, %v10100_v16 }
 0x576   : > { %10010 = vst [vmem:[%s12992_s1 + $0x140] sm:$0xff] %v9934_v15   ;;  %10006 = vst [vmem:[%s12992_s1 + $0x120] sm:$0xff] %v9914_v6   ;;  %v7584_v51 = vpop.f32.mrb[68].mxu0 }
 0x577   : > { %10014 = vst [vmem:[%s12992_s1 + $0x160] sm:$0xff] %v9954_v9   ;;  %v7876_v4 = vpop.f32.mrb[68].mxu1  ;;  %v7586_v63 = vpop.f32.mrb[69].mxu0  ;;  %v10087_v14 = vadd.f32 %v7584_v51, %v13476_v57 }
 0x578   : > { %v7878_v32 = vpop.f32.mrb[69].mxu1  ;;  %v7588_v23 = vpop.f32.mrb[70].mxu0  ;;  %v10103_v17 = vadd.f32 %v7876_v4, %v13479_v8  ;;  %v10088_v39 = vadd.f32 %v7586_v63, %v13482_v52 }
 0x579   : > { %v10089_v0 = vadd.f32 %v7588_v23, %v13476_v57  ;;  %v7880_v27 = vpop.f32.mrb[70].mxu1  ;;  %v7590_v46 = vpop.f32.mrb[71].mxu0  ;;  %v10104_v13 = vadd.f32 %v7878_v32, %v13485_v31 }
 0x57a   : > { %v10105_v22 = vadd.f32 %v7880_v27, %v13479_v8  ;;  %v10090_v54 = vadd.f32 %v7590_v46, %v13482_v52  ;;  %v7882_v45 = vpop.f32.mrb[71].mxu1 }
 0x57b   : > { %v9899_v20 = vpack.c.bf16 %v10089_v0, %v10087_v14  ;;  %v10106_v25 = vadd.f32 %v7882_v45, %v13485_v31 }
 0x57c   : > { %v9939_v60 = vpack.c.bf16 %v10105_v22, %v10103_v17  ;;  %v9919_v7 = vpack.c.bf16 %v10090_v54, %v10088_v39 }
 0x57d   : > { %10003 = vst [vmem:[%s12992_s1 + $0x108] sm:$0xff] %v9899_v20   ;;  %v9959_v19 = vpack.c.bf16 %v10106_v25, %v10104_v13 }
 0x57e   : > { %10011 = vst [vmem:[%s12992_s1 + $0x148] sm:$0xff] %v9939_v60   ;;  %10007 = vst [vmem:[%s12992_s1 + $0x128] sm:$0xff] %v9919_v7   ;;  %v7594_v56 = vpop.f32.mrb[72].mxu0 }
 0x57f   : > { %10015 = vst [vmem:[%s12992_s1 + $0x168] sm:$0xff] %v9959_v19   ;;  %v7886_v30 = vpop.f32.mrb[72].mxu1  ;;  %v7596_v50 = vpop.f32.mrb[73].mxu0  ;;  %v10091_v42 = vadd.f32 %v7594_v56, %v13476_v57 }
 0x580   : > { %v7888_v33 = vpop.f32.mrb[73].mxu1  ;;  %v7598_v34 = vpop.f32.mrb[74].mxu0  ;;  %v10107_v49 = vadd.f32 %v7886_v30, %v13479_v8  ;;  %v10092_v41 = vadd.f32 %v7596_v50, %v13482_v52 }
 0x581   : > { %v10093_v29 = vadd.f32 %v7598_v34, %v13476_v57  ;;  %v7890_v26 = vpop.f32.mrb[74].mxu1  ;;  %v7600_v21 = vpop.f32.mrb[75].mxu0  ;;  %v10108_v24 = vadd.f32 %v7888_v33, %v13485_v31 }
 0x582   : > { %v10109_v5 = vadd.f32 %v7890_v26, %v13479_v8  ;;  %v10094_v38 = vadd.f32 %v7600_v21, %v13482_v52  ;;  %v7892_v11 = vpop.f32.mrb[75].mxu1 }
 0x583   : > { %v9904_v61 = vpack.c.bf16 %v10093_v29, %v10091_v42  ;;  %v10110_v62 = vadd.f32 %v7892_v11, %v13485_v31 }
 0x584   : > { %v9944_v47 = vpack.c.bf16 %v10109_v5, %v10107_v49  ;;  %v9924_v1 = vpack.c.bf16 %v10094_v38, %v10092_v41 }
 0x585   : > { %10004 = vst [vmem:[%s12992_s1 + $0x110] sm:$0xff] %v9904_v61   ;;  %v9964_v55 = vpack.c.bf16 %v10110_v62, %v10108_v24 }
 0x586   : > { %10012 = vst [vmem:[%s12992_s1 + $0x150] sm:$0xff] %v9944_v47   ;;  %10008 = vst [vmem:[%s12992_s1 + $0x130] sm:$0xff] %v9924_v1   ;;  %v7604_v48 = vpop.f32.mrb[76].mxu0 }
 0x587   : > { %10016 = vst [vmem:[%s12992_s1 + $0x170] sm:$0xff] %v9964_v55   ;;  %v7896_v40 = vpop.f32.mrb[76].mxu1  ;;  %v7606_v36 = vpop.f32.mrb[77].mxu0  ;;  %v10095_v28 = vadd.f32 %v7604_v48, %v13476_v57 }
 0x588   : > { %v7898_v37 = vpop.f32.mrb[77].mxu1  ;;  %v7608_v18 = vpop.f32.mrb[78].mxu0  ;;  %v10111_v44 = vadd.f32 %v7896_v40, %v13479_v8  ;;  %v10096_v10 = vadd.f32 %v7606_v36, %v13482_v52 }
 0x589   : > { %v10097_v43 = vadd.f32 %v7608_v18, %v13476_v57  ;;  %v7900_v53 = vpop.f32.mrb[78].mxu1  ;;  %v7610_v58 = vpop.f32.mrb[79].mxu0  ;;  %v10112_v57 = vadd.f32 %v7898_v37, %v13485_v31 }
 0x58a   : > { %v10113_v12 = vadd.f32 %v7900_v53, %v13479_v8  ;;  %v10098_v59 = vadd.f32 %v7610_v58, %v13482_v52  ;;  %v7902_v35 = vpop.f32.mrb[79].mxu1 }
 0x58b   : > { %v9909_v16 = vpack.c.bf16 %v10097_v43, %v10095_v28  ;;  %v10114_v2 = vadd.f32 %v7902_v35, %v13485_v31 }
 0x58c   : > { %v9949_v3 = vpack.c.bf16 %v10113_v12, %v10111_v44  ;;  %v9929_v15 = vpack.c.bf16 %v10098_v59, %v10096_v10 }
 0x58d   : > { %10005 = vst [vmem:[%s12992_s1 + $0x118] sm:$0xff] %v9909_v16   ;;  %v9969_v8 = vpack.c.bf16 %v10114_v2, %v10112_v57 }
 0x58e   : > { %10013 = vst [vmem:[%s12992_s1 + $0x158] sm:$0xff] %v9949_v3   ;;  %10009 = vst [vmem:[%s12992_s1 + $0x138] sm:$0xff] %v9929_v15  }
 0x58f   : > { %10017 = vst [vmem:[%s12992_s1 + $0x178] sm:$0xff] %v9969_v8  }
 0x590   : > { %11809 = shalt.err (!%p11806_p2)
}
 0x591   : > { %s11810_s25 = scalar_lea.hbm %s13536_s14, 6144  ;;  %s11814_s3 = scalar_lea.hbm %s13591_s5, 12288 }
 0x592   : > { %p11811_p10 = scmp.ne.s32.totalorder %s13536_s14, %s11810_s25  ;;  %p11815_p5 = scmp.lt.u32.totalorder %s13536_s14, %s13591_s5 }
 0x593   : > { %p11816_p11 = scmp.lt.u32.totalorder %s11814_s3, %s11810_s25  ;;  %p11818_p13 = scmp.lt.u32.totalorder %s11810_s25, %s13536_s14 }
 0x594   : > { %p11812_p4 = pnand %p11811_p10, %p13641_p7 }
 0x595   : > { %p11817_p3 = por %p11816_p11, %p11815_p5 }
 0x596   : > { %p11813_p0 = pneg %p11812_p4 }
 0x597   : > { %p11819_p9 = por %p11818_p13, %p11817_p3 }
 0x599   : > { %p11820_p8 = pnand %p11819_p9, %p11813_p0 }
 0x59b   : > { %11823 = shalt.err (!%p11820_p8)
}
 0x59c   : > { %s11885_s26 = smov 64   ;;  %s11886_s6 = smov 4  }
 0x59d   : > { %10424 = dma.vmem_to_hbm [thread:$0]  (%p13641_p7), %s13538_s17, 6144, %s13536_s14, %s8397_s10, %s11885_s26, %s11885_s26, %s11886_s6  }
 0x59e PF: > { %s13642_s29 = sld [smem:[#allocation16_spill]]  ;;  %s13643_s16 = sld [smem:[#allocation19_spill]] }
 0x59f   : > { %p13645_p12 = scmp.ge.s32.totalorder %s11870_s21, 2 }
 0x5a4   : > { %s8426_s18 = sand.u32 1, %s13642_s29   ;;  %p13644_p6 = scmp.ne.s32.totalorder %s13643_s16, 0 }
 0x5a5   : > { %s8427_s1 = scalar_lea.sflag [#allocation4], %s8426_s18 }
 0x5a6   : > { %p10444_p1 = pnand %p13645_p12, %p13644_p6 }
 0x5a8   : > { %11853 = dma.done.wait (!%p10444_p1), %s8427_s1, 6144  }
 0x5a9   : > { %11855 = vsyncadd (!%p10444_p1), %s8427_s1, 4294961152  ;;  %s13646_s21 = sld [smem:[#allocation17_spill]]  ;;  %s13647_s9 = sld [smem:[#allocation18_spill]] }
 0x5aa   : > { %s13648_s18 = smov %s11862_s19  ;;  %s13649_s19 = smov %s11866_s20 }
 0x5af   : > { %p20_p2 = scmp.ge.s32.totalorder %s13646_s21, 4   ;;  %s13650_s20 = smov %s13647_s9 }
 0x5b1   :  { %22 = sbr.rel (!%p20_p2) target bundleno = 10 (0xa), region = 120 }
 0x5b8   :  { %8432 = vsyncpa [#allocation3], 1 }
 0x5b9   :  { %8434 = vsyncpa [#allocation3 + $0x1], 1 }
 0x5ba   :  { %8435 = vsyncpa [#allocation6], 1 }
 0x5bb   :  { %8436 = vsyncpa [#allocation9], 1 }
 0x5bc   :  { %8438 = vsyncpa [#allocation9 + $0x1], 1 }
 0x5bd   :  { %8439 = vsyncpa [#allocation4], 1 }
 0x5be   :  { %8441 = vsyncpa [#allocation4 + $0x1], 1 }

</bundles_post_ra>
